<compile_context>
chip_gen: v7x
topology: tpu7x:2x2x1
jax: 0.10.0
libtpu: 0.0.40
codegen_flags: <defaults>
</compile_context>

<pallas_src>
import functools

import jax
import jax.numpy as jnp
from jax import lax
from jax.experimental import pallas as pl
from jax.experimental.pallas import tpu as pltpu


def _round_up(x, m):
    return -(-x // m) * m


# ----------------------------- Pallas kernels ------------------------------


def _run_lstm_layer(act_ref, xp_ref, wih_ref, whh_ref, b_ref, h0, c0):
    """One LSTM layer over the full (VMEM-resident) sequence held in act_ref.

    Reads the layer input from act_ref, overwrites act_ref[t] with this layer's
    hidden state h_t (lane-dense (Bc, Dp) stores), and returns the final (h, c).
    """
    T, Bc, Dp = act_ref.shape
    G = 4 * Dp
    wdt = wih_ref.dtype                       # bf16 (or f32) MXU compute dtype

    wih = wih_ref[0]                          # (Dp, 4Dp) fused gate columns i|f|g|o
    whh = whh_ref[0]                          # (Dp, 4Dp)
    bias = b_ref[0]                           # (1, 4Dp) f32 (b_ih + b_hh)

    # Hoisted input projection: ONE big MXU matmul for all timesteps, staged in a
    # VMEM scratch so the recurrence indexes it per step (bounded live ranges).
    # (T, Bc, Dp) -> (T*Bc, Dp) merge is tile-aligned (Bc = 8 sublanes, Dp % 128 == 0).
    x_in = act_ref[...].reshape(T * Bc, Dp)
    xp_ref[...] = (jnp.dot(x_in.astype(wdt), wih,
                           preferred_element_type=jnp.float32)
                   + bias).reshape(T, Bc, G)

    def step(t, carry):
        h, c = carry
        gates = xp_ref[t] + jnp.dot(h.astype(wdt), whh,
                                    preferred_element_type=jnp.float32)   # (Bc, 4Dp) f32
        # 2 EUP pushes on full-width vregs; slices below are 128-lane aligned.
        sg = jax.nn.sigmoid(gates)
        th = jnp.tanh(gates)
        i_g = sg[:, 0 * Dp:1 * Dp]
        f_g = sg[:, 1 * Dp:2 * Dp]
        g_g = th[:, 2 * Dp:3 * Dp]
        o_g = sg[:, 3 * Dp:4 * Dp]
        c = f_g * c + i_g * g_g
        h = o_g * jnp.tanh(c)
        act_ref[t] = h                        # lane-dense (Bc, Dp) store
        return h, c

    unroll = True if T <= 32 else 4
    return lax.fori_loop(0, T, step, (h0, c0), unroll=unroll)


def _encoder_kernel(x_ref, wih_ref, whh_ref, b_ref, hT_ref, cT_ref, act_ref, xp_ref):
    """grid = (batch_chunk [parallel], layer [arbitrary]); outputs final (h, c) per layer."""
    l = pl.program_id(1)
    _, Bc, Dp = x_ref.shape

    @pl.when(l == 0)
    def _():
        act_ref[...] = x_ref[...]             # seed the inter-layer activation buffer

    # Encoder starts from zero state: initialized in-kernel (no HBM zeros inputs).
    h0 = jnp.zeros((Bc, Dp), jnp.float32)
    c0 = jnp.zeros((Bc, Dp), jnp.float32)
    h, c = _run_lstm_layer(act_ref, xp_ref, wih_ref, whh_ref, b_ref, h0, c0)
    hT_ref[0] = h
    cT_ref[0] = c


def _decoder_kernel(x_ref, h0_ref, c0_ref, wih_ref, whh_ref, b_ref, wout_ref, bout_ref,
                    logits_ref, act_ref, xp_ref):
    """Decoder LSTM stack with the vocab projection fused into the last layer's epilogue."""
    l = pl.program_id(1)
    L = pl.num_programs(1)
    T, Bc, Dp = act_ref.shape
    Vp = logits_ref.shape[2]

    @pl.when(l == 0)
    def _():
        act_ref[...] = x_ref[...]

    h, c = _run_lstm_layer(act_ref, xp_ref, wih_ref, whh_ref, b_ref,
                           h0_ref[0], c0_ref[0])
    del h, c                                  # final decoder state unused by the model

    # Fused output-vocab projection on the last layer's VMEM-resident activations.
    @pl.when(l == L - 1)
    def _():
        y_flat = act_ref[...].reshape(T * Bc, Dp)
        wdt = wout_ref.dtype
        logits = jnp.dot(y_flat.astype(wdt), wout_ref[...],
                         preferred_element_type=jnp.float32) + bout_ref[...]
        logits_ref[...] = logits.reshape(T, Bc, Vp)


# ----------------------------- JAX wrappers --------------------------------


def _lstm_vmem_limit(T, Bc, Dp, wbytes, Vp=0):
    vmem = 0
    vmem += 2 * T * Bc * Dp * 4                   # x block (double-buffered)
    vmem += 2 * 2 * Dp * (4 * Dp) * wbytes        # wih + whh blocks (double-buffered)
    vmem += 2 * 2 * (4 * Dp) * 4                  # fused bias
    vmem += 4 * 2 * Bc * Dp * 4                   # h/c in or out blocks
    vmem += T * Bc * Dp * 4                       # act scratch
    vmem += T * Bc * (4 * Dp) * 4                 # xproj scratch
    if Vp:
        vmem += 2 * (Dp * Vp * wbytes + Vp * 4)   # vocab weights / bias
        vmem += 2 * T * Bc * Vp * 4               # logits block
    vmem += 2 << 20                               # headroom
    # Cap with v7x's 64 MiB physical VMEM in mind (v5e/v6e have 128 MiB).
    return min(max(vmem, 4 << 20), 48 << 20)


def lstm_encoder(x, wih, whh, b, *, block_b=8):
    """x: (T, Bp, Dp) f32 -> (hT, cT) each (L, Bp, Dp) f32."""
    T, Bp, Dp = x.shape
    L = wih.shape[0]
    nB = Bp // block_b
    wbytes = jnp.dtype(wih.dtype).itemsize
    return pl.pallas_call(
        _encoder_kernel,
        out_shape=(
            jax.ShapeDtypeStruct((L, Bp, Dp), jnp.float32),   # h_T per layer
            jax.ShapeDtypeStruct((L, Bp, Dp), jnp.float32),   # c_T per layer
        ),
        grid_spec=pltpu.PrefetchScalarGridSpec(
            num_scalar_prefetch=0,
            grid=(nB, L),
            in_specs=[
                pl.BlockSpec((T, block_b, Dp), lambda bb, l: (0, bb, 0)),
                pl.BlockSpec((1, Dp, 4 * Dp), lambda bb, l: (l, 0, 0)),
                pl.BlockSpec((1, Dp, 4 * Dp), lambda bb, l: (l, 0, 0)),
                pl.BlockSpec((1, 1, 4 * Dp), lambda bb, l: (l, 0, 0)),
            ],
            out_specs=[
                pl.BlockSpec((1, block_b, Dp), lambda bb, l: (l, bb, 0)),
                pl.BlockSpec((1, block_b, Dp), lambda bb, l: (l, bb, 0)),
            ],
            scratch_shapes=[
                pltpu.VMEM((T, block_b, Dp), jnp.float32),        # inter-layer activations
                pltpu.VMEM((T, block_b, 4 * Dp), jnp.float32),    # hoisted input projection
            ],
        ),
        compiler_params=pltpu.CompilerParams(
            dimension_semantics=("parallel", "arbitrary"),
            vmem_limit_bytes=_lstm_vmem_limit(T, block_b, Dp, wbytes),
        ),
        cost_estimate=pl.CostEstimate(
            flops=2 * 2 * L * T * Bp * Dp * 4 * Dp,
            transcendentals=9 * L * T * Bp * Dp,
            bytes_accessed=(4 * T * Bp * Dp + wbytes * L * 2 * Dp * 4 * Dp
                            + 4 * L * 4 * Dp + 4 * 2 * L * Bp * Dp),
        ),
    )(x, wih, whh, b)


def lstm_decoder_project(x, h0, c0, wih, whh, b, wout, bout, *, block_b=8):
    """x: (T, Bp, Dp) f32; returns logits (T, Bp, Vp) f32 (vocab proj fused in-kernel)."""
    T, Bp, Dp = x.shape
    L = wih.shape[0]
    Vp = wout.shape[1]
    nB = Bp // block_b
    wbytes = jnp.dtype(wih.dtype).itemsize
    return pl.pallas_call(
        _decoder_kernel,
        out_shape=jax.ShapeDtypeStruct((T, Bp, Vp), jnp.float32),
        grid_spec=pltpu.PrefetchScalarGridSpec(
            num_scalar_prefetch=0,
            grid=(nB, L),
            in_specs=[
                pl.BlockSpec((T, block_b, Dp), lambda bb, l: (0, bb, 0)),
                pl.BlockSpec((1, block_b, Dp), lambda bb, l: (l, bb, 0)),
                pl.BlockSpec((1, block_b, Dp), lambda bb, l: (l, bb, 0)),
                pl.BlockSpec((1, Dp, 4 * Dp), lambda bb, l: (l, 0, 0)),
                pl.BlockSpec((1, Dp, 4 * Dp), lambda bb, l: (l, 0, 0)),
                pl.BlockSpec((1, 1, 4 * Dp), lambda bb, l: (l, 0, 0)),
                pl.BlockSpec((Dp, Vp), lambda bb, l: (0, 0)),
                pl.BlockSpec((1, Vp), lambda bb, l: (0, 0)),
            ],
            out_specs=pl.BlockSpec((T, block_b, Vp), lambda bb, l: (0, bb, 0)),
            scratch_shapes=[
                pltpu.VMEM((T, block_b, Dp), jnp.float32),
                pltpu.VMEM((T, block_b, 4 * Dp), jnp.float32),
            ],
        ),
        compiler_params=pltpu.CompilerParams(
            dimension_semantics=("parallel", "arbitrary"),
            vmem_limit_bytes=_lstm_vmem_limit(T, block_b, Dp, wbytes, Vp=Vp),
        ),
        cost_estimate=pl.CostEstimate(
            flops=2 * 2 * L * T * Bp * Dp * 4 * Dp + 2 * T * Bp * Dp * Vp,
            transcendentals=9 * L * T * Bp * Dp,
            bytes_accessed=(4 * T * Bp * Dp + wbytes * L * 2 * Dp * 4 * Dp
                            + 4 * L * 4 * Dp + 4 * 2 * L * Bp * Dp
                            + wbytes * Dp * Vp + 4 * Vp + 4 * T * Bp * Vp),
        ),
    )(x, h0, c0, wih, whh, b, wout, bout)


# --------------------------- parameter creation -----------------------------


def _uniform(key, shape):
    return jax.random.uniform(key, shape, jnp.float32, minval=-0.08, maxval=0.08)


def make_params(key, n_src_words, n_tgt_words, d_model, n_layers,
                weight_dtype=jnp.bfloat16):
    """PyTorch-equivalent parameters, re-laid-out for the TPU kernels.

    LSTM weights are fused per gate (columns i|f|g|o), transposed to (D_in, 4*D) and
    lane-padded to Dp = round_up(D, 128).  weight_dtype=bf16 halves HBM/VMEM traffic on
    v6e/v7x (f32 accumulation kept); pass jnp.float32 for bit-exact f32 semantics.
    """
    D = d_model
    Dp = _round_up(D, 128)
    Vp = _round_up(n_tgt_words, 128)
    keys = iter(jax.random.split(key, 4 + 8 * n_layers))

    def fuse_w(w):                               # w: PyTorch (4D, D_in), rows i|f|g|o
        din = w.shape[1]
        wt = w.T.reshape(din, 4, D)              # (D_in, gate, D)
        wt = jnp.pad(wt, ((0, Dp - din), (0, 0), (0, Dp - D)))
        return wt.reshape(Dp, 4 * Dp).astype(weight_dtype)

    def fuse_b(b_ih, b_hh):
        bb = (b_ih + b_hh).reshape(4, D)
        bb = jnp.pad(bb, ((0, 0), (0, Dp - D)))
        return bb.reshape(1, 4 * Dp)             # keep f32

    def lstm_stack_params():
        wih, whh, bias = [], [], []
        for _ in range(n_layers):
            w_ih = _uniform(next(keys), (4 * D, D))
            w_hh = _uniform(next(keys), (4 * D, D))
            b_ih = _uniform(next(keys), (4 * D,))
            b_hh = _uniform(next(keys), (4 * D,))
            wih.append(fuse_w(w_ih))
            whh.append(fuse_w(w_hh))
            bias.append(fuse_b(b_ih, b_hh))
        return jnp.stack(wih), jnp.stack(whh), jnp.stack(bias)

    params = {}
    params["emb_src"] = jnp.pad(_uniform(next(keys), (n_src_words, D)),
                                ((0, 0), (0, Dp - D)))            # f32 activations
    params["emb_tgt"] = jnp.pad(_uniform(next(keys), (n_tgt_words, D)),
                                ((0, 0), (0, Dp - D)))
    params["enc_wih"], params["enc_whh"], params["enc_b"] = lstm_stack_params()
    params["dec_wih"], params["dec_whh"], params["dec_b"] = lstm_stack_params()
    w_out = _uniform(next(keys), (n_tgt_words, D))                # PyTorch Linear (V, D)
    b_out = _uniform(next(keys), (n_tgt_words,))
    params["wout_t"] = jnp.pad(w_out.T, ((0, Dp - D), (0, Vp - n_tgt_words))
                               ).astype(weight_dtype)             # (Dp, Vp)
    params["bout"] = jnp.pad(b_out, (0, Vp - n_tgt_words)).reshape(1, Vp)  # f32
    return params


# ------------------------------ full forward --------------------------------


def seq2seq_forward(params, src_tokens, prev_tgt_tokens, *, n_tgt_words, block_b=8):
    B = src_tokens.shape[0]
    Bp = _round_up(B, block_b)                   # sublane-dense padded batch

    def embed_time_major(emb, tokens):
        # Dropout = identity (eval).  Gather directly time-major: no activation transpose.
        if Bp != B:
            tokens = jnp.pad(tokens, ((0, Bp - B), (0, 0)))
        return emb[tokens.T]                     # (T, Bp, Dp)

    # Encoder: per-layer-blocked, batch-parallel LSTM stack; zero state init in-kernel.
    x = embed_time_major(params["emb_src"], src_tokens)
    hT, cT = lstm_encoder(x, params["enc_wih"], params["enc_whh"], params["enc_b"],
                          block_b=block_b)

    # Decoder: same stack seeded with encoder state; vocab projection fused in-kernel.
    y = embed_time_major(params["emb_tgt"], prev_tgt_tokens)
    logits_tbv = lstm_decoder_project(y, hT, cT,
                                      params["dec_wih"], params["dec_whh"], params["dec_b"],
                                      params["wout_t"], params["bout"], block_b=block_b)

    # Only the small final logits tensor is transposed/sliced on the host.
    return jnp.transpose(logits_tbv, (1, 0, 2))[:B, :, :n_tgt_words]


# ---------------------------------- main -------------------------------------

if __name__ == "__main__":
    n_src_words, n_tgt_words = 53, 57
    d_model, n_layers = 32, 2
    batch, src_len, tgt_len = 2, 10, 8

    key = jax.random.PRNGKey(0)
    k_params, k_src, k_tgt = jax.random.split(key, 3)

    params = make_params(k_params, n_src_words, n_tgt_words, d_model, n_layers)
    src_tokens = jax.random.randint(k_src, (batch, src_len), 0, n_src_words,
                                    dtype=jnp.int32)
    prev_tgt_tokens = jax.random.randint(k_tgt, (batch, tgt_len), 0, n_tgt_words,
                                         dtype=jnp.int32)

    fwd = jax.jit(functools.partial(seq2seq_forward, n_tgt_words=n_tgt_words))
    model_out = fwd(params, src_tokens, prev_tgt_tokens)
    model_out = jax.block_until_ready(model_out)

    assert model_out.shape == (batch, tgt_len, n_tgt_words), model_out.shape
    assert model_out.dtype == jnp.float32
    print("KERNEL_OK")
</pallas_src>

<mosaic_0001>
module attributes {stable_mosaic.version = 11 : i64} {
  func.func @_encoder_kernel(%arg0: i32, %arg1: i32, %arg2: memref<10x8x128xf32, #tpu.memory_space<vmem>>, %arg3: memref<1x128x512xbf16, #tpu.memory_space<vmem>>, %arg4: memref<1x128x512xbf16, #tpu.memory_space<vmem>>, %arg5: memref<1x1x512xf32, #tpu.memory_space<vmem>>, %arg6: memref<1x8x128xf32, #tpu.memory_space<vmem>>, %arg7: memref<1x8x128xf32, #tpu.memory_space<vmem>>, %arg8: memref<10x8x128xf32, #tpu.memory_space<vmem>>, %arg9: memref<10x8x512xf32, #tpu.memory_space<vmem>>) attributes {dimension_semantics = [#tpu.dimension_semantics<parallel>, #tpu.dimension_semantics<arbitrary>], iteration_bounds = array<i64: 1, 2>, scalar_prefetch = 0 : i64, scratch_operands = 2 : i64, tpu.core_type = #tpu.core_type<tc>, window_params = [{transform_indices = @transform_0, window_bounds = array<i64: 10, 8, 128>}, {transform_indices = @transform_1, window_bounds = array<i64: 1, 128, 512>}, {transform_indices = @transform_2, window_bounds = array<i64: 1, 128, 512>}, {transform_indices = @transform_3, window_bounds = array<i64: 1, 1, 512>}, {transform_indices = @transform_4, window_bounds = array<i64: 1, 8, 128>}, {transform_indices = @transform_5, window_bounds = array<i64: 1, 8, 128>}]} {
    %c0_i32 = arith.constant 0 : i32
    %0 = arith.cmpi eq, %arg1, %c0_i32 : i32
    %1 = arith.extui %0 : i1 to i32
    %c0_i32_0 = arith.constant 0 : i32
    %2 = arith.cmpi ne, %1, %c0_i32_0 : i32
    scf.if %2 {
      %c0_84 = arith.constant 0 : index
      %c0_85 = arith.constant 0 : index
      %c0_86 = arith.constant 0 : index
      %275 = vector.load %arg2[%c0_84, %c0_85, %c0_86] : memref<10x8x128xf32, #tpu.memory_space<vmem>>, vector<10x8x128xf32>
      %c0_87 = arith.constant 0 : index
      %c0_88 = arith.constant 0 : index
      %c0_89 = arith.constant 0 : index
      %276 = vector.load %arg8[%c0_87, %c0_88, %c0_89] : memref<10x8x128xf32, #tpu.memory_space<vmem>>, vector<10x8x128xf32>
      tpu.vector_store %arg8[%c0_87, %c0_88, %c0_89], %275 {strides = array<i32>} : memref<10x8x128xf32, #tpu.memory_space<vmem>>, vector<10x8x128xf32>,
    } else {
    }
    %cst = arith.constant 0.000000e+00 : f32
    %3 = vector.broadcast %cst : f32 to vector<8x128xf32>
    %cst_1 = arith.constant 0.000000e+00 : f32
    %4 = vector.broadcast %cst_1 : f32 to vector<8x128xf32>
    %c0 = arith.constant 0 : index
    %c0_2 = arith.constant 0 : index
    %c0_3 = arith.constant 0 : index
    %5 = vector.load %arg3[%c0, %c0_2, %c0_3] : memref<1x128x512xbf16, #tpu.memory_space<vmem>>, vector<1x128x512xbf16>
    %6 = vector.shape_cast %5 : vector<1x128x512xbf16> to vector<128x512xbf16>
    %c0_4 = arith.constant 0 : index
    %c0_5 = arith.constant 0 : index
    %c0_6 = arith.constant 0 : index
    %7 = vector.load %arg4[%c0_4, %c0_5, %c0_6] : memref<1x128x512xbf16, #tpu.memory_space<vmem>>, vector<1x128x512xbf16>
    %8 = vector.shape_cast %7 : vector<1x128x512xbf16> to vector<128x512xbf16>
    %c0_7 = arith.constant 0 : index
    %c0_8 = arith.constant 0 : index
    %c0_9 = arith.constant 0 : index
    %9 = vector.load %arg5[%c0_7, %c0_8, %c0_9] : memref<1x1x512xf32, #tpu.memory_space<vmem>>, vector<1x1x512xf32>
    %10 = vector.shape_cast %9 : vector<1x1x512xf32> to vector<1x512xf32>
    %c0_10 = arith.constant 0 : index
    %c0_11 = arith.constant 0 : index
    %c0_12 = arith.constant 0 : index
    %11 = vector.load %arg8[%c0_10, %c0_11, %c0_12] : memref<10x8x128xf32, #tpu.memory_space<vmem>>, vector<10x8x128xf32>
    %12 = vector.shape_cast %11 : vector<10x8x128xf32> to vector<80x128xf32>
    %13 = arith.truncf %12 : vector<80x128xf32> to vector<80x128xbf16>
    %cst_13 = arith.constant dense<0.000000e+00> : vector<80x512xf32>
    %14 = tpu.matmul %13, %6, %cst_13 {dimension_numbers = #tpu.dot_dimension_numbers<[1], [0], [0], [1], [0, 0, 1, 1], [], []>} : vector<80x128xbf16>, vector<128x512xbf16>, vector<80x512xf32> -> vector<80x512xf32>
    %15 = vector.broadcast %10 : vector<1x512xf32> to vector<80x512xf32>
    %16 = arith.addf %14, %15 : vector<80x512xf32>
    %17 = vector.shape_cast %16 : vector<80x512xf32> to vector<10x8x512xf32>
    %c0_14 = arith.constant 0 : index
    %c0_15 = arith.constant 0 : index
    %c0_16 = arith.constant 0 : index
    %18 = vector.load %arg9[%c0_14, %c0_15, %c0_16] : memref<10x8x512xf32, #tpu.memory_space<vmem>>, vector<10x8x512xf32>
    tpu.vector_store %arg9[%c0_14, %c0_15, %c0_16], %17 {strides = array<i32>} : memref<10x8x512xf32, #tpu.memory_space<vmem>>, vector<10x8x512xf32>,
    %c0_i32_17 = arith.constant 0 : i32
    %19 = arith.index_cast %c0_i32_17 : i32 to index
    %c0_18 = arith.constant 0 : index
    %c0_19 = arith.constant 0 : index
    %20 = vector.load %arg9[%19, %c0_18, %c0_19] : memref<10x8x512xf32, #tpu.memory_space<vmem>>, vector<1x8x512xf32>
    %21 = vector.shape_cast %20 : vector<1x8x512xf32> to vector<8x512xf32>
    %22 = arith.truncf %3 : vector<8x128xf32> to vector<8x128xbf16>
    %cst_20 = arith.constant dense<0.000000e+00> : vector<8x512xf32>
    %23 = tpu.matmul %22, %8, %cst_20 {dimension_numbers = #tpu.dot_dimension_numbers<[1], [0], [0], [1], [0, 0, 1, 1], [], []>} : vector<8x128xbf16>, vector<128x512xbf16>, vector<8x512xf32> -> vector<8x512xf32>
    %24 = arith.addf %21, %23 : vector<8x512xf32>
    %25 = arith.negf %24 : vector<8x512xf32>
    %26 = math.exp %25 : vector<8x512xf32>
    %cst_21 = arith.constant 1.000000e+00 : f32
    %27 = vector.broadcast %cst_21 : f32 to vector<8x512xf32>
    %28 = arith.addf %27, %26 : vector<8x512xf32>
    %29 = arith.divf %27, %28 : vector<8x512xf32>
    %30 = math.tanh %24 : vector<8x512xf32>
    %31 = vector.extract_strided_slice %29 {offsets = [0, 0], sizes = [8, 128], strides = [1, 1]} : vector<8x512xf32> to vector<8x128xf32>
    %32 = vector.extract_strided_slice %29 {offsets = [0, 128], sizes = [8, 128], strides = [1, 1]} : vector<8x512xf32> to vector<8x128xf32>
    %33 = vector.extract_strided_slice %30 {offsets = [0, 256], sizes = [8, 128], strides = [1, 1]} : vector<8x512xf32> to vector<8x128xf32>
    %34 = vector.extract_strided_slice %29 {offsets = [0, 384], sizes = [8, 128], strides = [1, 1]} : vector<8x512xf32> to vector<8x128xf32>
    %35 = arith.mulf %32, %4 : vector<8x128xf32>
    %36 = arith.mulf %31, %33 : vector<8x128xf32>
    %37 = arith.addf %35, %36 : vector<8x128xf32>
    %38 = math.tanh %37 : vector<8x128xf32>
    %39 = arith.mulf %34, %38 : vector<8x128xf32>
    %40 = arith.index_cast %c0_i32_17 : i32 to index
    %c0_22 = arith.constant 0 : index
    %c0_23 = arith.constant 0 : index
    %41 = vector.load %arg8[%40, %c0_22, %c0_23] : memref<10x8x128xf32, #tpu.memory_space<vmem>>, vector<1x8x128xf32>
    %42 = vector.shape_cast %41 : vector<1x8x128xf32> to vector<8x128xf32>
    %43 = vector.shape_cast %39 : vector<8x128xf32> to vector<1x8x128xf32>
    tpu.vector_store %arg8[%40, %c0_22, %c0_23], %43 {strides = array<i32>} : memref<10x8x128xf32, #tpu.memory_space<vmem>>, vector<1x8x128xf32>,
    %c1_i32 = arith.constant 1 : i32
    %44 = arith.index_cast %c1_i32 : i32 to index
    %c0_24 = arith.constant 0 : index
    %c0_25 = arith.constant 0 : index
    %45 = vector.load %arg9[%44, %c0_24, %c0_25] : memref<10x8x512xf32, #tpu.memory_space<vmem>>, vector<1x8x512xf32>
    %46 = vector.shape_cast %45 : vector<1x8x512xf32> to vector<8x512xf32>
    %47 = arith.truncf %39 : vector<8x128xf32> to vector<8x128xbf16>
    %cst_26 = arith.constant dense<0.000000e+00> : vector<8x512xf32>
    %48 = tpu.matmul %47, %8, %cst_26 {dimension_numbers = #tpu.dot_dimension_numbers<[1], [0], [0], [1], [0, 0, 1, 1], [], []>} : vector<8x128xbf16>, vector<128x512xbf16>, vector<8x512xf32> -> vector<8x512xf32>
    %49 = arith.addf %46, %48 : vector<8x512xf32>
    %50 = arith.negf %49 : vector<8x512xf32>
    %51 = math.exp %50 : vector<8x512xf32>
    %cst_27 = arith.constant 1.000000e+00 : f32
    %52 = vector.broadcast %cst_27 : f32 to vector<8x512xf32>
    %53 = arith.addf %52, %51 : vector<8x512xf32>
    %54 = arith.divf %52, %53 : vector<8x512xf32>
    %55 = math.tanh %49 : vector<8x512xf32>
    %56 = vector.extract_strided_slice %54 {offsets = [0, 0], sizes = [8, 128], strides = [1, 1]} : vector<8x512xf32> to vector<8x128xf32>
    %57 = vector.extract_strided_slice %54 {offsets = [0, 128], sizes = [8, 128], strides = [1, 1]} : vector<8x512xf32> to vector<8x128xf32>
    %58 = vector.extract_strided_slice %55 {offsets = [0, 256], sizes = [8, 128], strides = [1, 1]} : vector<8x512xf32> to vector<8x128xf32>
    %59 = vector.extract_strided_slice %54 {offsets = [0, 384], sizes = [8, 128], strides = [1, 1]} : vector<8x512xf32> to vector<8x128xf32>
    %60 = arith.mulf %57, %37 : vector<8x128xf32>
    %61 = arith.mulf %56, %58 : vector<8x128xf32>
    %62 = arith.addf %60, %61 : vector<8x128xf32>
    %63 = math.tanh %62 : vector<8x128xf32>
    %64 = arith.mulf %59, %63 : vector<8x128xf32>
    %65 = arith.index_cast %c1_i32 : i32 to index
    %c0_28 = arith.constant 0 : index
    %c0_29 = arith.constant 0 : index
    %66 = vector.load %arg8[%65, %c0_28, %c0_29] : memref<10x8x128xf32, #tpu.memory_space<vmem>>, vector<1x8x128xf32>
    %67 = vector.shape_cast %66 : vector<1x8x128xf32> to vector<8x128xf32>
    %68 = vector.shape_cast %64 : vector<8x128xf32> to vector<1x8x128xf32>
    tpu.vector_store %arg8[%65, %c0_28, %c0_29], %68 {strides = array<i32>} : memref<10x8x128xf32, #tpu.memory_space<vmem>>, vector<1x8x128xf32>,
    %c2_i32 = arith.constant 2 : i32
    %69 = arith.index_cast %c2_i32 : i32 to index
    %c0_30 = arith.constant 0 : index
    %c0_31 = arith.constant 0 : index
    %70 = vector.load %arg9[%69, %c0_30, %c0_31] : memref<10x8x512xf32, #tpu.memory_space<vmem>>, vector<1x8x512xf32>
    %71 = vector.shape_cast %70 : vector<1x8x512xf32> to vector<8x512xf32>
    %72 = arith.truncf %64 : vector<8x128xf32> to vector<8x128xbf16>
    %cst_32 = arith.constant dense<0.000000e+00> : vector<8x512xf32>
    %73 = tpu.matmul %72, %8, %cst_32 {dimension_numbers = #tpu.dot_dimension_numbers<[1], [0], [0], [1], [0, 0, 1, 1], [], []>} : vector<8x128xbf16>, vector<128x512xbf16>, vector<8x512xf32> -> vector<8x512xf32>
    %74 = arith.addf %71, %73 : vector<8x512xf32>
    %75 = arith.negf %74 : vector<8x512xf32>
    %76 = math.exp %75 : vector<8x512xf32>
    %cst_33 = arith.constant 1.000000e+00 : f32
    %77 = vector.broadcast %cst_33 : f32 to vector<8x512xf32>
    %78 = arith.addf %77, %76 : vector<8x512xf32>
    %79 = arith.divf %77, %78 : vector<8x512xf32>
    %80 = math.tanh %74 : vector<8x512xf32>
    %81 = vector.extract_strided_slice %79 {offsets = [0, 0], sizes = [8, 128], strides = [1, 1]} : vector<8x512xf32> to vector<8x128xf32>
    %82 = vector.extract_strided_slice %79 {offsets = [0, 128], sizes = [8, 128], strides = [1, 1]} : vector<8x512xf32> to vector<8x128xf32>
    %83 = vector.extract_strided_slice %80 {offsets = [0, 256], sizes = [8, 128], strides = [1, 1]} : vector<8x512xf32> to vector<8x128xf32>
    %84 = vector.extract_strided_slice %79 {offsets = [0, 384], sizes = [8, 128], strides = [1, 1]} : vector<8x512xf32> to vector<8x128xf32>
    %85 = arith.mulf %82, %62 : vector<8x128xf32>
    %86 = arith.mulf %81, %83 : vector<8x128xf32>
    %87 = arith.addf %85, %86 : vector<8x128xf32>
    %88 = math.tanh %87 : vector<8x128xf32>
    %89 = arith.mulf %84, %88 : vector<8x128xf32>
    %90 = arith.index_cast %c2_i32 : i32 to index
    %c0_34 = arith.constant 0 : index
    %c0_35 = arith.constant 0 : index
    %91 = vector.load %arg8[%90, %c0_34, %c0_35] : memref<10x8x128xf32, #tpu.memory_space<vmem>>, vector<1x8x128xf32>
    %92 = vector.shape_cast %91 : vector<1x8x128xf32> to vector<8x128xf32>
    %93 = vector.shape_cast %89 : vector<8x128xf32> to vector<1x8x128xf32>
    tpu.vector_store %arg8[%90, %c0_34, %c0_35], %93 {strides = array<i32>} : memref<10x8x128xf32, #tpu.memory_space<vmem>>, vector<1x8x128xf32>,
    %c3_i32 = arith.constant 3 : i32
    %94 = arith.index_cast %c3_i32 : i32 to index
    %c0_36 = arith.constant 0 : index
    %c0_37 = arith.constant 0 : index
    %95 = vector.load %arg9[%94, %c0_36, %c0_37] : memref<10x8x512xf32, #tpu.memory_space<vmem>>, vector<1x8x512xf32>
    %96 = vector.shape_cast %95 : vector<1x8x512xf32> to vector<8x512xf32>
    %97 = arith.truncf %89 : vector<8x128xf32> to vector<8x128xbf16>
    %cst_38 = arith.constant dense<0.000000e+00> : vector<8x512xf32>
    %98 = tpu.matmul %97, %8, %cst_38 {dimension_numbers = #tpu.dot_dimension_numbers<[1], [0], [0], [1], [0, 0, 1, 1], [], []>} : vector<8x128xbf16>, vector<128x512xbf16>, vector<8x512xf32> -> vector<8x512xf32>
    %99 = arith.addf %96, %98 : vector<8x512xf32>
    %100 = arith.negf %99 : vector<8x512xf32>
    %101 = math.exp %100 : vector<8x512xf32>
    %cst_39 = arith.constant 1.000000e+00 : f32
    %102 = vector.broadcast %cst_39 : f32 to vector<8x512xf32>
    %103 = arith.addf %102, %101 : vector<8x512xf32>
    %104 = arith.divf %102, %103 : vector<8x512xf32>
    %105 = math.tanh %99 : vector<8x512xf32>
    %106 = vector.extract_strided_slice %104 {offsets = [0, 0], sizes = [8, 128], strides = [1, 1]} : vector<8x512xf32> to vector<8x128xf32>
    %107 = vector.extract_strided_slice %104 {offsets = [0, 128], sizes = [8, 128], strides = [1, 1]} : vector<8x512xf32> to vector<8x128xf32>
    %108 = vector.extract_strided_slice %105 {offsets = [0, 256], sizes = [8, 128], strides = [1, 1]} : vector<8x512xf32> to vector<8x128xf32>
    %109 = vector.extract_strided_slice %104 {offsets = [0, 384], sizes = [8, 128], strides = [1, 1]} : vector<8x512xf32> to vector<8x128xf32>
    %110 = arith.mulf %107, %87 : vector<8x128xf32>
    %111 = arith.mulf %106, %108 : vector<8x128xf32>
    %112 = arith.addf %110, %111 : vector<8x128xf32>
    %113 = math.tanh %112 : vector<8x128xf32>
    %114 = arith.mulf %109, %113 : vector<8x128xf32>
    %115 = arith.index_cast %c3_i32 : i32 to index
    %c0_40 = arith.constant 0 : index
    %c0_41 = arith.constant 0 : index
    %116 = vector.load %arg8[%115, %c0_40, %c0_41] : memref<10x8x128xf32, #tpu.memory_space<vmem>>, vector<1x8x128xf32>
    %117 = vector.shape_cast %116 : vector<1x8x128xf32> to vector<8x128xf32>
    %118 = vector.shape_cast %114 : vector<8x128xf32> to vector<1x8x128xf32>
    tpu.vector_store %arg8[%115, %c0_40, %c0_41], %118 {strides = array<i32>} : memref<10x8x128xf32, #tpu.memory_space<vmem>>, vector<1x8x128xf32>,
    %c4_i32 = arith.constant 4 : i32
    %119 = arith.index_cast %c4_i32 : i32 to index
    %c0_42 = arith.constant 0 : index
    %c0_43 = arith.constant 0 : index
    %120 = vector.load %arg9[%119, %c0_42, %c0_43] : memref<10x8x512xf32, #tpu.memory_space<vmem>>, vector<1x8x512xf32>
    %121 = vector.shape_cast %120 : vector<1x8x512xf32> to vector<8x512xf32>
    %122 = arith.truncf %114 : vector<8x128xf32> to vector<8x128xbf16>
    %cst_44 = arith.constant dense<0.000000e+00> : vector<8x512xf32>
    %123 = tpu.matmul %122, %8, %cst_44 {dimension_numbers = #tpu.dot_dimension_numbers<[1], [0], [0], [1], [0, 0, 1, 1], [], []>} : vector<8x128xbf16>, vector<128x512xbf16>, vector<8x512xf32> -> vector<8x512xf32>
    %124 = arith.addf %121, %123 : vector<8x512xf32>
    %125 = arith.negf %124 : vector<8x512xf32>
    %126 = math.exp %125 : vector<8x512xf32>
    %cst_45 = arith.constant 1.000000e+00 : f32
    %127 = vector.broadcast %cst_45 : f32 to vector<8x512xf32>
    %128 = arith.addf %127, %126 : vector<8x512xf32>
    %129 = arith.divf %127, %128 : vector<8x512xf32>
    %130 = math.tanh %124 : vector<8x512xf32>
    %131 = vector.extract_strided_slice %129 {offsets = [0, 0], sizes = [8, 128], strides = [1, 1]} : vector<8x512xf32> to vector<8x128xf32>
    %132 = vector.extract_strided_slice %129 {offsets = [0, 128], sizes = [8, 128], strides = [1, 1]} : vector<8x512xf32> to vector<8x128xf32>
    %133 = vector.extract_strided_slice %130 {offsets = [0, 256], sizes = [8, 128], strides = [1, 1]} : vector<8x512xf32> to vector<8x128xf32>
    %134 = vector.extract_strided_slice %129 {offsets = [0, 384], sizes = [8, 128], strides = [1, 1]} : vector<8x512xf32> to vector<8x128xf32>
    %135 = arith.mulf %132, %112 : vector<8x128xf32>
    %136 = arith.mulf %131, %133 : vector<8x128xf32>
    %137 = arith.addf %135, %136 : vector<8x128xf32>
    %138 = math.tanh %137 : vector<8x128xf32>
    %139 = arith.mulf %134, %138 : vector<8x128xf32>
    %140 = arith.index_cast %c4_i32 : i32 to index
    %c0_46 = arith.constant 0 : index
    %c0_47 = arith.constant 0 : index
    %141 = vector.load %arg8[%140, %c0_46, %c0_47] : memref<10x8x128xf32, #tpu.memory_space<vmem>>, vector<1x8x128xf32>
    %142 = vector.shape_cast %141 : vector<1x8x128xf32> to vector<8x128xf32>
    %143 = vector.shape_cast %139 : vector<8x128xf32> to vector<1x8x128xf32>
    tpu.vector_store %arg8[%140, %c0_46, %c0_47], %143 {strides = array<i32>} : memref<10x8x128xf32, #tpu.memory_space<vmem>>, vector<1x8x128xf32>,
    %c5_i32 = arith.constant 5 : i32
    %144 = arith.index_cast %c5_i32 : i32 to index
    %c0_48 = arith.constant 0 : index
    %c0_49 = arith.constant 0 : index
    %145 = vector.load %arg9[%144, %c0_48, %c0_49] : memref<10x8x512xf32, #tpu.memory_space<vmem>>, vector<1x8x512xf32>
    %146 = vector.shape_cast %145 : vector<1x8x512xf32> to vector<8x512xf32>
    %147 = arith.truncf %139 : vector<8x128xf32> to vector<8x128xbf16>
    %cst_50 = arith.constant dense<0.000000e+00> : vector<8x512xf32>
    %148 = tpu.matmul %147, %8, %cst_50 {dimension_numbers = #tpu.dot_dimension_numbers<[1], [0], [0], [1], [0, 0, 1, 1], [], []>} : vector<8x128xbf16>, vector<128x512xbf16>, vector<8x512xf32> -> vector<8x512xf32>
    %149 = arith.addf %146, %148 : vector<8x512xf32>
    %150 = arith.negf %149 : vector<8x512xf32>
    %151 = math.exp %150 : vector<8x512xf32>
    %cst_51 = arith.constant 1.000000e+00 : f32
    %152 = vector.broadcast %cst_51 : f32 to vector<8x512xf32>
    %153 = arith.addf %152, %151 : vector<8x512xf32>
    %154 = arith.divf %152, %153 : vector<8x512xf32>
    %155 = math.tanh %149 : vector<8x512xf32>
    %156 = vector.extract_strided_slice %154 {offsets = [0, 0], sizes = [8, 128], strides = [1, 1]} : vector<8x512xf32> to vector<8x128xf32>
    %157 = vector.extract_strided_slice %154 {offsets = [0, 128], sizes = [8, 128], strides = [1, 1]} : vector<8x512xf32> to vector<8x128xf32>
    %158 = vector.extract_strided_slice %155 {offsets = [0, 256], sizes = [8, 128], strides = [1, 1]} : vector<8x512xf32> to vector<8x128xf32>
    %159 = vector.extract_strided_slice %154 {offsets = [0, 384], sizes = [8, 128], strides = [1, 1]} : vector<8x512xf32> to vector<8x128xf32>
    %160 = arith.mulf %157, %137 : vector<8x128xf32>
    %161 = arith.mulf %156, %158 : vector<8x128xf32>
    %162 = arith.addf %160, %161 : vector<8x128xf32>
    %163 = math.tanh %162 : vector<8x128xf32>
    %164 = arith.mulf %159, %163 : vector<8x128xf32>
    %165 = arith.index_cast %c5_i32 : i32 to index
    %c0_52 = arith.constant 0 : index
    %c0_53 = arith.constant 0 : index
    %166 = vector.load %arg8[%165, %c0_52, %c0_53] : memref<10x8x128xf32, #tpu.memory_space<vmem>>, vector<1x8x128xf32>
    %167 = vector.shape_cast %166 : vector<1x8x128xf32> to vector<8x128xf32>
    %168 = vector.shape_cast %164 : vector<8x128xf32> to vector<1x8x128xf32>
    tpu.vector_store %arg8[%165, %c0_52, %c0_53], %168 {strides = array<i32>} : memref<10x8x128xf32, #tpu.memory_space<vmem>>, vector<1x8x128xf32>,
    %c6_i32 = arith.constant 6 : i32
    %169 = arith.index_cast %c6_i32 : i32 to index
    %c0_54 = arith.constant 0 : index
    %c0_55 = arith.constant 0 : index
    %170 = vector.load %arg9[%169, %c0_54, %c0_55] : memref<10x8x512xf32, #tpu.memory_space<vmem>>, vector<1x8x512xf32>
    %171 = vector.shape_cast %170 : vector<1x8x512xf32> to vector<8x512xf32>
    %172 = arith.truncf %164 : vector<8x128xf32> to vector<8x128xbf16>
    %cst_56 = arith.constant dense<0.000000e+00> : vector<8x512xf32>
    %173 = tpu.matmul %172, %8, %cst_56 {dimension_numbers = #tpu.dot_dimension_numbers<[1], [0], [0], [1], [0, 0, 1, 1], [], []>} : vector<8x128xbf16>, vector<128x512xbf16>, vector<8x512xf32> -> vector<8x512xf32>
    %174 = arith.addf %171, %173 : vector<8x512xf32>
    %175 = arith.negf %174 : vector<8x512xf32>
    %176 = math.exp %175 : vector<8x512xf32>
    %cst_57 = arith.constant 1.000000e+00 : f32
    %177 = vector.broadcast %cst_57 : f32 to vector<8x512xf32>
    %178 = arith.addf %177, %176 : vector<8x512xf32>
    %179 = arith.divf %177, %178 : vector<8x512xf32>
    %180 = math.tanh %174 : vector<8x512xf32>
    %181 = vector.extract_strided_slice %179 {offsets = [0, 0], sizes = [8, 128], strides = [1, 1]} : vector<8x512xf32> to vector<8x128xf32>
    %182 = vector.extract_strided_slice %179 {offsets = [0, 128], sizes = [8, 128], strides = [1, 1]} : vector<8x512xf32> to vector<8x128xf32>
    %183 = vector.extract_strided_slice %180 {offsets = [0, 256], sizes = [8, 128], strides = [1, 1]} : vector<8x512xf32> to vector<8x128xf32>
    %184 = vector.extract_strided_slice %179 {offsets = [0, 384], sizes = [8, 128], strides = [1, 1]} : vector<8x512xf32> to vector<8x128xf32>
    %185 = arith.mulf %182, %162 : vector<8x128xf32>
    %186 = arith.mulf %181, %183 : vector<8x128xf32>
    %187 = arith.addf %185, %186 : vector<8x128xf32>
    %188 = math.tanh %187 : vector<8x128xf32>
    %189 = arith.mulf %184, %188 : vector<8x128xf32>
    %190 = arith.index_cast %c6_i32 : i32 to index
    %c0_58 = arith.constant 0 : index
    %c0_59 = arith.constant 0 : index
    %191 = vector.load %arg8[%190, %c0_58, %c0_59] : memref<10x8x128xf32, #tpu.memory_space<vmem>>, vector<1x8x128xf32>
    %192 = vector.shape_cast %191 : vector<1x8x128xf32> to vector<8x128xf32>
    %193 = vector.shape_cast %189 : vector<8x128xf32> to vector<1x8x128xf32>
    tpu.vector_store %arg8[%190, %c0_58, %c0_59], %193 {strides = array<i32>} : memref<10x8x128xf32, #tpu.memory_space<vmem>>, vector<1x8x128xf32>,
    %c7_i32 = arith.constant 7 : i32
    %194 = arith.index_cast %c7_i32 : i32 to index
    %c0_60 = arith.constant 0 : index
    %c0_61 = arith.constant 0 : index
    %195 = vector.load %arg9[%194, %c0_60, %c0_61] : memref<10x8x512xf32, #tpu.memory_space<vmem>>, vector<1x8x512xf32>
    %196 = vector.shape_cast %195 : vector<1x8x512xf32> to vector<8x512xf32>
    %197 = arith.truncf %189 : vector<8x128xf32> to vector<8x128xbf16>
    %cst_62 = arith.constant dense<0.000000e+00> : vector<8x512xf32>
    %198 = tpu.matmul %197, %8, %cst_62 {dimension_numbers = #tpu.dot_dimension_numbers<[1], [0], [0], [1], [0, 0, 1, 1], [], []>} : vector<8x128xbf16>, vector<128x512xbf16>, vector<8x512xf32> -> vector<8x512xf32>
    %199 = arith.addf %196, %198 : vector<8x512xf32>
    %200 = arith.negf %199 : vector<8x512xf32>
    %201 = math.exp %200 : vector<8x512xf32>
    %cst_63 = arith.constant 1.000000e+00 : f32
    %202 = vector.broadcast %cst_63 : f32 to vector<8x512xf32>
    %203 = arith.addf %202, %201 : vector<8x512xf32>
    %204 = arith.divf %202, %203 : vector<8x512xf32>
    %205 = math.tanh %199 : vector<8x512xf32>
    %206 = vector.extract_strided_slice %204 {offsets = [0, 0], sizes = [8, 128], strides = [1, 1]} : vector<8x512xf32> to vector<8x128xf32>
    %207 = vector.extract_strided_slice %204 {offsets = [0, 128], sizes = [8, 128], strides = [1, 1]} : vector<8x512xf32> to vector<8x128xf32>
    %208 = vector.extract_strided_slice %205 {offsets = [0, 256], sizes = [8, 128], strides = [1, 1]} : vector<8x512xf32> to vector<8x128xf32>
    %209 = vector.extract_strided_slice %204 {offsets = [0, 384], sizes = [8, 128], strides = [1, 1]} : vector<8x512xf32> to vector<8x128xf32>
    %210 = arith.mulf %207, %187 : vector<8x128xf32>
    %211 = arith.mulf %206, %208 : vector<8x128xf32>
    %212 = arith.addf %210, %211 : vector<8x128xf32>
    %213 = math.tanh %212 : vector<8x128xf32>
    %214 = arith.mulf %209, %213 : vector<8x128xf32>
    %215 = arith.index_cast %c7_i32 : i32 to index
    %c0_64 = arith.constant 0 : index
    %c0_65 = arith.constant 0 : index
    %216 = vector.load %arg8[%215, %c0_64, %c0_65] : memref<10x8x128xf32, #tpu.memory_space<vmem>>, vector<1x8x128xf32>
    %217 = vector.shape_cast %216 : vector<1x8x128xf32> to vector<8x128xf32>
    %218 = vector.shape_cast %214 : vector<8x128xf32> to vector<1x8x128xf32>
    tpu.vector_store %arg8[%215, %c0_64, %c0_65], %218 {strides = array<i32>} : memref<10x8x128xf32, #tpu.memory_space<vmem>>, vector<1x8x128xf32>,
    %c8_i32 = arith.constant 8 : i32
    %219 = arith.index_cast %c8_i32 : i32 to index
    %c0_66 = arith.constant 0 : index
    %c0_67 = arith.constant 0 : index
    %220 = vector.load %arg9[%219, %c0_66, %c0_67] : memref<10x8x512xf32, #tpu.memory_space<vmem>>, vector<1x8x512xf32>
    %221 = vector.shape_cast %220 : vector<1x8x512xf32> to vector<8x512xf32>
    %222 = arith.truncf %214 : vector<8x128xf32> to vector<8x128xbf16>
    %cst_68 = arith.constant dense<0.000000e+00> : vector<8x512xf32>
    %223 = tpu.matmul %222, %8, %cst_68 {dimension_numbers = #tpu.dot_dimension_numbers<[1], [0], [0], [1], [0, 0, 1, 1], [], []>} : vector<8x128xbf16>, vector<128x512xbf16>, vector<8x512xf32> -> vector<8x512xf32>
    %224 = arith.addf %221, %223 : vector<8x512xf32>
    %225 = arith.negf %224 : vector<8x512xf32>
    %226 = math.exp %225 : vector<8x512xf32>
    %cst_69 = arith.constant 1.000000e+00 : f32
    %227 = vector.broadcast %cst_69 : f32 to vector<8x512xf32>
    %228 = arith.addf %227, %226 : vector<8x512xf32>
    %229 = arith.divf %227, %228 : vector<8x512xf32>
    %230 = math.tanh %224 : vector<8x512xf32>
    %231 = vector.extract_strided_slice %229 {offsets = [0, 0], sizes = [8, 128], strides = [1, 1]} : vector<8x512xf32> to vector<8x128xf32>
    %232 = vector.extract_strided_slice %229 {offsets = [0, 128], sizes = [8, 128], strides = [1, 1]} : vector<8x512xf32> to vector<8x128xf32>
    %233 = vector.extract_strided_slice %230 {offsets = [0, 256], sizes = [8, 128], strides = [1, 1]} : vector<8x512xf32> to vector<8x128xf32>
    %234 = vector.extract_strided_slice %229 {offsets = [0, 384], sizes = [8, 128], strides = [1, 1]} : vector<8x512xf32> to vector<8x128xf32>
    %235 = arith.mulf %232, %212 : vector<8x128xf32>
    %236 = arith.mulf %231, %233 : vector<8x128xf32>
    %237 = arith.addf %235, %236 : vector<8x128xf32>
    %238 = math.tanh %237 : vector<8x128xf32>
    %239 = arith.mulf %234, %238 : vector<8x128xf32>
    %240 = arith.index_cast %c8_i32 : i32 to index
    %c0_70 = arith.constant 0 : index
    %c0_71 = arith.constant 0 : index
    %241 = vector.load %arg8[%240, %c0_70, %c0_71] : memref<10x8x128xf32, #tpu.memory_space<vmem>>, vector<1x8x128xf32>
    %242 = vector.shape_cast %241 : vector<1x8x128xf32> to vector<8x128xf32>
    %243 = vector.shape_cast %239 : vector<8x128xf32> to vector<1x8x128xf32>
    tpu.vector_store %arg8[%240, %c0_70, %c0_71], %243 {strides = array<i32>} : memref<10x8x128xf32, #tpu.memory_space<vmem>>, vector<1x8x128xf32>,
    %c9_i32 = arith.constant 9 : i32
    %244 = arith.index_cast %c9_i32 : i32 to index
    %c0_72 = arith.constant 0 : index
    %c0_73 = arith.constant 0 : index
    %245 = vector.load %arg9[%244, %c0_72, %c0_73] : memref<10x8x512xf32, #tpu.memory_space<vmem>>, vector<1x8x512xf32>
    %246 = vector.shape_cast %245 : vector<1x8x512xf32> to vector<8x512xf32>
    %247 = arith.truncf %239 : vector<8x128xf32> to vector<8x128xbf16>
    %cst_74 = arith.constant dense<0.000000e+00> : vector<8x512xf32>
    %248 = tpu.matmul %247, %8, %cst_74 {dimension_numbers = #tpu.dot_dimension_numbers<[1], [0], [0], [1], [0, 0, 1, 1], [], []>} : vector<8x128xbf16>, vector<128x512xbf16>, vector<8x512xf32> -> vector<8x512xf32>
    %249 = arith.addf %246, %248 : vector<8x512xf32>
    %250 = arith.negf %249 : vector<8x512xf32>
    %251 = math.exp %250 : vector<8x512xf32>
    %cst_75 = arith.constant 1.000000e+00 : f32
    %252 = vector.broadcast %cst_75 : f32 to vector<8x512xf32>
    %253 = arith.addf %252, %251 : vector<8x512xf32>
    %254 = arith.divf %252, %253 : vector<8x512xf32>
    %255 = math.tanh %249 : vector<8x512xf32>
    %256 = vector.extract_strided_slice %254 {offsets = [0, 0], sizes = [8, 128], strides = [1, 1]} : vector<8x512xf32> to vector<8x128xf32>
    %257 = vector.extract_strided_slice %254 {offsets = [0, 128], sizes = [8, 128], strides = [1, 1]} : vector<8x512xf32> to vector<8x128xf32>
    %258 = vector.extract_strided_slice %255 {offsets = [0, 256], sizes = [8, 128], strides = [1, 1]} : vector<8x512xf32> to vector<8x128xf32>
    %259 = vector.extract_strided_slice %254 {offsets = [0, 384], sizes = [8, 128], strides = [1, 1]} : vector<8x512xf32> to vector<8x128xf32>
    %260 = arith.mulf %257, %237 : vector<8x128xf32>
    %261 = arith.mulf %256, %258 : vector<8x128xf32>
    %262 = arith.addf %260, %261 : vector<8x128xf32>
    %263 = math.tanh %262 : vector<8x128xf32>
    %264 = arith.mulf %259, %263 : vector<8x128xf32>
    %265 = arith.index_cast %c9_i32 : i32 to index
    %c0_76 = arith.constant 0 : index
    %c0_77 = arith.constant 0 : index
    %266 = vector.load %arg8[%265, %c0_76, %c0_77] : memref<10x8x128xf32, #tpu.memory_space<vmem>>, vector<1x8x128xf32>
    %267 = vector.shape_cast %266 : vector<1x8x128xf32> to vector<8x128xf32>
    %268 = vector.shape_cast %264 : vector<8x128xf32> to vector<1x8x128xf32>
    tpu.vector_store %arg8[%265, %c0_76, %c0_77], %268 {strides = array<i32>} : memref<10x8x128xf32, #tpu.memory_space<vmem>>, vector<1x8x128xf32>,
    %c10_i32 = arith.constant 10 : i32
    %c0_78 = arith.constant 0 : index
    %c0_79 = arith.constant 0 : index
    %c0_80 = arith.constant 0 : index
    %269 = vector.load %arg6[%c0_78, %c0_79, %c0_80] : memref<1x8x128xf32, #tpu.memory_space<vmem>>, vector<1x8x128xf32>
    %270 = vector.shape_cast %269 : vector<1x8x128xf32> to vector<8x128xf32>
    %271 = vector.shape_cast %264 : vector<8x128xf32> to vector<1x8x128xf32>
    tpu.vector_store %arg6[%c0_78, %c0_79, %c0_80], %271 {strides = array<i32>} : memref<1x8x128xf32, #tpu.memory_space<vmem>>, vector<1x8x128xf32>,
    %c0_81 = arith.constant 0 : index
    %c0_82 = arith.constant 0 : index
    %c0_83 = arith.constant 0 : index
    %272 = vector.load %arg7[%c0_81, %c0_82, %c0_83] : memref<1x8x128xf32, #tpu.memory_space<vmem>>, vector<1x8x128xf32>
    %273 = vector.shape_cast %272 : vector<1x8x128xf32> to vector<8x128xf32>
    %274 = vector.shape_cast %262 : vector<8x128xf32> to vector<1x8x128xf32>
    tpu.vector_store %arg7[%c0_81, %c0_82, %c0_83], %274 {strides = array<i32>} : memref<1x8x128xf32, #tpu.memory_space<vmem>>, vector<1x8x128xf32>,
    return
  }
  func.func @transform_0(%arg0: i32, %arg1: i32) -> (i32, i32, i32) {
    %c0_i32 = arith.constant 0 : i32
    %c0_i32_0 = arith.constant 0 : i32
    %c0_i32_1 = arith.constant 0 : i32
    return %c0_i32, %arg0, %c0_i32_0 : i32, i32, i32
  }
  func.func @transform_1(%arg0: i32, %arg1: i32) -> (i32, i32, i32) {
    %c0_i32 = arith.constant 0 : i32
    %c0_i32_0 = arith.constant 0 : i32
    %c0_i32_1 = arith.constant 0 : i32
    return %arg1, %c0_i32, %c0_i32_0 : i32, i32, i32
  }
  func.func @transform_2(%arg0: i32, %arg1: i32) -> (i32, i32, i32) {
    %c0_i32 = arith.constant 0 : i32
    %c0_i32_0 = arith.constant 0 : i32
    %c0_i32_1 = arith.constant 0 : i32
    return %arg1, %c0_i32, %c0_i32_0 : i32, i32, i32
  }
  func.func @transform_3(%arg0: i32, %arg1: i32) -> (i32, i32, i32) {
    %c0_i32 = arith.constant 0 : i32
    %c0_i32_0 = arith.constant 0 : i32
    %c0_i32_1 = arith.constant 0 : i32
    return %arg1, %c0_i32, %c0_i32_0 : i32, i32, i32
  }
  func.func @transform_4(%arg0: i32, %arg1: i32) -> (i32, i32, i32) {
    %c0_i32 = arith.constant 0 : i32
    %c0_i32_0 = arith.constant 0 : i32
    return %arg1, %arg0, %c0_i32 : i32, i32, i32
  }
  func.func @transform_5(%arg0: i32, %arg1: i32) -> (i32, i32, i32) {
    %c0_i32 = arith.constant 0 : i32
    %c0_i32_0 = arith.constant 0 : i32
    return %arg1, %arg0, %c0_i32 : i32, i32, i32
  }
}

module attributes {stable_mosaic.version = 11 : i64} {
  func.func @_decoder_kernel(%arg0: i32, %arg1: i32, %arg2: memref<8x8x128xf32, #tpu.memory_space<vmem>>, %arg3: memref<1x8x128xf32, #tpu.memory_space<vmem>>, %arg4: memref<1x8x128xf32, #tpu.memory_space<vmem>>, %arg5: memref<1x128x512xbf16, #tpu.memory_space<vmem>>, %arg6: memref<1x128x512xbf16, #tpu.memory_space<vmem>>, %arg7: memref<1x1x512xf32, #tpu.memory_space<vmem>>, %arg8: memref<128x128xbf16, #tpu.memory_space<vmem>>, %arg9: memref<1x128xf32, #tpu.memory_space<vmem>>, %arg10: memref<8x8x128xf32, #tpu.memory_space<vmem>>, %arg11: memref<8x8x128xf32, #tpu.memory_space<vmem>>, %arg12: memref<8x8x512xf32, #tpu.memory_space<vmem>>) attributes {dimension_semantics = [#tpu.dimension_semantics<parallel>, #tpu.dimension_semantics<arbitrary>], iteration_bounds = array<i64: 1, 2>, scalar_prefetch = 0 : i64, scratch_operands = 2 : i64, tpu.core_type = #tpu.core_type<tc>, window_params = [{transform_indices = @transform_0, window_bounds = array<i64: 8, 8, 128>}, {transform_indices = @transform_1, window_bounds = array<i64: 1, 8, 128>}, {transform_indices = @transform_2, window_bounds = array<i64: 1, 8, 128>}, {transform_indices = @transform_3, window_bounds = array<i64: 1, 128, 512>}, {transform_indices = @transform_4, window_bounds = array<i64: 1, 128, 512>}, {transform_indices = @transform_5, window_bounds = array<i64: 1, 1, 512>}, {pipeline_mode = #tpu.pipeline_mode<synchronous>, transform_indices = @transform_6, window_bounds = array<i64: 128, 128>}, {pipeline_mode = #tpu.pipeline_mode<synchronous>, transform_indices = @transform_7, window_bounds = array<i64: 1, 128>}, {transform_indices = @transform_8, window_bounds = array<i64: 8, 8, 128>}]} {
    %c0_i32 = arith.constant 0 : i32
    %0 = arith.cmpi eq, %arg1, %c0_i32 : i32
    %1 = arith.extui %0 : i1 to i32
    %c0_i32_0 = arith.constant 0 : i32
    %2 = arith.cmpi ne, %1, %c0_i32_0 : i32
    scf.if %2 {
      %c0_72 = arith.constant 0 : index
      %c0_73 = arith.constant 0 : index
      %c0_74 = arith.constant 0 : index
      %224 = vector.load %arg2[%c0_72, %c0_73, %c0_74] : memref<8x8x128xf32, #tpu.memory_space<vmem>>, vector<8x8x128xf32>
      %c0_75 = arith.constant 0 : index
      %c0_76 = arith.constant 0 : index
      %c0_77 = arith.constant 0 : index
      %225 = vector.load %arg11[%c0_75, %c0_76, %c0_77] : memref<8x8x128xf32, #tpu.memory_space<vmem>>, vector<8x8x128xf32>
      tpu.vector_store %arg11[%c0_75, %c0_76, %c0_77], %224 {strides = array<i32>} : memref<8x8x128xf32, #tpu.memory_space<vmem>>, vector<8x8x128xf32>,
    } else {
    }
    %c0 = arith.constant 0 : index
    %c0_1 = arith.constant 0 : index
    %c0_2 = arith.constant 0 : index
    %3 = vector.load %arg3[%c0, %c0_1, %c0_2] : memref<1x8x128xf32, #tpu.memory_space<vmem>>, vector<1x8x128xf32>
    %4 = vector.shape_cast %3 : vector<1x8x128xf32> to vector<8x128xf32>
    %c0_3 = arith.constant 0 : index
    %c0_4 = arith.constant 0 : index
    %c0_5 = arith.constant 0 : index
    %5 = vector.load %arg4[%c0_3, %c0_4, %c0_5] : memref<1x8x128xf32, #tpu.memory_space<vmem>>, vector<1x8x128xf32>
    %6 = vector.shape_cast %5 : vector<1x8x128xf32> to vector<8x128xf32>
    %c0_6 = arith.constant 0 : index
    %c0_7 = arith.constant 0 : index
    %c0_8 = arith.constant 0 : index
    %7 = vector.load %arg5[%c0_6, %c0_7, %c0_8] : memref<1x128x512xbf16, #tpu.memory_space<vmem>>, vector<1x128x512xbf16>
    %8 = vector.shape_cast %7 : vector<1x128x512xbf16> to vector<128x512xbf16>
    %c0_9 = arith.constant 0 : index
    %c0_10 = arith.constant 0 : index
    %c0_11 = arith.constant 0 : index
    %9 = vector.load %arg6[%c0_9, %c0_10, %c0_11] : memref<1x128x512xbf16, #tpu.memory_space<vmem>>, vector<1x128x512xbf16>
    %10 = vector.shape_cast %9 : vector<1x128x512xbf16> to vector<128x512xbf16>
    %c0_12 = arith.constant 0 : index
    %c0_13 = arith.constant 0 : index
    %c0_14 = arith.constant 0 : index
    %11 = vector.load %arg7[%c0_12, %c0_13, %c0_14] : memref<1x1x512xf32, #tpu.memory_space<vmem>>, vector<1x1x512xf32>
    %12 = vector.shape_cast %11 : vector<1x1x512xf32> to vector<1x512xf32>
    %c0_15 = arith.constant 0 : index
    %c0_16 = arith.constant 0 : index
    %c0_17 = arith.constant 0 : index
    %13 = vector.load %arg11[%c0_15, %c0_16, %c0_17] : memref<8x8x128xf32, #tpu.memory_space<vmem>>, vector<8x8x128xf32>
    %14 = vector.shape_cast %13 : vector<8x8x128xf32> to vector<64x128xf32>
    %15 = arith.truncf %14 : vector<64x128xf32> to vector<64x128xbf16>
    %cst = arith.constant dense<0.000000e+00> : vector<64x512xf32>
    %16 = tpu.matmul %15, %8, %cst {dimension_numbers = #tpu.dot_dimension_numbers<[1], [0], [0], [1], [0, 0, 1, 1], [], []>} : vector<64x128xbf16>, vector<128x512xbf16>, vector<64x512xf32> -> vector<64x512xf32>
    %17 = vector.broadcast %12 : vector<1x512xf32> to vector<64x512xf32>
    %18 = arith.addf %16, %17 : vector<64x512xf32>
    %19 = vector.shape_cast %18 : vector<64x512xf32> to vector<8x8x512xf32>
    %c0_18 = arith.constant 0 : index
    %c0_19 = arith.constant 0 : index
    %c0_20 = arith.constant 0 : index
    %20 = vector.load %arg12[%c0_18, %c0_19, %c0_20] : memref<8x8x512xf32, #tpu.memory_space<vmem>>, vector<8x8x512xf32>
    tpu.vector_store %arg12[%c0_18, %c0_19, %c0_20], %19 {strides = array<i32>} : memref<8x8x512xf32, #tpu.memory_space<vmem>>, vector<8x8x512xf32>,
    %c0_i32_21 = arith.constant 0 : i32
    %21 = arith.index_cast %c0_i32_21 : i32 to index
    %c0_22 = arith.constant 0 : index
    %c0_23 = arith.constant 0 : index
    %22 = vector.load %arg12[%21, %c0_22, %c0_23] : memref<8x8x512xf32, #tpu.memory_space<vmem>>, vector<1x8x512xf32>
    %23 = vector.shape_cast %22 : vector<1x8x512xf32> to vector<8x512xf32>
    %24 = arith.truncf %4 : vector<8x128xf32> to vector<8x128xbf16>
    %cst_24 = arith.constant dense<0.000000e+00> : vector<8x512xf32>
    %25 = tpu.matmul %24, %10, %cst_24 {dimension_numbers = #tpu.dot_dimension_numbers<[1], [0], [0], [1], [0, 0, 1, 1], [], []>} : vector<8x128xbf16>, vector<128x512xbf16>, vector<8x512xf32> -> vector<8x512xf32>
    %26 = arith.addf %23, %25 : vector<8x512xf32>
    %27 = arith.negf %26 : vector<8x512xf32>
    %28 = math.exp %27 : vector<8x512xf32>
    %cst_25 = arith.constant 1.000000e+00 : f32
    %29 = vector.broadcast %cst_25 : f32 to vector<8x512xf32>
    %30 = arith.addf %29, %28 : vector<8x512xf32>
    %31 = arith.divf %29, %30 : vector<8x512xf32>
    %32 = math.tanh %26 : vector<8x512xf32>
    %33 = vector.extract_strided_slice %31 {offsets = [0, 0], sizes = [8, 128], strides = [1, 1]} : vector<8x512xf32> to vector<8x128xf32>
    %34 = vector.extract_strided_slice %31 {offsets = [0, 128], sizes = [8, 128], strides = [1, 1]} : vector<8x512xf32> to vector<8x128xf32>
    %35 = vector.extract_strided_slice %32 {offsets = [0, 256], sizes = [8, 128], strides = [1, 1]} : vector<8x512xf32> to vector<8x128xf32>
    %36 = vector.extract_strided_slice %31 {offsets = [0, 384], sizes = [8, 128], strides = [1, 1]} : vector<8x512xf32> to vector<8x128xf32>
    %37 = arith.mulf %34, %6 : vector<8x128xf32>
    %38 = arith.mulf %33, %35 : vector<8x128xf32>
    %39 = arith.addf %37, %38 : vector<8x128xf32>
    %40 = math.tanh %39 : vector<8x128xf32>
    %41 = arith.mulf %36, %40 : vector<8x128xf32>
    %42 = arith.index_cast %c0_i32_21 : i32 to index
    %c0_26 = arith.constant 0 : index
    %c0_27 = arith.constant 0 : index
    %43 = vector.load %arg11[%42, %c0_26, %c0_27] : memref<8x8x128xf32, #tpu.memory_space<vmem>>, vector<1x8x128xf32>
    %44 = vector.shape_cast %43 : vector<1x8x128xf32> to vector<8x128xf32>
    %45 = vector.shape_cast %41 : vector<8x128xf32> to vector<1x8x128xf32>
    tpu.vector_store %arg11[%42, %c0_26, %c0_27], %45 {strides = array<i32>} : memref<8x8x128xf32, #tpu.memory_space<vmem>>, vector<1x8x128xf32>,
    %c1_i32 = arith.constant 1 : i32
    %46 = arith.index_cast %c1_i32 : i32 to index
    %c0_28 = arith.constant 0 : index
    %c0_29 = arith.constant 0 : index
    %47 = vector.load %arg12[%46, %c0_28, %c0_29] : memref<8x8x512xf32, #tpu.memory_space<vmem>>, vector<1x8x512xf32>
    %48 = vector.shape_cast %47 : vector<1x8x512xf32> to vector<8x512xf32>
    %49 = arith.truncf %41 : vector<8x128xf32> to vector<8x128xbf16>
    %cst_30 = arith.constant dense<0.000000e+00> : vector<8x512xf32>
    %50 = tpu.matmul %49, %10, %cst_30 {dimension_numbers = #tpu.dot_dimension_numbers<[1], [0], [0], [1], [0, 0, 1, 1], [], []>} : vector<8x128xbf16>, vector<128x512xbf16>, vector<8x512xf32> -> vector<8x512xf32>
    %51 = arith.addf %48, %50 : vector<8x512xf32>
    %52 = arith.negf %51 : vector<8x512xf32>
    %53 = math.exp %52 : vector<8x512xf32>
    %cst_31 = arith.constant 1.000000e+00 : f32
    %54 = vector.broadcast %cst_31 : f32 to vector<8x512xf32>
    %55 = arith.addf %54, %53 : vector<8x512xf32>
    %56 = arith.divf %54, %55 : vector<8x512xf32>
    %57 = math.tanh %51 : vector<8x512xf32>
    %58 = vector.extract_strided_slice %56 {offsets = [0, 0], sizes = [8, 128], strides = [1, 1]} : vector<8x512xf32> to vector<8x128xf32>
    %59 = vector.extract_strided_slice %56 {offsets = [0, 128], sizes = [8, 128], strides = [1, 1]} : vector<8x512xf32> to vector<8x128xf32>
    %60 = vector.extract_strided_slice %57 {offsets = [0, 256], sizes = [8, 128], strides = [1, 1]} : vector<8x512xf32> to vector<8x128xf32>
    %61 = vector.extract_strided_slice %56 {offsets = [0, 384], sizes = [8, 128], strides = [1, 1]} : vector<8x512xf32> to vector<8x128xf32>
    %62 = arith.mulf %59, %39 : vector<8x128xf32>
    %63 = arith.mulf %58, %60 : vector<8x128xf32>
    %64 = arith.addf %62, %63 : vector<8x128xf32>
    %65 = math.tanh %64 : vector<8x128xf32>
    %66 = arith.mulf %61, %65 : vector<8x128xf32>
    %67 = arith.index_cast %c1_i32 : i32 to index
    %c0_32 = arith.constant 0 : index
    %c0_33 = arith.constant 0 : index
    %68 = vector.load %arg11[%67, %c0_32, %c0_33] : memref<8x8x128xf32, #tpu.memory_space<vmem>>, vector<1x8x128xf32>
    %69 = vector.shape_cast %68 : vector<1x8x128xf32> to vector<8x128xf32>
    %70 = vector.shape_cast %66 : vector<8x128xf32> to vector<1x8x128xf32>
    tpu.vector_store %arg11[%67, %c0_32, %c0_33], %70 {strides = array<i32>} : memref<8x8x128xf32, #tpu.memory_space<vmem>>, vector<1x8x128xf32>,
    %c2_i32 = arith.constant 2 : i32
    %71 = arith.index_cast %c2_i32 : i32 to index
    %c0_34 = arith.constant 0 : index
    %c0_35 = arith.constant 0 : index
    %72 = vector.load %arg12[%71, %c0_34, %c0_35] : memref<8x8x512xf32, #tpu.memory_space<vmem>>, vector<1x8x512xf32>
    %73 = vector.shape_cast %72 : vector<1x8x512xf32> to vector<8x512xf32>
    %74 = arith.truncf %66 : vector<8x128xf32> to vector<8x128xbf16>
    %cst_36 = arith.constant dense<0.000000e+00> : vector<8x512xf32>
    %75 = tpu.matmul %74, %10, %cst_36 {dimension_numbers = #tpu.dot_dimension_numbers<[1], [0], [0], [1], [0, 0, 1, 1], [], []>} : vector<8x128xbf16>, vector<128x512xbf16>, vector<8x512xf32> -> vector<8x512xf32>
    %76 = arith.addf %73, %75 : vector<8x512xf32>
    %77 = arith.negf %76 : vector<8x512xf32>
    %78 = math.exp %77 : vector<8x512xf32>
    %cst_37 = arith.constant 1.000000e+00 : f32
    %79 = vector.broadcast %cst_37 : f32 to vector<8x512xf32>
    %80 = arith.addf %79, %78 : vector<8x512xf32>
    %81 = arith.divf %79, %80 : vector<8x512xf32>
    %82 = math.tanh %76 : vector<8x512xf32>
    %83 = vector.extract_strided_slice %81 {offsets = [0, 0], sizes = [8, 128], strides = [1, 1]} : vector<8x512xf32> to vector<8x128xf32>
    %84 = vector.extract_strided_slice %81 {offsets = [0, 128], sizes = [8, 128], strides = [1, 1]} : vector<8x512xf32> to vector<8x128xf32>
    %85 = vector.extract_strided_slice %82 {offsets = [0, 256], sizes = [8, 128], strides = [1, 1]} : vector<8x512xf32> to vector<8x128xf32>
    %86 = vector.extract_strided_slice %81 {offsets = [0, 384], sizes = [8, 128], strides = [1, 1]} : vector<8x512xf32> to vector<8x128xf32>
    %87 = arith.mulf %84, %64 : vector<8x128xf32>
    %88 = arith.mulf %83, %85 : vector<8x128xf32>
    %89 = arith.addf %87, %88 : vector<8x128xf32>
    %90 = math.tanh %89 : vector<8x128xf32>
    %91 = arith.mulf %86, %90 : vector<8x128xf32>
    %92 = arith.index_cast %c2_i32 : i32 to index
    %c0_38 = arith.constant 0 : index
    %c0_39 = arith.constant 0 : index
    %93 = vector.load %arg11[%92, %c0_38, %c0_39] : memref<8x8x128xf32, #tpu.memory_space<vmem>>, vector<1x8x128xf32>
    %94 = vector.shape_cast %93 : vector<1x8x128xf32> to vector<8x128xf32>
    %95 = vector.shape_cast %91 : vector<8x128xf32> to vector<1x8x128xf32>
    tpu.vector_store %arg11[%92, %c0_38, %c0_39], %95 {strides = array<i32>} : memref<8x8x128xf32, #tpu.memory_space<vmem>>, vector<1x8x128xf32>,
    %c3_i32 = arith.constant 3 : i32
    %96 = arith.index_cast %c3_i32 : i32 to index
    %c0_40 = arith.constant 0 : index
    %c0_41 = arith.constant 0 : index
    %97 = vector.load %arg12[%96, %c0_40, %c0_41] : memref<8x8x512xf32, #tpu.memory_space<vmem>>, vector<1x8x512xf32>
    %98 = vector.shape_cast %97 : vector<1x8x512xf32> to vector<8x512xf32>
    %99 = arith.truncf %91 : vector<8x128xf32> to vector<8x128xbf16>
    %cst_42 = arith.constant dense<0.000000e+00> : vector<8x512xf32>
    %100 = tpu.matmul %99, %10, %cst_42 {dimension_numbers = #tpu.dot_dimension_numbers<[1], [0], [0], [1], [0, 0, 1, 1], [], []>} : vector<8x128xbf16>, vector<128x512xbf16>, vector<8x512xf32> -> vector<8x512xf32>
    %101 = arith.addf %98, %100 : vector<8x512xf32>
    %102 = arith.negf %101 : vector<8x512xf32>
    %103 = math.exp %102 : vector<8x512xf32>
    %cst_43 = arith.constant 1.000000e+00 : f32
    %104 = vector.broadcast %cst_43 : f32 to vector<8x512xf32>
    %105 = arith.addf %104, %103 : vector<8x512xf32>
    %106 = arith.divf %104, %105 : vector<8x512xf32>
    %107 = math.tanh %101 : vector<8x512xf32>
    %108 = vector.extract_strided_slice %106 {offsets = [0, 0], sizes = [8, 128], strides = [1, 1]} : vector<8x512xf32> to vector<8x128xf32>
    %109 = vector.extract_strided_slice %106 {offsets = [0, 128], sizes = [8, 128], strides = [1, 1]} : vector<8x512xf32> to vector<8x128xf32>
    %110 = vector.extract_strided_slice %107 {offsets = [0, 256], sizes = [8, 128], strides = [1, 1]} : vector<8x512xf32> to vector<8x128xf32>
    %111 = vector.extract_strided_slice %106 {offsets = [0, 384], sizes = [8, 128], strides = [1, 1]} : vector<8x512xf32> to vector<8x128xf32>
    %112 = arith.mulf %109, %89 : vector<8x128xf32>
    %113 = arith.mulf %108, %110 : vector<8x128xf32>
    %114 = arith.addf %112, %113 : vector<8x128xf32>
    %115 = math.tanh %114 : vector<8x128xf32>
    %116 = arith.mulf %111, %115 : vector<8x128xf32>
    %117 = arith.index_cast %c3_i32 : i32 to index
    %c0_44 = arith.constant 0 : index
    %c0_45 = arith.constant 0 : index
    %118 = vector.load %arg11[%117, %c0_44, %c0_45] : memref<8x8x128xf32, #tpu.memory_space<vmem>>, vector<1x8x128xf32>
    %119 = vector.shape_cast %118 : vector<1x8x128xf32> to vector<8x128xf32>
    %120 = vector.shape_cast %116 : vector<8x128xf32> to vector<1x8x128xf32>
    tpu.vector_store %arg11[%117, %c0_44, %c0_45], %120 {strides = array<i32>} : memref<8x8x128xf32, #tpu.memory_space<vmem>>, vector<1x8x128xf32>,
    %c4_i32 = arith.constant 4 : i32
    %121 = arith.index_cast %c4_i32 : i32 to index
    %c0_46 = arith.constant 0 : index
    %c0_47 = arith.constant 0 : index
    %122 = vector.load %arg12[%121, %c0_46, %c0_47] : memref<8x8x512xf32, #tpu.memory_space<vmem>>, vector<1x8x512xf32>
    %123 = vector.shape_cast %122 : vector<1x8x512xf32> to vector<8x512xf32>
    %124 = arith.truncf %116 : vector<8x128xf32> to vector<8x128xbf16>
    %cst_48 = arith.constant dense<0.000000e+00> : vector<8x512xf32>
    %125 = tpu.matmul %124, %10, %cst_48 {dimension_numbers = #tpu.dot_dimension_numbers<[1], [0], [0], [1], [0, 0, 1, 1], [], []>} : vector<8x128xbf16>, vector<128x512xbf16>, vector<8x512xf32> -> vector<8x512xf32>
    %126 = arith.addf %123, %125 : vector<8x512xf32>
    %127 = arith.negf %126 : vector<8x512xf32>
    %128 = math.exp %127 : vector<8x512xf32>
    %cst_49 = arith.constant 1.000000e+00 : f32
    %129 = vector.broadcast %cst_49 : f32 to vector<8x512xf32>
    %130 = arith.addf %129, %128 : vector<8x512xf32>
    %131 = arith.divf %129, %130 : vector<8x512xf32>
    %132 = math.tanh %126 : vector<8x512xf32>
    %133 = vector.extract_strided_slice %131 {offsets = [0, 0], sizes = [8, 128], strides = [1, 1]} : vector<8x512xf32> to vector<8x128xf32>
    %134 = vector.extract_strided_slice %131 {offsets = [0, 128], sizes = [8, 128], strides = [1, 1]} : vector<8x512xf32> to vector<8x128xf32>
    %135 = vector.extract_strided_slice %132 {offsets = [0, 256], sizes = [8, 128], strides = [1, 1]} : vector<8x512xf32> to vector<8x128xf32>
    %136 = vector.extract_strided_slice %131 {offsets = [0, 384], sizes = [8, 128], strides = [1, 1]} : vector<8x512xf32> to vector<8x128xf32>
    %137 = arith.mulf %134, %114 : vector<8x128xf32>
    %138 = arith.mulf %133, %135 : vector<8x128xf32>
    %139 = arith.addf %137, %138 : vector<8x128xf32>
    %140 = math.tanh %139 : vector<8x128xf32>
    %141 = arith.mulf %136, %140 : vector<8x128xf32>
    %142 = arith.index_cast %c4_i32 : i32 to index
    %c0_50 = arith.constant 0 : index
    %c0_51 = arith.constant 0 : index
    %143 = vector.load %arg11[%142, %c0_50, %c0_51] : memref<8x8x128xf32, #tpu.memory_space<vmem>>, vector<1x8x128xf32>
    %144 = vector.shape_cast %143 : vector<1x8x128xf32> to vector<8x128xf32>
    %145 = vector.shape_cast %141 : vector<8x128xf32> to vector<1x8x128xf32>
    tpu.vector_store %arg11[%142, %c0_50, %c0_51], %145 {strides = array<i32>} : memref<8x8x128xf32, #tpu.memory_space<vmem>>, vector<1x8x128xf32>,
    %c5_i32 = arith.constant 5 : i32
    %146 = arith.index_cast %c5_i32 : i32 to index
    %c0_52 = arith.constant 0 : index
    %c0_53 = arith.constant 0 : index
    %147 = vector.load %arg12[%146, %c0_52, %c0_53] : memref<8x8x512xf32, #tpu.memory_space<vmem>>, vector<1x8x512xf32>
    %148 = vector.shape_cast %147 : vector<1x8x512xf32> to vector<8x512xf32>
    %149 = arith.truncf %141 : vector<8x128xf32> to vector<8x128xbf16>
    %cst_54 = arith.constant dense<0.000000e+00> : vector<8x512xf32>
    %150 = tpu.matmul %149, %10, %cst_54 {dimension_numbers = #tpu.dot_dimension_numbers<[1], [0], [0], [1], [0, 0, 1, 1], [], []>} : vector<8x128xbf16>, vector<128x512xbf16>, vector<8x512xf32> -> vector<8x512xf32>
    %151 = arith.addf %148, %150 : vector<8x512xf32>
    %152 = arith.negf %151 : vector<8x512xf32>
    %153 = math.exp %152 : vector<8x512xf32>
    %cst_55 = arith.constant 1.000000e+00 : f32
    %154 = vector.broadcast %cst_55 : f32 to vector<8x512xf32>
    %155 = arith.addf %154, %153 : vector<8x512xf32>
    %156 = arith.divf %154, %155 : vector<8x512xf32>
    %157 = math.tanh %151 : vector<8x512xf32>
    %158 = vector.extract_strided_slice %156 {offsets = [0, 0], sizes = [8, 128], strides = [1, 1]} : vector<8x512xf32> to vector<8x128xf32>
    %159 = vector.extract_strided_slice %156 {offsets = [0, 128], sizes = [8, 128], strides = [1, 1]} : vector<8x512xf32> to vector<8x128xf32>
    %160 = vector.extract_strided_slice %157 {offsets = [0, 256], sizes = [8, 128], strides = [1, 1]} : vector<8x512xf32> to vector<8x128xf32>
    %161 = vector.extract_strided_slice %156 {offsets = [0, 384], sizes = [8, 128], strides = [1, 1]} : vector<8x512xf32> to vector<8x128xf32>
    %162 = arith.mulf %159, %139 : vector<8x128xf32>
    %163 = arith.mulf %158, %160 : vector<8x128xf32>
    %164 = arith.addf %162, %163 : vector<8x128xf32>
    %165 = math.tanh %164 : vector<8x128xf32>
    %166 = arith.mulf %161, %165 : vector<8x128xf32>
    %167 = arith.index_cast %c5_i32 : i32 to index
    %c0_56 = arith.constant 0 : index
    %c0_57 = arith.constant 0 : index
    %168 = vector.load %arg11[%167, %c0_56, %c0_57] : memref<8x8x128xf32, #tpu.memory_space<vmem>>, vector<1x8x128xf32>
    %169 = vector.shape_cast %168 : vector<1x8x128xf32> to vector<8x128xf32>
    %170 = vector.shape_cast %166 : vector<8x128xf32> to vector<1x8x128xf32>
    tpu.vector_store %arg11[%167, %c0_56, %c0_57], %170 {strides = array<i32>} : memref<8x8x128xf32, #tpu.memory_space<vmem>>, vector<1x8x128xf32>,
    %c6_i32 = arith.constant 6 : i32
    %171 = arith.index_cast %c6_i32 : i32 to index
    %c0_58 = arith.constant 0 : index
    %c0_59 = arith.constant 0 : index
    %172 = vector.load %arg12[%171, %c0_58, %c0_59] : memref<8x8x512xf32, #tpu.memory_space<vmem>>, vector<1x8x512xf32>
    %173 = vector.shape_cast %172 : vector<1x8x512xf32> to vector<8x512xf32>
    %174 = arith.truncf %166 : vector<8x128xf32> to vector<8x128xbf16>
    %cst_60 = arith.constant dense<0.000000e+00> : vector<8x512xf32>
    %175 = tpu.matmul %174, %10, %cst_60 {dimension_numbers = #tpu.dot_dimension_numbers<[1], [0], [0], [1], [0, 0, 1, 1], [], []>} : vector<8x128xbf16>, vector<128x512xbf16>, vector<8x512xf32> -> vector<8x512xf32>
    %176 = arith.addf %173, %175 : vector<8x512xf32>
    %177 = arith.negf %176 : vector<8x512xf32>
    %178 = math.exp %177 : vector<8x512xf32>
    %cst_61 = arith.constant 1.000000e+00 : f32
    %179 = vector.broadcast %cst_61 : f32 to vector<8x512xf32>
    %180 = arith.addf %179, %178 : vector<8x512xf32>
    %181 = arith.divf %179, %180 : vector<8x512xf32>
    %182 = math.tanh %176 : vector<8x512xf32>
    %183 = vector.extract_strided_slice %181 {offsets = [0, 0], sizes = [8, 128], strides = [1, 1]} : vector<8x512xf32> to vector<8x128xf32>
    %184 = vector.extract_strided_slice %181 {offsets = [0, 128], sizes = [8, 128], strides = [1, 1]} : vector<8x512xf32> to vector<8x128xf32>
    %185 = vector.extract_strided_slice %182 {offsets = [0, 256], sizes = [8, 128], strides = [1, 1]} : vector<8x512xf32> to vector<8x128xf32>
    %186 = vector.extract_strided_slice %181 {offsets = [0, 384], sizes = [8, 128], strides = [1, 1]} : vector<8x512xf32> to vector<8x128xf32>
    %187 = arith.mulf %184, %164 : vector<8x128xf32>
    %188 = arith.mulf %183, %185 : vector<8x128xf32>
    %189 = arith.addf %187, %188 : vector<8x128xf32>
    %190 = math.tanh %189 : vector<8x128xf32>
    %191 = arith.mulf %186, %190 : vector<8x128xf32>
    %192 = arith.index_cast %c6_i32 : i32 to index
    %c0_62 = arith.constant 0 : index
    %c0_63 = arith.constant 0 : index
    %193 = vector.load %arg11[%192, %c0_62, %c0_63] : memref<8x8x128xf32, #tpu.memory_space<vmem>>, vector<1x8x128xf32>
    %194 = vector.shape_cast %193 : vector<1x8x128xf32> to vector<8x128xf32>
    %195 = vector.shape_cast %191 : vector<8x128xf32> to vector<1x8x128xf32>
    tpu.vector_store %arg11[%192, %c0_62, %c0_63], %195 {strides = array<i32>} : memref<8x8x128xf32, #tpu.memory_space<vmem>>, vector<1x8x128xf32>,
    %c7_i32 = arith.constant 7 : i32
    %196 = arith.index_cast %c7_i32 : i32 to index
    %c0_64 = arith.constant 0 : index
    %c0_65 = arith.constant 0 : index
    %197 = vector.load %arg12[%196, %c0_64, %c0_65] : memref<8x8x512xf32, #tpu.memory_space<vmem>>, vector<1x8x512xf32>
    %198 = vector.shape_cast %197 : vector<1x8x512xf32> to vector<8x512xf32>
    %199 = arith.truncf %191 : vector<8x128xf32> to vector<8x128xbf16>
    %cst_66 = arith.constant dense<0.000000e+00> : vector<8x512xf32>
    %200 = tpu.matmul %199, %10, %cst_66 {dimension_numbers = #tpu.dot_dimension_numbers<[1], [0], [0], [1], [0, 0, 1, 1], [], []>} : vector<8x128xbf16>, vector<128x512xbf16>, vector<8x512xf32> -> vector<8x512xf32>
    %201 = arith.addf %198, %200 : vector<8x512xf32>
    %202 = arith.negf %201 : vector<8x512xf32>
    %203 = math.exp %202 : vector<8x512xf32>
    %cst_67 = arith.constant 1.000000e+00 : f32
    %204 = vector.broadcast %cst_67 : f32 to vector<8x512xf32>
    %205 = arith.addf %204, %203 : vector<8x512xf32>
    %206 = arith.divf %204, %205 : vector<8x512xf32>
    %207 = math.tanh %201 : vector<8x512xf32>
    %208 = vector.extract_strided_slice %206 {offsets = [0, 0], sizes = [8, 128], strides = [1, 1]} : vector<8x512xf32> to vector<8x128xf32>
    %209 = vector.extract_strided_slice %206 {offsets = [0, 128], sizes = [8, 128], strides = [1, 1]} : vector<8x512xf32> to vector<8x128xf32>
    %210 = vector.extract_strided_slice %207 {offsets = [0, 256], sizes = [8, 128], strides = [1, 1]} : vector<8x512xf32> to vector<8x128xf32>
    %211 = vector.extract_strided_slice %206 {offsets = [0, 384], sizes = [8, 128], strides = [1, 1]} : vector<8x512xf32> to vector<8x128xf32>
    %212 = arith.mulf %209, %189 : vector<8x128xf32>
    %213 = arith.mulf %208, %210 : vector<8x128xf32>
    %214 = arith.addf %212, %213 : vector<8x128xf32>
    %215 = math.tanh %214 : vector<8x128xf32>
    %216 = arith.mulf %211, %215 : vector<8x128xf32>
    %217 = arith.index_cast %c7_i32 : i32 to index
    %c0_68 = arith.constant 0 : index
    %c0_69 = arith.constant 0 : index
    %218 = vector.load %arg11[%217, %c0_68, %c0_69] : memref<8x8x128xf32, #tpu.memory_space<vmem>>, vector<1x8x128xf32>
    %219 = vector.shape_cast %218 : vector<1x8x128xf32> to vector<8x128xf32>
    %220 = vector.shape_cast %216 : vector<8x128xf32> to vector<1x8x128xf32>
    tpu.vector_store %arg11[%217, %c0_68, %c0_69], %220 {strides = array<i32>} : memref<8x8x128xf32, #tpu.memory_space<vmem>>, vector<1x8x128xf32>,
    %c8_i32 = arith.constant 8 : i32
    %c1_i32_70 = arith.constant 1 : i32
    %221 = arith.cmpi eq, %arg1, %c1_i32_70 : i32
    %222 = arith.extui %221 : i1 to i32
    %c0_i32_71 = arith.constant 0 : i32
    %223 = arith.cmpi ne, %222, %c0_i32_71 : i32
    scf.if %223 {
      %c0_72 = arith.constant 0 : index
      %c0_73 = arith.constant 0 : index
      %c0_74 = arith.constant 0 : index
      %224 = vector.load %arg11[%c0_72, %c0_73, %c0_74] : memref<8x8x128xf32, #tpu.memory_space<vmem>>, vector<8x8x128xf32>
      %225 = vector.shape_cast %224 : vector<8x8x128xf32> to vector<64x128xf32>
      %226 = arith.truncf %225 : vector<64x128xf32> to vector<64x128xbf16>
      %c0_75 = arith.constant 0 : index
      %c0_76 = arith.constant 0 : index
      %227 = vector.load %arg8[%c0_75, %c0_76] : memref<128x128xbf16, #tpu.memory_space<vmem>>, vector<128x128xbf16>
      %cst_77 = arith.constant dense<0.000000e+00> : vector<64x128xf32>
      %228 = tpu.matmul %226, %227, %cst_77 {dimension_numbers = #tpu.dot_dimension_numbers<[1], [0], [0], [1], [0, 0, 1, 1], [], []>} : vector<64x128xbf16>, vector<128x128xbf16>, vector<64x128xf32> -> vector<64x128xf32>
      %c0_78 = arith.constant 0 : index
      %c0_79 = arith.constant 0 : index
      %229 = vector.load %arg9[%c0_78, %c0_79] : memref<1x128xf32, #tpu.memory_space<vmem>>, vector<1x128xf32>
      %230 = vector.broadcast %229 : vector<1x128xf32> to vector<64x128xf32>
      %231 = arith.addf %228, %230 : vector<64x128xf32>
      %232 = vector.shape_cast %231 : vector<64x128xf32> to vector<8x8x128xf32>
      %c0_80 = arith.constant 0 : index
      %c0_81 = arith.constant 0 : index
      %c0_82 = arith.constant 0 : index
      %233 = vector.load %arg10[%c0_80, %c0_81, %c0_82] : memref<8x8x128xf32, #tpu.memory_space<vmem>>, vector<8x8x128xf32>
      tpu.vector_store %arg10[%c0_80, %c0_81, %c0_82], %232 {strides = array<i32>} : memref<8x8x128xf32, #tpu.memory_space<vmem>>, vector<8x8x128xf32>,
    } else {
    }
    return
  }
  func.func @transform_0(%arg0: i32, %arg1: i32) -> (i32, i32, i32) {
    %c0_i32 = arith.constant 0 : i32
    %c0_i32_0 = arith.constant 0 : i32
    %c0_i32_1 = arith.constant 0 : i32
    return %c0_i32, %arg0, %c0_i32_0 : i32, i32, i32
  }
  func.func @transform_1(%arg0: i32, %arg1: i32) -> (i32, i32, i32) {
    %c0_i32 = arith.constant 0 : i32
    %c0_i32_0 = arith.constant 0 : i32
    return %arg1, %arg0, %c0_i32 : i32, i32, i32
  }
  func.func @transform_2(%arg0: i32, %arg1: i32) -> (i32, i32, i32) {
    %c0_i32 = arith.constant 0 : i32
    %c0_i32_0 = arith.constant 0 : i32
    return %arg1, %arg0, %c0_i32 : i32, i32, i32
  }
  func.func @transform_3(%arg0: i32, %arg1: i32) -> (i32, i32, i32) {
    %c0_i32 = arith.constant 0 : i32
    %c0_i32_0 = arith.constant 0 : i32
    %c0_i32_1 = arith.constant 0 : i32
    return %arg1, %c0_i32, %c0_i32_0 : i32, i32, i32
  }
  func.func @transform_4(%arg0: i32, %arg1: i32) -> (i32, i32, i32) {
    %c0_i32 = arith.constant 0 : i32
    %c0_i32_0 = arith.constant 0 : i32
    %c0_i32_1 = arith.constant 0 : i32
    return %arg1, %c0_i32, %c0_i32_0 : i32, i32, i32
  }
  func.func @transform_5(%arg0: i32, %arg1: i32) -> (i32, i32, i32) {
    %c0_i32 = arith.constant 0 : i32
    %c0_i32_0 = arith.constant 0 : i32
    %c0_i32_1 = arith.constant 0 : i32
    return %arg1, %c0_i32, %c0_i32_0 : i32, i32, i32
  }
  func.func @transform_6(%arg0: i32, %arg1: i32) -> (i32, i32) {
    %c0_i32 = arith.constant 0 : i32
    %c0_i32_0 = arith.constant 0 : i32
    %c0_i32_1 = arith.constant 0 : i32
    return %c0_i32, %c0_i32_0 : i32, i32
  }
  func.func @transform_7(%arg0: i32, %arg1: i32) -> (i32, i32) {
    %c0_i32 = arith.constant 0 : i32
    %c0_i32_0 = arith.constant 0 : i32
    %c0_i32_1 = arith.constant 0 : i32
    return %c0_i32, %c0_i32_0 : i32, i32
  }
  func.func @transform_8(%arg0: i32, %arg1: i32) -> (i32, i32, i32) {
    %c0_i32 = arith.constant 0 : i32
    %c0_i32_0 = arith.constant 0 : i32
    %c0_i32_1 = arith.constant 0 : i32
    return %c0_i32, %arg0, %c0_i32_0 : i32, i32, i32
  }
}

</mosaic_0001>

<bundles_post_ra>
// kernel: seq2seq_forward.3
= control target key start
LH: loop header
LB: loop body
LE: loop exit
PB: predicated region body
PF: predicated region fallthrough
CT: control target
= control target key end

     0   :  { %s2802_s27 = smov 0   ;;  %s2804_s28 = smov 0   ;;  %s3552_s0 = inlined_call_operand.vmem [shape: f32[8,8,128], index: 0, kind: input, shape index: {}]   ;;  %s3553_s1 = inlined_call_operand.vmem [shape: f32[2,8,128], index: 1, kind: input, shape index: {}]   ;;  %s3554_s2 = inlined_call_operand.vmem [shape: f32[2,8,128], index: 2, kind: input, shape index: {}]   ;;  %s3555_s3 = inlined_call_operand.vmem [shape: bf16[2,128,512], index: 3, kind: input, shape index: {}]   ;;  %s3556_s4 = inlined_call_operand.vmem [shape: bf16[2,128,512], index: 4, kind: input, shape index: {}]   ;;  %s3557_s5 = inlined_call_operand.vmem [shape: f32[2,1,512], index: 5, kind: input, shape index: {}]   ;;  %s3558_s6 = inlined_call_operand.vmem [shape: bf16[128,128], index: 6, kind: input, shape index: {}]   ;;  %s3559_s7 = inlined_call_operand.vmem [shape: f32[1,128], index: 7, kind: input, shape index: {}]   ;;  %s3560_s8 = inlined_call_operand.vmem [shape: f32[8,8,128], index: 8, kind: output, shape index: {}]  }
   0x1   :  { %s2806_s29 = smov 0  }
   0x2 LB: > { %s27_s30 = sadd.s32 1, %s2750_s28  ;;  %p2279_p0 = scmp.ge.s32.totalorder %s2754_s29, 1  ;;  %s2754_s29 = sphi %s2806_s29, %s18_s29   ;;  %s2750_s28 = sphi %s2804_s28, %s3605_s28   ;;  %s2746_s27 = sphi %s2802_s27, %s3604_s27  }
   0x3   : > { %p28_p1 = scmp.ge.s32.totalorder %s27_s30, 2  ;;  %p330_p2 = scmp.lt.s32.totalorder %s2754_s29, 3 }
   0x5   : > { %s3607_s30 = smov (%p28_p1, %s27_s30), 0  ;;  %p331_p3 = pnand %p2279_p0, %p330_p2 }
   0x7   : > { %334 = sbr.rel (%p331_p3) target bundleno = 2396 (0x95c), region = 52 }
   0xe   : > { %p394_p4 = scmp.lt.s32.totalorder %s2746_s27, 1  ;;  %p2287_p5 = scmp.ne.s32.totalorder %s2746_s27, 0 }
   0xf   : > { %v431_v0 = vld [vmem:[%s3552_s0] sm:$0xff] (!%p2287_p5)  ;;  %v432_v1 = vld [vmem:[%s3552_s0 + $0x8] sm:$0xff] (!%p2287_p5)  ;;  %v433_v2 = vld [vmem:[%s3552_s0 + $0x10] sm:$0xff] (!%p2287_p5) }
  0x10   : > { %s395_s9 = scalar_select %p394_p4, %s2746_s27, 1 }
  0x11   : > { %430 = sbr.rel (%p2287_p5) target bundleno = 24 (0x18), region = 56  ;;  %439 = vst [vmem:[#allocation2] sm:$0xff] (!%p2287_p5), %v431_v0  ;;  %440 = vst [vmem:[#allocation2 + $0x8] sm:$0xff] (!%p2287_p5), %v432_v1  ;;  %v434_v3 = vld [vmem:[%s3552_s0 + $0x18] sm:$0xff] (!%p2287_p5)  ;;  %v435_v4 = vld [vmem:[%s3552_s0 + $0x20] sm:$0xff] (!%p2287_p5) }
  0x12   : > { %s2280_s10 = sshll.u32 %s395_s9, 3  ;;  %s2389_s11 = sshll.u32 %s395_s9, 8  ;;  %441 = vst [vmem:[#allocation2 + $0x10] sm:$0xff] (!%p2287_p5), %v433_v2  ;;  %v436_v5 = vld [vmem:[%s3552_s0 + $0x28] sm:$0xff] (!%p2287_p5)  ;;  %442 = vst [vmem:[#allocation2 + $0x18] sm:$0xff] (!%p2287_p5), %v434_v3  ;;  %v437_v6 = vld [vmem:[%s3552_s0 + $0x30] sm:$0xff] (!%p2287_p5) }
  0x13   : > { %s2827_s14 = scalar_lea.vmem %s3553_s1, %s2280_s10  ;;  %s2832_s17 = scalar_lea.vmem %s3554_s2, %s2280_s10  ;;  %443 = vst [vmem:[#allocation2 + $0x20] sm:$0xff] (!%p2287_p5), %v435_v4  ;;  %444 = vst [vmem:[#allocation2 + $0x28] sm:$0xff] (!%p2287_p5), %v436_v5  ;;  %v438_v7 = vld [vmem:[%s3552_s0 + $0x38] sm:$0xff] (!%p2287_p5) }
  0x14   : > { %s2837_s20 = scalar_lea.vmem %s3555_s3, %s2389_s11  ;;  %s2842_s23 = scalar_lea.vmem %s3556_s4, %s2389_s11  ;;  %445 = vst [vmem:[#allocation2 + $0x30] sm:$0xff] (!%p2287_p5), %v437_v6  ;;  %446 = vst [vmem:[#allocation2 + $0x38] sm:$0xff] (!%p2287_p5), %v438_v7 }
  0x15   : > { %s2286_s24 = sshll.u32 %s395_s9, 2 }
  0x16   : > { %s2847_s12 = scalar_lea.vmem %s3557_s5, %s2286_s24 }
  0x18 PF: > { %v2468_v8 = vld [vmem:[%s2837_s20 + $0x4] ss:$16 sps:$4 sm:$0xff]   ;;  %v2470_v9 = vld [vmem:[%s2837_s20 + $0xc] ss:$16 sps:$4 sm:$0xff]   ;;  %v3561_v10 = vmov 0   ;;  %p2376_p6 = scmp.ne.s32.totalorder %s2746_s27, 1 }
  0x19   : > { %739 = vmatprep.mubr.bf16.mxu0 %v3561_v10  ;;  %812 = vmatprep.mubr.bf16.mxu1 %v3561_v10  ;;  %v2472_v11 = vld [vmem:[%s2837_s20] ss:$16 sps:$4 sm:$0xff]   ;;  %v2473_v12 = vld [vmem:[%s2837_s20 + $0x8] ss:$16 sps:$4 sm:$0xff]   ;;  %v2474_v13 = vld [vmem:[%s2837_s20 + $0x24] ss:$16 sps:$4 sm:$0xff]  }
  0x1a   : > { %707 = vmatprep.subr.bf16.mxu0 %v2468_v8  ;;  %780 = vmatprep.subr.bf16.mxu1 %v2470_v9  ;;  %v2476_v14 = vld [vmem:[%s2837_s20 + $0x2c] ss:$16 sps:$4 sm:$0xff]   ;;  %v2478_v15 = vld [vmem:[%s2837_s20 + $0x20] ss:$16 sps:$4 sm:$0xff]   ;;  %v2479_v16 = vld [vmem:[%s2837_s20 + $0x28] ss:$16 sps:$4 sm:$0xff]  }
  0x1b   : > { %708 = vmatpush1.bf16.msra.mxu0 %v2472_v11  ;;  %781 = vmatpush1.bf16.msra.mxu1 %v2473_v12  ;;  %v2480_v17 = vld [vmem:[%s2837_s20 + $0x44] ss:$16 sps:$4 sm:$0xff]   ;;  %v2482_v18 = vld [vmem:[%s2837_s20 + $0x4c] ss:$16 sps:$4 sm:$0xff]   ;;  %v2484_v19 = vld [vmem:[%s2837_s20 + $0x40] ss:$16 sps:$4 sm:$0xff]  }
  0x1c   : > { %709 = vmatprep.subr.bf16.mxu0 %v2474_v13  ;;  %782 = vmatprep.subr.bf16.mxu1 %v2476_v14  ;;  %v2485_v20 = vld [vmem:[%s2837_s20 + $0x48] ss:$16 sps:$4 sm:$0xff]   ;;  %v2486_v21 = vld [vmem:[%s2837_s20 + $0x64] ss:$16 sps:$4 sm:$0xff]   ;;  %v2488_v22 = vld [vmem:[%s2837_s20 + $0x6c] ss:$16 sps:$4 sm:$0xff]  }
  0x1d   : > { %v2490_v23 = vld [vmem:[%s2837_s20 + $0x60] ss:$16 sps:$4 sm:$0xff]   ;;  %v2491_v24 = vld [vmem:[%s2837_s20 + $0x68] ss:$16 sps:$4 sm:$0xff]   ;;  %v2492_v25 = vld [vmem:[%s2837_s20 + $0x84] ss:$16 sps:$4 sm:$0xff]  }
  0x1e   : > { %v2494_v26 = vld [vmem:[%s2837_s20 + $0x8c] ss:$16 sps:$4 sm:$0xff]   ;;  %v2496_v27 = vld [vmem:[%s2837_s20 + $0x80] ss:$16 sps:$4 sm:$0xff]   ;;  %v2497_v28 = vld [vmem:[%s2837_s20 + $0x88] ss:$16 sps:$4 sm:$0xff]  }
  0x1f   : > { %710 = vmatpush1.bf16.msra.mxu0 %v2478_v15  ;;  %783 = vmatpush1.bf16.msra.mxu1 %v2479_v16  ;;  %v2498_v29 = vld [vmem:[%s2837_s20 + $0xa4] ss:$16 sps:$4 sm:$0xff]   ;;  %v2500_v30 = vld [vmem:[%s2837_s20 + $0xac] ss:$16 sps:$4 sm:$0xff]   ;;  %v2502_v31 = vld [vmem:[%s2837_s20 + $0xa0] ss:$16 sps:$4 sm:$0xff]  }
  0x20   : > { %711 = vmatprep.subr.bf16.mxu0 %v2480_v17  ;;  %784 = vmatprep.subr.bf16.mxu1 %v2482_v18  ;;  %v2503_v32 = vld [vmem:[%s2837_s20 + $0xa8] ss:$16 sps:$4 sm:$0xff]   ;;  %v2504_v33 = vld [vmem:[%s2837_s20 + $0xc4] ss:$16 sps:$4 sm:$0xff]   ;;  %v2506_v34 = vld [vmem:[%s2837_s20 + $0xcc] ss:$16 sps:$4 sm:$0xff]  }
  0x21   : > { %v2508_v35 = vld [vmem:[%s2837_s20 + $0xc0] ss:$16 sps:$4 sm:$0xff]   ;;  %v2509_v36 = vld [vmem:[%s2837_s20 + $0xc8] ss:$16 sps:$4 sm:$0xff]   ;;  %v2510_v37 = vld [vmem:[%s2837_s20 + $0xe4] ss:$16 sps:$4 sm:$0xff]  }
  0x22   : > { %v2512_v38 = vld [vmem:[%s2837_s20 + $0xec] ss:$16 sps:$4 sm:$0xff]   ;;  %v2514_v39 = vld [vmem:[%s2837_s20 + $0xe0] ss:$16 sps:$4 sm:$0xff]   ;;  %v2515_v40 = vld [vmem:[%s2837_s20 + $0xe8] ss:$16 sps:$4 sm:$0xff]  }
  0x23   : > { %712 = vmatpush1.bf16.msra.mxu0 %v2484_v19  ;;  %785 = vmatpush1.bf16.msra.mxu1 %v2485_v20  ;;  %v514_v41 = vld [vmem:[#allocation2] sm:$0xff]  ;;  %v515_v42 = vld [vmem:[#allocation2 + $0x8] sm:$0xff]  ;;  %v516_v52 = vld [vmem:[#allocation2 + $0x10] sm:$0xff] }
  0x24   : > { %713 = vmatprep.subr.bf16.mxu0 %v2486_v21  ;;  %786 = vmatprep.subr.bf16.mxu1 %v2488_v22  ;;  %v2909_v43 = vld [vmem:[%s2842_s23 + $0x4] ss:$16 sps:$4 sm:$0xff]   ;;  %v2912_v44 = vld [vmem:[%s2842_s23 + $0xc] ss:$16 sps:$4 sm:$0xff]   ;;  %v522_v45 = vpack.c.bf16 %v515_v42, %v514_v41  ;;  %v2915_v46 = vld [vmem:[%s2842_s23] ss:$16 sps:$4 sm:$0xff]  }
  0x25   : > { %v2918_v47 = vld [vmem:[%s2842_s23 + $0x8] ss:$16 sps:$4 sm:$0xff]   ;;  %v2923_v48 = vld [vmem:[%s2842_s23 + $0x24] ss:$16 sps:$4 sm:$0xff]   ;;  %v2926_v49 = vld [vmem:[%s2842_s23 + $0x2c] ss:$16 sps:$4 sm:$0xff]  }
  0x26   : > { %v2929_v50 = vld [vmem:[%s2842_s23 + $0x20] ss:$16 sps:$4 sm:$0xff]   ;;  %v2932_v51 = vld [vmem:[%s2842_s23 + $0x28] ss:$16 sps:$4 sm:$0xff]   ;;  %v2937_v54 = vld [vmem:[%s2842_s23 + $0x44] ss:$16 sps:$4 sm:$0xff]  }
  0x27   : > { %714 = vmatpush1.bf16.msra.mxu0 %v2490_v23  ;;  %787 = vmatpush1.bf16.msra.mxu1 %v2491_v24  ;;  %v517_v53 = vld [vmem:[#allocation2 + $0x18] sm:$0xff]  ;;  %v2947_v57 = vld [vmem:[%s2842_s23 + $0x40] ss:$16 sps:$4 sm:$0xff]   ;;  %v2955_v59 = vld [vmem:[%s2842_s23 + $0x64] ss:$16 sps:$4 sm:$0xff]   ;;  %v527_v24 = vlaneseq }
  0x28   : > { %715 = vmatprep.subr.bf16.mxu0 %v2492_v25  ;;  %788 = vmatprep.subr.bf16.mxu1 %v2494_v26  ;;  %v2942_v55 = vld [vmem:[%s2842_s23 + $0x4c] ss:$16 sps:$4 sm:$0xff]   ;;  %v523_v56 = vpack.c.bf16 %v517_v53, %v516_v52  ;;  %v2950_v58 = vld [vmem:[%s2842_s23 + $0x48] ss:$16 sps:$4 sm:$0xff]   ;;  %v2963_v61 = vld [vmem:[%s2842_s23 + $0x60] ss:$16 sps:$4 sm:$0xff]  }
  0x29   : > { %v2960_v60 = vld [vmem:[%s2842_s23 + $0x6c] ss:$16 sps:$4 sm:$0xff]   ;;  %v2966_v62 = vld [vmem:[%s2842_s23 + $0x68] ss:$16 sps:$4 sm:$0xff]   ;;  %v518_v63 = vld [vmem:[#allocation2 + $0x20] sm:$0xff]  ;;  %v528_v25 = vshrl.u32 %v527_v24, 7 }
  0x2a   : > { %v519_v0 = vld [vmem:[#allocation2 + $0x28] sm:$0xff]  ;;  %v2973_v1 = vld [vmem:[%s2842_s23 + $0x84] ss:$16 sps:$4 sm:$0xff]   ;;  %v2983_v4 = vld [vmem:[%s2842_s23 + $0x80] ss:$16 sps:$4 sm:$0xff]  }
  0x2b   : > { %716 = vmatpush1.bf16.msra.mxu0 %v2496_v27  ;;  %789 = vmatpush1.bf16.msra.mxu1 %v2497_v28  ;;  %v2976_v2 = vld [vmem:[%s2842_s23 + $0x8c] ss:$16 sps:$4 sm:$0xff]   ;;  %v524_v3 = vpack.c.bf16 %v519_v0, %v518_v63  ;;  %v2986_v5 = vld [vmem:[%s2842_s23 + $0x88] ss:$16 sps:$4 sm:$0xff]   ;;  %v2991_v6 = vld [vmem:[%s2842_s23 + $0xa4] ss:$16 sps:$4 sm:$0xff]  }
  0x2c   : > { %717 = vmatprep.subr.bf16.mxu0 %v2498_v29  ;;  %790 = vmatprep.subr.bf16.mxu1 %v2500_v30  ;;  %v2994_v7 = vld [vmem:[%s2842_s23 + $0xac] ss:$16 sps:$4 sm:$0xff]   ;;  %v2997_v8 = vld [vmem:[%s2842_s23 + $0xa0] ss:$16 sps:$4 sm:$0xff]   ;;  %v3002_v9 = vld [vmem:[%s2842_s23 + $0xa8] ss:$16 sps:$4 sm:$0xff]  }
  0x2d   : > { %v520_v11 = vld [vmem:[#allocation2 + $0x30] sm:$0xff]  ;;  %v521_v12 = vld [vmem:[#allocation2 + $0x38] sm:$0xff]  ;;  %v447_v22 = vld [vmem:[%s2827_s14] sm:$0xff]  ;;  %v537_v26 = vsub.s32 2, %v528_v25  ;;  %v541_v27 = vsub.s32 3, %v528_v25  ;;  %v529_v28 = vsub.s32 0, %v528_v25 }
  0x2e   : > { %v3007_v13 = vld [vmem:[%s2842_s23 + $0xc4] ss:$16 sps:$4 sm:$0xff]   ;;  %v3010_v14 = vld [vmem:[%s2842_s23 + $0xcc] ss:$16 sps:$4 sm:$0xff]   ;;  %v525_v15 = vpack.c.bf16 %v521_v12, %v520_v11  ;;  %v3017_v16 = vld [vmem:[%s2842_s23 + $0xc0] ss:$16 sps:$4 sm:$0xff]   ;;  %v889_v23 = vpack.c.bf16 %v447_v22, %v447_v22 }
  0x2f   : > { %718 = vmatpush1.bf16.msra.mxu0 %v2502_v31  ;;  %791 = vmatpush1.bf16.msra.mxu1 %v2503_v32  ;;  %v3020_v17 = vld [vmem:[%s2842_s23 + $0xc8] ss:$16 sps:$4 sm:$0xff]   ;;  %v3025_v18 = vld [vmem:[%s2842_s23 + $0xe4] ss:$16 sps:$4 sm:$0xff]   ;;  %v3028_v19 = vld [vmem:[%s2842_s23 + $0xec] ss:$16 sps:$4 sm:$0xff]  }
  0x30   : > { %719 = vmatprep.subr.bf16.mxu0 %v2504_v33  ;;  %792 = vmatprep.subr.bf16.mxu1 %v2506_v34  ;;  %v3033_v20 = vld [vmem:[%s2842_s23 + $0xe0] ss:$16 sps:$4 sm:$0xff]   ;;  %v3036_v21 = vld [vmem:[%s2842_s23 + $0xe8] ss:$16 sps:$4 sm:$0xff]   ;;  %v533_v30 = vsub.s32 1, %v528_v25 }
  0x31   : > { %v513_v29 = vld [vmem:[%s2847_s12] sm:$0xf] }
  0x32   : > { %v3082_v31 = vrot.slane %v513_v29, %v537_v26  ;;  %v3088_v34 = vrot.slane %v513_v29, %v541_v27 }
  0x33   : > { %720 = vmatpush1.bf16.msra.mxu0 %v2508_v35  ;;  %793 = vmatpush1.bf16.msra.mxu1 %v2509_v36  ;;  %v530_v35 = vrot.slane %v513_v29, %v529_v28 }
  0x34   : > { %721 = vmatprep.subr.bf16.mxu0 %v2510_v37  ;;  %794 = vmatprep.subr.bf16.mxu1 %v2512_v38  ;;  %v534_v38 = vrot.slane %v513_v29, %v533_v30 }
  0x37   : > { %722 = vmatpush1.bf16.msra.mxu0 %v2514_v39  ;;  %795 = vmatpush1.bf16.msra.mxu1 %v2515_v40 }
  0x38   : > { %1050 = vmatprep.subr.bf16.mxu0 %v2909_v43  ;;  %1091 = vmatprep.subr.bf16.mxu1 %v2912_v44 }
  0x3a   : > { %740 = vmatmul.mubr.bf16.vlgmr.msra.gmra.mrb[0].mxu0 %v522_v45  ;;  %813 = vmatmul.mubr.bf16.vlgmr.msra.gmra.mrb[0].mxu1 %v522_v45 }
  0x3b   : > { %1051 = vmatpush1.bf16.msra.mxu0 %v2915_v46  ;;  %1092 = vmatpush1.bf16.msra.mxu1 %v2918_v47 }
  0x3c   : > { %1052 = vmatprep.subr.bf16.mxu0 %v2923_v48  ;;  %1093 = vmatprep.subr.bf16.mxu1 %v2926_v49 }
  0x3d   : > { %749 = vmatprep.mubr.bf16.mxu0 %v3561_v10  ;;  %822 = vmatprep.mubr.bf16.mxu1 %v3561_v10 }
  0x3f   : > { %1053 = vmatpush1.bf16.msra.mxu0 %v2929_v50  ;;  %1094 = vmatpush1.bf16.msra.mxu1 %v2932_v51 }
  0x40   : > { %1054 = vmatprep.subr.bf16.mxu0 %v2937_v54  ;;  %1095 = vmatprep.subr.bf16.mxu1 %v2942_v55 }
  0x42   : > { %750 = vmatmul.mubr.bf16.gmra.mrb[4].mxu0 %v523_v56  ;;  %823 = vmatmul.mubr.bf16.gmra.mrb[4].mxu1 %v523_v56 }
  0x43   : > { %1055 = vmatpush1.bf16.msra.mxu0 %v2947_v57  ;;  %1096 = vmatpush1.bf16.msra.mxu1 %v2950_v58 }
  0x44   : > { %1056 = vmatprep.subr.bf16.mxu0 %v2955_v59  ;;  %1097 = vmatprep.subr.bf16.mxu1 %v2960_v60 }
  0x45   : > { %759 = vmatprep.mubr.bf16.mxu0 %v3561_v10  ;;  %832 = vmatprep.mubr.bf16.mxu1 %v3561_v10 }
  0x47   : > { %1057 = vmatpush1.bf16.msra.mxu0 %v2963_v61  ;;  %1098 = vmatpush1.bf16.msra.mxu1 %v2966_v62 }
  0x48   : > { %1058 = vmatprep.subr.bf16.mxu0 %v2973_v1  ;;  %1099 = vmatprep.subr.bf16.mxu1 %v2976_v2 }
  0x4a   : > { %760 = vmatmul.mubr.bf16.gmra.mrb[8].mxu0 %v524_v3  ;;  %833 = vmatmul.mubr.bf16.gmra.mrb[8].mxu1 %v524_v3 }
  0x4b   : > { %1059 = vmatpush1.bf16.msra.mxu0 %v2983_v4  ;;  %1100 = vmatpush1.bf16.msra.mxu1 %v2986_v5 }
  0x4c   : > { %1060 = vmatprep.subr.bf16.mxu0 %v2991_v6  ;;  %1101 = vmatprep.subr.bf16.mxu1 %v2994_v7 }
  0x4d   : > { %769 = vmatprep.mubr.bf16.mxu0 %v3561_v10  ;;  %842 = vmatprep.mubr.bf16.mxu1 %v3561_v10 }
  0x4f   : > { %1061 = vmatpush1.bf16.msra.mxu0 %v2997_v8  ;;  %1102 = vmatpush1.bf16.msra.mxu1 %v3002_v9 }
  0x50   : > { %1062 = vmatprep.subr.bf16.mxu0 %v3007_v13  ;;  %1103 = vmatprep.subr.bf16.mxu1 %v3010_v14 }
  0x52   : > { %770 = vmatmul.mubr.bf16.gmra.mrb[12].mxu0 %v525_v15  ;;  %843 = vmatmul.mubr.bf16.gmra.mrb[12].mxu1 %v525_v15 }
  0x53   : > { %1063 = vmatpush1.bf16.msra.mxu0 %v3017_v16  ;;  %1104 = vmatpush1.bf16.msra.mxu1 %v3020_v17 }
  0x54   : > { %1064 = vmatprep.subr.bf16.mxu0 %v3025_v18  ;;  %1105 = vmatprep.subr.bf16.mxu1 %v3028_v19 }
  0x55   : > { %1082 = vmatprep.mubr.bf16.mxu0 %v3561_v10  ;;  %1123 = vmatprep.mubr.bf16.mxu1 %v3561_v10 }
  0x57   : > { %1065 = vmatpush1.bf16.msra.mxu0 %v3033_v20  ;;  %1106 = vmatpush1.bf16.msra.mxu1 %v3036_v21 }
  0x58   : > { %1167 = vmatprep.subr.bf16.mxu0 %v2909_v43  ;;  %1208 = vmatprep.subr.bf16.mxu1 %v2912_v44 }
  0x5a   : > { %1083 = vmatmul.mubr.bf16.vlgmr.msra.gmra.mrb[16].mxu0 %v889_v23  ;;  %1124 = vmatmul.mubr.bf16.vlgmr.msra.gmra.mrb[16].mxu1 %v889_v23 }
  0x5b   : > { %1168 = vmatpush1.bf16.msra.mxu0 %v2915_v46  ;;  %1209 = vmatpush1.bf16.msra.mxu1 %v2918_v47 }
  0x5c   : > { %1169 = vmatprep.subr.bf16.mxu0 %v2923_v48  ;;  %1210 = vmatprep.subr.bf16.mxu1 %v2926_v49 }
  0x5d   : > { %1199 = vmatprep.mubr.bf16.mxu0 %v3561_v10  ;;  %1240 = vmatprep.mubr.bf16.mxu1 %v3561_v10 }
  0x5f   : > { %1170 = vmatpush1.bf16.msra.mxu0 %v2929_v50  ;;  %1211 = vmatpush1.bf16.msra.mxu1 %v2932_v51 }
  0x60   : > { %1171 = vmatprep.subr.bf16.mxu0 %v2937_v54  ;;  %1212 = vmatprep.subr.bf16.mxu1 %v2942_v55 }
  0x63   : > { %1172 = vmatpush1.bf16.msra.mxu0 %v2947_v57  ;;  %1213 = vmatpush1.bf16.msra.mxu1 %v2950_v58 }
  0x64   : > { %1173 = vmatprep.subr.bf16.mxu0 %v2955_v59  ;;  %1214 = vmatprep.subr.bf16.mxu1 %v2960_v60 }
  0x67   : > { %1174 = vmatpush1.bf16.msra.mxu0 %v2963_v61  ;;  %1215 = vmatpush1.bf16.msra.mxu1 %v2966_v62 }
  0x68   : > { %1175 = vmatprep.subr.bf16.mxu0 %v2973_v1  ;;  %1216 = vmatprep.subr.bf16.mxu1 %v2976_v2 }
  0x6b   : > { %1176 = vmatpush1.bf16.msra.mxu0 %v2983_v4  ;;  %1217 = vmatpush1.bf16.msra.mxu1 %v2986_v5 }
  0x6c   : > { %1177 = vmatprep.subr.bf16.mxu0 %v2991_v6  ;;  %1218 = vmatprep.subr.bf16.mxu1 %v2994_v7 }
  0x6f   : > { %1178 = vmatpush1.bf16.msra.mxu0 %v2997_v8  ;;  %1219 = vmatpush1.bf16.msra.mxu1 %v3002_v9 }
  0x70   : > { %1179 = vmatprep.subr.bf16.mxu0 %v3007_v13  ;;  %1220 = vmatprep.subr.bf16.mxu1 %v3010_v14 }
  0x73   : > { %1180 = vmatpush1.bf16.msra.mxu0 %v3017_v16  ;;  %1221 = vmatpush1.bf16.msra.mxu1 %v3020_v17 }
  0x74   : > { %1181 = vmatprep.subr.bf16.mxu0 %v3025_v18  ;;  %1222 = vmatprep.subr.bf16.mxu1 %v3028_v19 }
  0x77   : > { %1182 = vmatpush1.bf16.msra.mxu0 %v3033_v20  ;;  %1223 = vmatpush1.bf16.msra.mxu1 %v3036_v21 }
  0x78   : > { %1285 = vmatprep.subr.bf16.mxu0 %v2909_v43  ;;  %1326 = vmatprep.subr.bf16.mxu1 %v2912_v44 }
 0x10d   : > { %v3084_v32 = vpop.f32.mrb[0].mxu0  ;;  %v3086_v33 = vpop.f32.mrb[0].mxu1 }
 0x10e   : > { %v743_v36 = vpop.f32.mrb[1].mxu0  ;;  %v816_v37 = vpop.f32.mrb[1].mxu1 }
 0x10f   : > { %v745_v39 = vpop.f32.mrb[2].mxu0  ;;  %v818_v40 = vpop.f32.mrb[2].mxu1 }
 0x110   : > { %v3090_v41 = vadd.f32 %v745_v39, %v530_v35  ;;  %v747_v42 = vpop.f32.mrb[3].mxu0  ;;  %v3093_v45 = vadd.f32 %v818_v40, %v3082_v31  ;;  %v820_v52 = vpop.f32.mrb[3].mxu1 }
 0x111   : > { %v3095_v53 = vadd.f32 %v747_v42, %v534_v38  ;;  %v3098_v56 = vadd.f32 %v820_v52, %v3088_v34 }
 0x115   : > { %v751_v63 = vpop.f32.mrb[4].mxu0  ;;  %v824_v0 = vpop.f32.mrb[4].mxu1 }
 0x116   : > { %v3100_v3 = vadd.f32 %v751_v63, %v530_v35  ;;  %v753_v11 = vpop.f32.mrb[5].mxu0  ;;  %v3103_v12 = vadd.f32 %v824_v0, %v3082_v31  ;;  %v826_v15 = vpop.f32.mrb[5].mxu1 }
 0x117   : > { %v3105_v22 = vadd.f32 %v753_v11, %v534_v38  ;;  %v755_v23 = vpop.f32.mrb[6].mxu0  ;;  %v3108_v24 = vadd.f32 %v826_v15, %v3088_v34  ;;  %v828_v25 = vpop.f32.mrb[6].mxu1 }
 0x118   : > { %v3110_v26 = vadd.f32 %v755_v23, %v530_v35  ;;  %v757_v27 = vpop.f32.mrb[7].mxu0  ;;  %v3113_v28 = vadd.f32 %v828_v25, %v3082_v31  ;;  %v830_v29 = vpop.f32.mrb[7].mxu1 }
 0x119   : > { %v3115_v30 = vadd.f32 %v757_v27, %v534_v38  ;;  %v3118_v39 = vadd.f32 %v830_v29, %v3088_v34 }
 0x11a   : > { %3563 = vst [vmem:[#allocation4_spill] sm:$0xff] %v3110_v26  ;;  %3564 = vst [vmem:[#allocation5_spill] sm:$0xff] %v3113_v28 }
 0x11b   : > { %3565 = vst [vmem:[#allocation6_spill] sm:$0xff] %v3115_v30  ;;  %3566 = vst [vmem:[#allocation7_spill] sm:$0xff] %v3118_v39 }
 0x11d   : > { %v761_v40 = vpop.f32.mrb[8].mxu0  ;;  %v834_v42 = vpop.f32.mrb[8].mxu1 }
 0x11e   : > { %v3120_v52 = vadd.f32 %v761_v40, %v530_v35  ;;  %v763_v63 = vpop.f32.mrb[9].mxu0  ;;  %v3123_v0 = vadd.f32 %v834_v42, %v3082_v31  ;;  %v836_v11 = vpop.f32.mrb[9].mxu1 }
 0x11f   : > { %v3125_v15 = vadd.f32 %v763_v63, %v534_v38  ;;  %v765_v23 = vpop.f32.mrb[10].mxu0  ;;  %v3128_v25 = vadd.f32 %v836_v11, %v3088_v34  ;;  %v838_v27 = vpop.f32.mrb[10].mxu1 }
 0x120   : > { %3567 = vst [vmem:[#allocation8_spill] sm:$0xff] %v3120_v52  ;;  %3568 = vst [vmem:[#allocation9_spill] sm:$0xff] %v3123_v0  ;;  %v3130_v10 = vadd.f32 %v765_v23, %v530_v35  ;;  %v767_v29 = vpop.f32.mrb[11].mxu0  ;;  %v3133_v39 = vadd.f32 %v838_v27, %v3082_v31  ;;  %v840_v40 = vpop.f32.mrb[11].mxu1 }
 0x121   : > { %3569 = vst [vmem:[#allocation10_spill] sm:$0xff] %v3125_v15  ;;  %3570 = vst [vmem:[#allocation11_spill] sm:$0xff] %v3128_v25  ;;  %v3135_v52 = vadd.f32 %v767_v29, %v534_v38  ;;  %v3138_v42 = vadd.f32 %v840_v40, %v3088_v34 }
 0x122   : > { %3571 = vst [vmem:[#allocation12_spill] sm:$0xff] %v3130_v10  ;;  %3572 = vst [vmem:[#allocation13_spill] sm:$0xff] %v3133_v39 }
 0x123   : > { %3573 = vst [vmem:[#allocation14_spill] sm:$0xff] %v3135_v52  ;;  %3574 = vst [vmem:[#allocation15_spill] sm:$0xff] %v3138_v42 }
 0x125   : > { %v771_v0 = vpop.f32.mrb[12].mxu0  ;;  %v844_v63 = vpop.f32.mrb[12].mxu1 }
 0x126   : > { %v3140_v15 = vadd.f32 %v771_v0, %v530_v35  ;;  %v773_v30 = vpop.f32.mrb[13].mxu0  ;;  %v3143_v11 = vadd.f32 %v844_v63, %v3082_v31  ;;  %v846_v23 = vpop.f32.mrb[13].mxu1 }
 0x127   : > { %v3145_v10 = vadd.f32 %v773_v30, %v534_v38  ;;  %v775_v25 = vpop.f32.mrb[14].mxu0  ;;  %v3148_v27 = vadd.f32 %v846_v23, %v3088_v34  ;;  %v848_v29 = vpop.f32.mrb[14].mxu1  ;;  %v742_v30 = vadd.f32 %v3084_v32, %v530_v35  ;;  %v744_v23 = vadd.f32 %v743_v36, %v534_v38 }
 0x128   : > { %3575 = vst [vmem:[#allocation16_spill] sm:$0xff] %v3140_v15  ;;  %3576 = vst [vmem:[#allocation17_spill] sm:$0xff] %v3143_v11  ;;  %v3150_v52 = vadd.f32 %v775_v25, %v530_v35  ;;  %v777_v40 = vpop.f32.mrb[15].mxu0  ;;  %v3153_v42 = vadd.f32 %v848_v29, %v3082_v31  ;;  %v850_v0 = vpop.f32.mrb[15].mxu1 }
 0x129   : > { %3577 = vst [vmem:[#allocation18_spill] sm:$0xff] %v3145_v10  ;;  %3578 = vst [vmem:[#allocation19_spill] sm:$0xff] %v3148_v27  ;;  %v3155_v15 = vadd.f32 %v777_v40, %v534_v38  ;;  %v3158_v63 = vadd.f32 %v850_v0, %v3088_v34  ;;  %v815_v10 = vadd.f32 %v3086_v33, %v3082_v31 }
 0x12a   : > { %3579 = vst [vmem:[#allocation20_spill] sm:$0xff] %v3150_v52  ;;  %3580 = vst [vmem:[#allocation21_spill] sm:$0xff] %v3153_v42  ;;  %v817_v27 = vadd.f32 %v816_v37, %v3088_v34 }
 0x12b   : > { %3581 = vst [vmem:[#allocation22_spill] sm:$0xff] %v3155_v15  ;;  %3582 = vst [vmem:[#allocation23_spill] sm:$0xff] %v3158_v63 }
 0x12d   : > { %v1084_v25 = vpop.f32.mrb[16].mxu0  ;;  %v1125_v52 = vpop.f32.mrb[16].mxu1 }
 0x12e   : > { %v1132_v11 = vadd.f32 %v1084_v25, %v742_v30  ;;  %v1134_v39 = vadd.f32 %v1125_v52, %v815_v10  ;;  %v1086_v29 = vpop.f32.mrb[17].mxu0  ;;  %v1127_v42 = vpop.f32.mrb[17].mxu1  ;;  %v448_v52 = vld [vmem:[%s2832_s17] sm:$0xff]  ;;  %v3583_v25 = vmov 0  }
 0x12f   : > { %v1133_v28 = vadd.f32 %v1086_v29, %v744_v23  ;;  %v1135_v40 = vadd.f32 %v1127_v42, %v817_v27  ;;  %v1088_v15 = vpop.f32.mrb[18].mxu0  ;;  %v1129_v26 = vpop.f32.mrb[18].mxu1 }
 0x130   : > { %v2352_v0 = vmul.f32 -1.442695, %v1132_v11  ;;  %v1089_v63 = vpop.f32.mrb[19].mxu0  ;;  %v1130_v32 = vpop.f32.mrb[19].mxu1 }
 0x131   : > { %v2353_v35 = vmul.f32 -1.442695, %v1133_v28  ;;  %v2354_v31 = vmul.f32 -1.442695, %v1135_v40 }
 0x132   : > { %2564 = vpow2.f32 %v2352_v0 }
 0x133   : > { %2566 = vpow2.f32 %v2353_v35 }
 0x134   : > { %2568 = vpow2.f32 %v2354_v31 }
 0x135   : > { %2570 = vtanh.f32 %v1134_v39 }
 0x13c   : > { %v2565_v33 = vpop.eup %2564 }
 0x13d   : > { %v2567_v34 = vpop.eup %2566  ;;  %v1145_v36 = vadd.f32 1.0, %v2565_v33 }
 0x13e   : > { %v1146_v10 = vadd.f32 1.0, %v2567_v34  ;;  %v2569_v37 = vpop.eup %2568 }
 0x13f   : > { %2572 = vrcp.f32 %v1145_v36  ;;  %v2571_v38 = vpop.eup %2570  ;;  %v1147_v11 = vadd.f32 1.0, %v2569_v37 }
 0x140   : > { %2574 = vrcp.f32 %v1146_v10 }
 0x141   : > { %2576 = vrcp.f32 %v1147_v11 }
 0x149   : > { %v2573_v26 = vpop.eup %2572 }
 0x14a   : > { %v2575_v15 = vpop.eup %2574  ;;  %v1156_v42 = vmul.f32 %v2573_v26, %v2571_v38 }
 0x14b   : > { %v1155_v27 = vmul.f32 %v2575_v15, %v448_v52  ;;  %v2577_v63 = vpop.eup %2576 }
 0x14d   : > { %v3165_v28 = vadd.f32 %v1156_v42, %v1155_v27 }
 0x14f   : > { %2578 = vtanh.f32 %v3165_v28 }
 0x159   : > { %v2579_v30 = vpop.eup %2578 }
 0x15a   : > { %v1159_v23 = vmul.f32 %v2579_v30, %v2577_v63 }
 0x15c   : > { %1160 = vst [vmem:[#allocation2] sm:$0xff] %v1159_v23  ;;  %v1166_v39 = vpack.c.bf16 %v1159_v23, %v1159_v23 }
 0x15e   : > { %1200 = vmatmul.mubr.bf16.vlgmr.msra.gmra.mrb[20].mxu0 %v1166_v39  ;;  %1241 = vmatmul.mubr.bf16.vlgmr.msra.gmra.mrb[20].mxu1 %v1166_v39 }
 0x15f   : > { %1286 = vmatpush1.bf16.msra.mxu0 %v2915_v46  ;;  %1327 = vmatpush1.bf16.msra.mxu1 %v2918_v47 }
 0x160   : > { %1287 = vmatprep.subr.bf16.mxu0 %v2923_v48  ;;  %1328 = vmatprep.subr.bf16.mxu1 %v2926_v49 }
 0x161   : > { %1317 = vmatprep.mubr.bf16.mxu0 %v3583_v25  ;;  %1358 = vmatprep.mubr.bf16.mxu1 %v3583_v25 }
 0x163   : > { %1288 = vmatpush1.bf16.msra.mxu0 %v2929_v50  ;;  %1329 = vmatpush1.bf16.msra.mxu1 %v2932_v51 }
 0x164   : > { %1289 = vmatprep.subr.bf16.mxu0 %v2937_v54  ;;  %1330 = vmatprep.subr.bf16.mxu1 %v2942_v55 }
 0x167   : > { %1290 = vmatpush1.bf16.msra.mxu0 %v2947_v57  ;;  %1331 = vmatpush1.bf16.msra.mxu1 %v2950_v58 }
 0x168   : > { %1291 = vmatprep.subr.bf16.mxu0 %v2955_v59  ;;  %1332 = vmatprep.subr.bf16.mxu1 %v2960_v60 }
 0x16b   : > { %1292 = vmatpush1.bf16.msra.mxu0 %v2963_v61  ;;  %1333 = vmatpush1.bf16.msra.mxu1 %v2966_v62 }
 0x16c   : > { %1293 = vmatprep.subr.bf16.mxu0 %v2973_v1  ;;  %1334 = vmatprep.subr.bf16.mxu1 %v2976_v2 }
 0x16f   : > { %1294 = vmatpush1.bf16.msra.mxu0 %v2983_v4  ;;  %1335 = vmatpush1.bf16.msra.mxu1 %v2986_v5 }
 0x170   : > { %1295 = vmatprep.subr.bf16.mxu0 %v2991_v6  ;;  %1336 = vmatprep.subr.bf16.mxu1 %v2994_v7 }
 0x173   : > { %1296 = vmatpush1.bf16.msra.mxu0 %v2997_v8  ;;  %1337 = vmatpush1.bf16.msra.mxu1 %v3002_v9 }
 0x174   : > { %1297 = vmatprep.subr.bf16.mxu0 %v3007_v13  ;;  %1338 = vmatprep.subr.bf16.mxu1 %v3010_v14 }
 0x177   : > { %1298 = vmatpush1.bf16.msra.mxu0 %v3017_v16  ;;  %1339 = vmatpush1.bf16.msra.mxu1 %v3020_v17 }
 0x178   : > { %1299 = vmatprep.subr.bf16.mxu0 %v3025_v18  ;;  %1340 = vmatprep.subr.bf16.mxu1 %v3028_v19 }
 0x17b   : > { %1300 = vmatpush1.bf16.msra.mxu0 %v3033_v20  ;;  %1341 = vmatpush1.bf16.msra.mxu1 %v3036_v21 }
 0x17c   : > { %1403 = vmatprep.subr.bf16.mxu0 %v2909_v43  ;;  %1444 = vmatprep.subr.bf16.mxu1 %v2912_v44 }
 0x231   : > { %v1201_v29 = vpop.f32.mrb[20].mxu0  ;;  %v1242_v40 = vpop.f32.mrb[20].mxu1 }
 0x232   : > { %v1249_v0 = vadd.f32 %v1201_v29, %v3090_v41  ;;  %v1251_v32 = vadd.f32 %v1242_v40, %v3093_v45  ;;  %v1203_v35 = vpop.f32.mrb[21].mxu0  ;;  %v1244_v31 = vpop.f32.mrb[21].mxu1 }
 0x233   : > { %v1250_v33 = vadd.f32 %v1203_v35, %v3095_v53  ;;  %v1252_v34 = vadd.f32 %v1244_v31, %v3098_v56  ;;  %v1205_v36 = vpop.f32.mrb[22].mxu0  ;;  %v1246_v10 = vpop.f32.mrb[22].mxu1 }
 0x234   : > { %v2355_v37 = vmul.f32 -1.442695, %v1249_v0  ;;  %v1206_v38 = vpop.f32.mrb[23].mxu0  ;;  %v1247_v52 = vpop.f32.mrb[23].mxu1 }
 0x235   : > { %v2356_v26 = vmul.f32 -1.442695, %v1250_v33  ;;  %v2357_v15 = vmul.f32 -1.442695, %v1252_v34 }
 0x236   : > { %2580 = vpow2.f32 %v2355_v37 }
 0x237   : > { %2582 = vpow2.f32 %v2356_v26 }
 0x238   : > { %2584 = vpow2.f32 %v2357_v15 }
 0x239   : > { %2586 = vtanh.f32 %v1251_v32 }
 0x240   : > { %v2581_v42 = vpop.eup %2580 }
 0x241   : > { %v2583_v11 = vpop.eup %2582  ;;  %v1262_v41 = vadd.f32 1.0, %v2581_v42 }
 0x242   : > { %v1263_v45 = vadd.f32 1.0, %v2583_v11  ;;  %v2585_v53 = vpop.eup %2584 }
 0x243   : > { %2588 = vrcp.f32 %v1262_v41  ;;  %v2587_v27 = vpop.eup %2586  ;;  %v1264_v23 = vadd.f32 1.0, %v2585_v53 }
 0x244   : > { %2590 = vrcp.f32 %v1263_v45 }
 0x245   : > { %2592 = vrcp.f32 %v1264_v23 }
 0x24d   : > { %v2589_v56 = vpop.eup %2588 }
 0x24e   : > { %v2591_v63 = vpop.eup %2590  ;;  %v1273_v30 = vmul.f32 %v2589_v56, %v2587_v27 }
 0x24f   : > { %v1272_v39 = vmul.f32 %v2591_v63, %v3165_v28  ;;  %v2593_v40 = vpop.eup %2592 }
 0x251   : > { %v3207_v29 = vadd.f32 %v1273_v30, %v1272_v39 }
 0x253   : > { %2594 = vtanh.f32 %v3207_v29 }
 0x25d   : > { %v2595_v0 = vpop.eup %2594 }
 0x25e   : > { %v1276_v35 = vmul.f32 %v2595_v0, %v2593_v40 }
 0x260   : > { %1278 = vst [vmem:[#allocation2 + $0x8] sm:$0xff] %v1276_v35  ;;  %v1284_v32 = vpack.c.bf16 %v1276_v35, %v1276_v35 }
 0x262   : > { %1318 = vmatmul.mubr.bf16.vlgmr.msra.gmra.mrb[24].mxu0 %v1284_v32  ;;  %1359 = vmatmul.mubr.bf16.vlgmr.msra.gmra.mrb[24].mxu1 %v1284_v32 }
 0x263   : > { %1404 = vmatpush1.bf16.msra.mxu0 %v2915_v46  ;;  %1445 = vmatpush1.bf16.msra.mxu1 %v2918_v47 }
 0x264   : > { %1405 = vmatprep.subr.bf16.mxu0 %v2923_v48  ;;  %1446 = vmatprep.subr.bf16.mxu1 %v2926_v49 }
 0x265   : > { %1435 = vmatprep.mubr.bf16.mxu0 %v3583_v25  ;;  %1476 = vmatprep.mubr.bf16.mxu1 %v3583_v25 }
 0x267   : > { %1406 = vmatpush1.bf16.msra.mxu0 %v2929_v50  ;;  %1447 = vmatpush1.bf16.msra.mxu1 %v2932_v51 }
 0x268   : > { %1407 = vmatprep.subr.bf16.mxu0 %v2937_v54  ;;  %1448 = vmatprep.subr.bf16.mxu1 %v2942_v55 }
 0x26b   : > { %1408 = vmatpush1.bf16.msra.mxu0 %v2947_v57  ;;  %1449 = vmatpush1.bf16.msra.mxu1 %v2950_v58 }
 0x26c   : > { %1409 = vmatprep.subr.bf16.mxu0 %v2955_v59  ;;  %1450 = vmatprep.subr.bf16.mxu1 %v2960_v60 }
 0x26f   : > { %1410 = vmatpush1.bf16.msra.mxu0 %v2963_v61  ;;  %1451 = vmatpush1.bf16.msra.mxu1 %v2966_v62 }
 0x270   : > { %1411 = vmatprep.subr.bf16.mxu0 %v2973_v1  ;;  %1452 = vmatprep.subr.bf16.mxu1 %v2976_v2 }
 0x273   : > { %1412 = vmatpush1.bf16.msra.mxu0 %v2983_v4  ;;  %1453 = vmatpush1.bf16.msra.mxu1 %v2986_v5 }
 0x274   : > { %1413 = vmatprep.subr.bf16.mxu0 %v2991_v6  ;;  %1454 = vmatprep.subr.bf16.mxu1 %v2994_v7 }
 0x277   : > { %1414 = vmatpush1.bf16.msra.mxu0 %v2997_v8  ;;  %1455 = vmatpush1.bf16.msra.mxu1 %v3002_v9 }
 0x278   : > { %1415 = vmatprep.subr.bf16.mxu0 %v3007_v13  ;;  %1456 = vmatprep.subr.bf16.mxu1 %v3010_v14 }
 0x27b   : > { %1416 = vmatpush1.bf16.msra.mxu0 %v3017_v16  ;;  %1457 = vmatpush1.bf16.msra.mxu1 %v3020_v17 }
 0x27c   : > { %1417 = vmatprep.subr.bf16.mxu0 %v3025_v18  ;;  %1458 = vmatprep.subr.bf16.mxu1 %v3028_v19 }
 0x27f   : > { %1418 = vmatpush1.bf16.msra.mxu0 %v3033_v20  ;;  %1459 = vmatpush1.bf16.msra.mxu1 %v3036_v21 }
 0x280   : > { %1521 = vmatprep.subr.bf16.mxu0 %v2909_v43  ;;  %1562 = vmatprep.subr.bf16.mxu1 %v2912_v44 }
 0x335   : > { %v1319_v28 = vpop.f32.mrb[24].mxu0  ;;  %v1360_v31 = vpop.f32.mrb[24].mxu1 }
 0x336   : > { %v1367_v33 = vadd.f32 %v1319_v28, %v3100_v3  ;;  %v1369_v34 = vadd.f32 %v1360_v31, %v3103_v12  ;;  %v1321_v36 = vpop.f32.mrb[25].mxu0  ;;  %v1362_v10 = vpop.f32.mrb[25].mxu1 }
 0x337   : > { %v1368_v37 = vadd.f32 %v1321_v36, %v3105_v22  ;;  %v1370_v38 = vadd.f32 %v1362_v10, %v3108_v24  ;;  %v1323_v52 = vpop.f32.mrb[26].mxu0  ;;  %v1364_v26 = vpop.f32.mrb[26].mxu1  ;;  %v3585_v36 = vld [vmem:[#allocation5_spill] sm:$0xff] }
 0x338   : > { %v2358_v15 = vmul.f32 -1.442695, %v1367_v33  ;;  %v1324_v42 = vpop.f32.mrb[27].mxu0  ;;  %v1365_v11 = vpop.f32.mrb[27].mxu1  ;;  %v3584_v33 = vld [vmem:[#allocation4_spill] sm:$0xff]  ;;  %v3586_v52 = vld [vmem:[#allocation6_spill] sm:$0xff] }
 0x339   : > { %v2359_v41 = vmul.f32 -1.442695, %v1368_v37  ;;  %v2360_v45 = vmul.f32 -1.442695, %v1370_v38 }
 0x33a   : > { %2596 = vpow2.f32 %v2358_v15  ;;  %v3587_v15 = vld [vmem:[#allocation7_spill] sm:$0xff] }
 0x33b   : > { %2598 = vpow2.f32 %v2359_v41 }
 0x33c   : > { %2600 = vpow2.f32 %v2360_v45 }
 0x33d   : > { %2602 = vtanh.f32 %v1369_v34 }
 0x344   : > { %v2597_v53 = vpop.eup %2596 }
 0x345   : > { %v2599_v27 = vpop.eup %2598  ;;  %v1380_v3 = vadd.f32 1.0, %v2597_v53 }
 0x346   : > { %v1381_v12 = vadd.f32 1.0, %v2599_v27  ;;  %v2601_v22 = vpop.eup %2600 }
 0x347   : > { %2604 = vrcp.f32 %v1380_v3  ;;  %v2603_v56 = vpop.eup %2602  ;;  %v1382_v23 = vadd.f32 1.0, %v2601_v22 }
 0x348   : > { %2606 = vrcp.f32 %v1381_v12 }
 0x349   : > { %2608 = vrcp.f32 %v1382_v23 }
 0x351   : > { %v2605_v24 = vpop.eup %2604 }
 0x352   : > { %v2607_v63 = vpop.eup %2606  ;;  %v1391_v30 = vmul.f32 %v2605_v24, %v2603_v56 }
 0x353   : > { %v1390_v39 = vmul.f32 %v2607_v63, %v3207_v29  ;;  %v2609_v0 = vpop.eup %2608 }
 0x355   : > { %v3249_v40 = vadd.f32 %v1391_v30, %v1390_v39 }
 0x357   : > { %2610 = vtanh.f32 %v3249_v40 }
 0x361   : > { %v2611_v35 = vpop.eup %2610 }
 0x362   : > { %v1394_v32 = vmul.f32 %v2611_v35, %v2609_v0 }
 0x364   : > { %1396 = vst [vmem:[#allocation2 + $0x10] sm:$0xff] %v1394_v32  ;;  %v1402_v28 = vpack.c.bf16 %v1394_v32, %v1394_v32 }
 0x366   : > { %1436 = vmatmul.mubr.bf16.vlgmr.msra.gmra.mrb[28].mxu0 %v1402_v28  ;;  %1477 = vmatmul.mubr.bf16.vlgmr.msra.gmra.mrb[28].mxu1 %v1402_v28 }
 0x367   : > { %1522 = vmatpush1.bf16.msra.mxu0 %v2915_v46  ;;  %1563 = vmatpush1.bf16.msra.mxu1 %v2918_v47 }
 0x368   : > { %1523 = vmatprep.subr.bf16.mxu0 %v2923_v48  ;;  %1564 = vmatprep.subr.bf16.mxu1 %v2926_v49 }
 0x369   : > { %1553 = vmatprep.mubr.bf16.mxu0 %v3583_v25  ;;  %1594 = vmatprep.mubr.bf16.mxu1 %v3583_v25 }
 0x36b   : > { %1524 = vmatpush1.bf16.msra.mxu0 %v2929_v50  ;;  %1565 = vmatpush1.bf16.msra.mxu1 %v2932_v51 }
 0x36c   : > { %1525 = vmatprep.subr.bf16.mxu0 %v2937_v54  ;;  %1566 = vmatprep.subr.bf16.mxu1 %v2942_v55 }
 0x36f   : > { %1526 = vmatpush1.bf16.msra.mxu0 %v2947_v57  ;;  %1567 = vmatpush1.bf16.msra.mxu1 %v2950_v58 }
 0x370   : > { %1527 = vmatprep.subr.bf16.mxu0 %v2955_v59  ;;  %1568 = vmatprep.subr.bf16.mxu1 %v2960_v60 }
 0x373   : > { %1528 = vmatpush1.bf16.msra.mxu0 %v2963_v61  ;;  %1569 = vmatpush1.bf16.msra.mxu1 %v2966_v62 }
 0x374   : > { %1529 = vmatprep.subr.bf16.mxu0 %v2973_v1  ;;  %1570 = vmatprep.subr.bf16.mxu1 %v2976_v2 }
 0x377   : > { %1530 = vmatpush1.bf16.msra.mxu0 %v2983_v4  ;;  %1571 = vmatpush1.bf16.msra.mxu1 %v2986_v5 }
 0x378   : > { %1531 = vmatprep.subr.bf16.mxu0 %v2991_v6  ;;  %1572 = vmatprep.subr.bf16.mxu1 %v2994_v7 }
 0x37b   : > { %1532 = vmatpush1.bf16.msra.mxu0 %v2997_v8  ;;  %1573 = vmatpush1.bf16.msra.mxu1 %v3002_v9 }
 0x37c   : > { %1533 = vmatprep.subr.bf16.mxu0 %v3007_v13  ;;  %1574 = vmatprep.subr.bf16.mxu1 %v3010_v14 }
 0x37f   : > { %1534 = vmatpush1.bf16.msra.mxu0 %v3017_v16  ;;  %1575 = vmatpush1.bf16.msra.mxu1 %v3020_v17 }
 0x380   : > { %1535 = vmatprep.subr.bf16.mxu0 %v3025_v18  ;;  %1576 = vmatprep.subr.bf16.mxu1 %v3028_v19 }
 0x383   : > { %1536 = vmatpush1.bf16.msra.mxu0 %v3033_v20  ;;  %1577 = vmatpush1.bf16.msra.mxu1 %v3036_v21 }
 0x384   : > { %1639 = vmatprep.subr.bf16.mxu0 %v2909_v43  ;;  %1680 = vmatprep.subr.bf16.mxu1 %v2912_v44 }
 0x439   : > { %v1437_v29 = vpop.f32.mrb[28].mxu0  ;;  %v1478_v31 = vpop.f32.mrb[28].mxu1 }
 0x43a   : > { %v1485_v34 = vadd.f32 %v1437_v29, %v3584_v33  ;;  %v1487_v10 = vadd.f32 %v1478_v31, %v3585_v36  ;;  %v1439_v37 = vpop.f32.mrb[29].mxu0  ;;  %v1480_v38 = vpop.f32.mrb[29].mxu1 }
 0x43b   : > { %v1486_v26 = vadd.f32 %v1439_v37, %v3586_v52  ;;  %v1488_v42 = vadd.f32 %v1480_v38, %v3587_v15  ;;  %v1441_v11 = vpop.f32.mrb[30].mxu0  ;;  %v1482_v41 = vpop.f32.mrb[30].mxu1 }
 0x43c   : > { %v2361_v45 = vmul.f32 -1.442695, %v1485_v34  ;;  %v1442_v53 = vpop.f32.mrb[31].mxu0  ;;  %v1483_v27 = vpop.f32.mrb[31].mxu1 }
 0x43d   : > { %v2362_v43 = vmul.f32 -1.442695, %v1486_v26  ;;  %v2363_v44 = vmul.f32 -1.442695, %v1488_v42 }
 0x43e   : > { %2612 = vpow2.f32 %v2361_v45 }
 0x43f   : > { %2614 = vpow2.f32 %v2362_v43  ;;  %v3343_v43 = vld [vmem:[%s2842_s23] ss:$16 sps:$4 sm:$0xff]  }
 0x440   : > { %2616 = vpow2.f32 %v2363_v44  ;;  %v3347_v44 = vld [vmem:[%s2842_s23 + $0x8] ss:$16 sps:$4 sm:$0xff]  }
 0x441   : > { %2618 = vtanh.f32 %v1487_v10 }
 0x448   : > { %v2613_v3 = vpop.eup %2612 }
 0x449   : > { %v2615_v12 = vpop.eup %2614  ;;  %v1498_v22 = vadd.f32 1.0, %v2613_v3  ;;  %v3351_v3 = vld [vmem:[%s2842_s23 + $0x24] ss:$16 sps:$4 sm:$0xff]  }
 0x44a   : > { %v1499_v56 = vadd.f32 1.0, %v2615_v12  ;;  %v2617_v24 = vpop.eup %2616  ;;  %v3355_v12 = vld [vmem:[%s2842_s23 + $0x2c] ss:$16 sps:$4 sm:$0xff]  }
 0x44b   : > { %2620 = vrcp.f32 %v1498_v22  ;;  %v2619_v63 = vpop.eup %2618  ;;  %v1500_v0 = vadd.f32 1.0, %v2617_v24  ;;  %v3361_v22 = vld [vmem:[%s2842_s23 + $0x20] ss:$16 sps:$4 sm:$0xff]   ;;  %v3369_v24 = vld [vmem:[%s2842_s23 + $0x44] ss:$16 sps:$4 sm:$0xff]  }
 0x44c   : > { %2622 = vrcp.f32 %v1499_v56  ;;  %v3365_v56 = vld [vmem:[%s2842_s23 + $0x28] ss:$16 sps:$4 sm:$0xff]  }
 0x44d   : > { %2624 = vrcp.f32 %v1500_v0  ;;  %v3389_v0 = vld [vmem:[%s2842_s23 + $0x6c] ss:$16 sps:$4 sm:$0xff]  }
 0x455   : > { %v2621_v30 = vpop.eup %2620 }
 0x456   : > { %v2623_v23 = vpop.eup %2622  ;;  %v1509_v39 = vmul.f32 %v2621_v30, %v2619_v63  ;;  %v3373_v63 = vld [vmem:[%s2842_s23 + $0x4c] ss:$16 sps:$4 sm:$0xff]   ;;  %v3377_v30 = vld [vmem:[%s2842_s23 + $0x40] ss:$16 sps:$4 sm:$0xff]  }
 0x457   : > { %v1508_v35 = vmul.f32 %v2623_v23, %v3249_v40  ;;  %v2625_v28 = vpop.eup %2624  ;;  %v3381_v23 = vld [vmem:[%s2842_s23 + $0x48] ss:$16 sps:$4 sm:$0xff]  }
 0x459   : > { %v3291_v32 = vadd.f32 %v1509_v39, %v1508_v35  ;;  %v3385_v39 = vld [vmem:[%s2842_s23 + $0x64] ss:$16 sps:$4 sm:$0xff]   ;;  %v3393_v35 = vld [vmem:[%s2842_s23 + $0x60] ss:$16 sps:$4 sm:$0xff]  }
 0x45b   : > { %2626 = vtanh.f32 %v3291_v32 }
 0x465   : > { %v2627_v29 = vpop.eup %2626 }
 0x466   : > { %v1512_v31 = vmul.f32 %v2627_v29, %v2625_v28  ;;  %v3401_v28 = vld [vmem:[%s2842_s23 + $0x84] ss:$16 sps:$4 sm:$0xff]   ;;  %v3405_v29 = vld [vmem:[%s2842_s23 + $0x8c] ss:$16 sps:$4 sm:$0xff]  }
 0x468   : > { %1514 = vst [vmem:[#allocation2 + $0x18] sm:$0xff] %v1512_v31  ;;  %v1520_v33 = vpack.c.bf16 %v1512_v31, %v1512_v31  ;;  %v3409_v31 = vld [vmem:[%s2842_s23 + $0x80] ss:$16 sps:$4 sm:$0xff]  }
 0x46a   : > { %1554 = vmatmul.mubr.bf16.vlgmr.msra.gmra.mrb[32].mxu0 %v1520_v33  ;;  %1595 = vmatmul.mubr.bf16.vlgmr.msra.gmra.mrb[32].mxu1 %v1520_v33  ;;  %v3413_v33 = vld [vmem:[%s2842_s23 + $0x88] ss:$16 sps:$4 sm:$0xff]  }
 0x46b   : > { %1640 = vmatpush1.bf16.msra.mxu0 %v2915_v46  ;;  %1681 = vmatpush1.bf16.msra.mxu1 %v2918_v47  ;;  %v3327_v46 = vld [vmem:[%s2842_s23 + $0x4] ss:$16 sps:$4 sm:$0xff]   ;;  %v3331_v47 = vld [vmem:[%s2842_s23 + $0xc] ss:$16 sps:$4 sm:$0xff]  }
 0x46c   : > { %1641 = vmatprep.subr.bf16.mxu0 %v2923_v48  ;;  %1682 = vmatprep.subr.bf16.mxu1 %v2926_v49 }
 0x46d   : > { %1671 = vmatprep.mubr.bf16.mxu0 %v3583_v25  ;;  %1712 = vmatprep.mubr.bf16.mxu1 %v3583_v25 }
 0x46f   : > { %1642 = vmatpush1.bf16.msra.mxu0 %v2929_v50  ;;  %1683 = vmatpush1.bf16.msra.mxu1 %v2932_v51  ;;  %v3588_v50 = vld [vmem:[#allocation8_spill] sm:$0xff] }
 0x470   : > { %1643 = vmatprep.subr.bf16.mxu0 %v2937_v54  ;;  %1684 = vmatprep.subr.bf16.mxu1 %v2942_v55  ;;  %v3589_v54 = vld [vmem:[#allocation9_spill] sm:$0xff] }
 0x473   : > { %1644 = vmatpush1.bf16.msra.mxu0 %v2947_v57  ;;  %1685 = vmatpush1.bf16.msra.mxu1 %v2950_v58 }
 0x474   : > { %1645 = vmatprep.subr.bf16.mxu0 %v2955_v59  ;;  %1686 = vmatprep.subr.bf16.mxu1 %v2960_v60  ;;  %v3590_v59 = vld [vmem:[#allocation10_spill] sm:$0xff] }
 0x477   : > { %1646 = vmatpush1.bf16.msra.mxu0 %v2963_v61  ;;  %1687 = vmatpush1.bf16.msra.mxu1 %v2966_v62  ;;  %v3591_v61 = vld [vmem:[#allocation11_spill] sm:$0xff] }
 0x478   : > { %1647 = vmatprep.subr.bf16.mxu0 %v2973_v1  ;;  %1688 = vmatprep.subr.bf16.mxu1 %v2976_v2 }
 0x47b   : > { %1648 = vmatpush1.bf16.msra.mxu0 %v2983_v4  ;;  %1689 = vmatpush1.bf16.msra.mxu1 %v2986_v5 }
 0x47c   : > { %1649 = vmatprep.subr.bf16.mxu0 %v2991_v6  ;;  %1690 = vmatprep.subr.bf16.mxu1 %v2994_v7 }
 0x47f   : > { %1650 = vmatpush1.bf16.msra.mxu0 %v2997_v8  ;;  %1691 = vmatpush1.bf16.msra.mxu1 %v3002_v9 }
 0x480   : > { %1651 = vmatprep.subr.bf16.mxu0 %v3007_v13  ;;  %1692 = vmatprep.subr.bf16.mxu1 %v3010_v14 }
 0x483   : > { %1652 = vmatpush1.bf16.msra.mxu0 %v3017_v16  ;;  %1693 = vmatpush1.bf16.msra.mxu1 %v3020_v17 }
 0x484   : > { %1653 = vmatprep.subr.bf16.mxu0 %v3025_v18  ;;  %1694 = vmatprep.subr.bf16.mxu1 %v3028_v19 }
 0x487   : > { %1654 = vmatpush1.bf16.msra.mxu0 %v3033_v20  ;;  %1695 = vmatpush1.bf16.msra.mxu1 %v3036_v21 }
 0x488   : > { %1757 = vmatprep.subr.bf16.mxu0 %v3327_v46  ;;  %1798 = vmatprep.subr.bf16.mxu1 %v3331_v47 }
 0x53d   : > { %v1555_v48 = vpop.f32.mrb[32].mxu0  ;;  %v1596_v49 = vpop.f32.mrb[32].mxu1 }
 0x53e   : > { %v1603_v51 = vadd.f32 %v1555_v48, %v3588_v50  ;;  %v1605_v55 = vadd.f32 %v1596_v49, %v3589_v54  ;;  %v1557_v57 = vpop.f32.mrb[33].mxu0  ;;  %v1598_v58 = vpop.f32.mrb[33].mxu1  ;;  %v3417_v48 = vld [vmem:[%s2842_s23 + $0xa4] ss:$16 sps:$4 sm:$0xff]   ;;  %v3421_v49 = vld [vmem:[%s2842_s23 + $0xac] ss:$16 sps:$4 sm:$0xff]  }
 0x53f   : > { %v1604_v60 = vadd.f32 %v1557_v57, %v3590_v59  ;;  %v1606_v62 = vadd.f32 %v1598_v58, %v3591_v61  ;;  %v1559_v1 = vpop.f32.mrb[34].mxu0  ;;  %v1600_v2 = vpop.f32.mrb[34].mxu1  ;;  %v3425_v50 = vld [vmem:[%s2842_s23 + $0xa0] ss:$16 sps:$4 sm:$0xff]   ;;  %v3593_v57 = vld [vmem:[#allocation13_spill] sm:$0xff] }
 0x540   : > { %v2364_v4 = vmul.f32 -1.442695, %v1603_v51  ;;  %v1560_v5 = vpop.f32.mrb[35].mxu0  ;;  %v1601_v6 = vpop.f32.mrb[35].mxu1  ;;  %v3429_v51 = vld [vmem:[%s2842_s23 + $0xa8] ss:$16 sps:$4 sm:$0xff]  }
 0x541   : > { %v2365_v7 = vmul.f32 -1.442695, %v1604_v60  ;;  %v2366_v8 = vmul.f32 -1.442695, %v1606_v62  ;;  %v3594_v59 = vld [vmem:[#allocation14_spill] sm:$0xff]  ;;  %v3595_v60 = vld [vmem:[#allocation15_spill] sm:$0xff] }
 0x542   : > { %2628 = vpow2.f32 %v2364_v4 }
 0x543   : > { %2630 = vpow2.f32 %v2365_v7 }
 0x544   : > { %2632 = vpow2.f32 %v2366_v8 }
 0x545   : > { %2634 = vtanh.f32 %v1605_v55  ;;  %v3592_v55 = vld [vmem:[#allocation12_spill] sm:$0xff] }
 0x54c   : > { %v2629_v9 = vpop.eup %2628 }
 0x54d   : > { %v2631_v40 = vpop.eup %2630  ;;  %v1616_v34 = vadd.f32 1.0, %v2629_v9 }
 0x54e   : > { %v1617_v36 = vadd.f32 1.0, %v2631_v40  ;;  %v2633_v10 = vpop.eup %2632 }
 0x54f   : > { %2636 = vrcp.f32 %v1616_v34  ;;  %v2635_v37 = vpop.eup %2634  ;;  %v1618_v15 = vadd.f32 1.0, %v2633_v10 }
 0x550   : > { %2638 = vrcp.f32 %v1617_v36 }
 0x551   : > { %2640 = vrcp.f32 %v1618_v15 }
 0x559   : > { %v2637_v38 = vpop.eup %2636 }
 0x55a   : > { %v2639_v52 = vpop.eup %2638  ;;  %v1627_v26 = vmul.f32 %v2637_v38, %v2635_v37 }
 0x55b   : > { %v1626_v42 = vmul.f32 %v2639_v52, %v3291_v32  ;;  %v2641_v41 = vpop.eup %2640  ;;  %v3397_v32 = vld [vmem:[%s2842_s23 + $0x68] ss:$16 sps:$4 sm:$0xff]  }
 0x55d   : > { %v3339_v11 = vadd.f32 %v1627_v26, %v1626_v42  ;;  %v2717_v42 = vld [vmem:[%s2842_s23 + $0xcc] ss:$16 sps:$4 sm:$0xff]  }
 0x55f   : > { %2642 = vtanh.f32 %v3339_v11 }
 0x569   : > { %v2643_v45 = vpop.eup %2642 }
 0x56a   : > { %v1630_v53 = vmul.f32 %v2643_v45, %v2641_v41  ;;  %v2719_v41 = vld [vmem:[%s2842_s23 + $0xc8] ss:$16 sps:$4 sm:$0xff]   ;;  %v2720_v45 = vld [vmem:[%s2842_s23 + $0xe4] ss:$16 sps:$4 sm:$0xff]  }
 0x56c   : > { %1632 = vst [vmem:[#allocation2 + $0x20] sm:$0xff] %v1630_v53  ;;  %v1638_v27 = vpack.c.bf16 %v1630_v53, %v1630_v53  ;;  %v2721_v53 = vld [vmem:[%s2842_s23 + $0xec] ss:$16 sps:$4 sm:$0xff]  }
 0x56e   : > { %1672 = vmatmul.mubr.bf16.vlgmr.msra.gmra.mrb[36].mxu0 %v1638_v27  ;;  %1713 = vmatmul.mubr.bf16.vlgmr.msra.gmra.mrb[36].mxu1 %v1638_v27  ;;  %v2722_v27 = vld [vmem:[%s2842_s23 + $0xe0] ss:$16 sps:$4 sm:$0xff]  }
 0x56f   : > { %1758 = vmatpush1.bf16.msra.mxu0 %v3343_v43  ;;  %1799 = vmatpush1.bf16.msra.mxu1 %v3347_v44 }
 0x570   : > { %1759 = vmatprep.subr.bf16.mxu0 %v3351_v3  ;;  %1800 = vmatprep.subr.bf16.mxu1 %v3355_v12 }
 0x571   : > { %1789 = vmatprep.mubr.bf16.mxu0 %v3583_v25  ;;  %1830 = vmatprep.mubr.bf16.mxu1 %v3583_v25 }
 0x573   : > { %1760 = vmatpush1.bf16.msra.mxu0 %v3361_v22  ;;  %1801 = vmatpush1.bf16.msra.mxu1 %v3365_v56 }
 0x574   : > { %1761 = vmatprep.subr.bf16.mxu0 %v3369_v24  ;;  %1802 = vmatprep.subr.bf16.mxu1 %v3373_v63 }
 0x577   : > { %1762 = vmatpush1.bf16.msra.mxu0 %v3377_v30  ;;  %1803 = vmatpush1.bf16.msra.mxu1 %v3381_v23 }
 0x578   : > { %1763 = vmatprep.subr.bf16.mxu0 %v3385_v39  ;;  %1804 = vmatprep.subr.bf16.mxu1 %v3389_v0 }
 0x57b   : > { %1764 = vmatpush1.bf16.msra.mxu0 %v3393_v35  ;;  %1805 = vmatpush1.bf16.msra.mxu1 %v3397_v32 }
 0x57c   : > { %1765 = vmatprep.subr.bf16.mxu0 %v3401_v28  ;;  %1806 = vmatprep.subr.bf16.mxu1 %v3405_v29 }
 0x57f   : > { %1766 = vmatpush1.bf16.msra.mxu0 %v3409_v31  ;;  %1807 = vmatpush1.bf16.msra.mxu1 %v3413_v33 }
 0x580   : > { %1767 = vmatprep.subr.bf16.mxu0 %v3417_v48  ;;  %1808 = vmatprep.subr.bf16.mxu1 %v3421_v49 }
 0x583   : > { %1768 = vmatpush1.bf16.msra.mxu0 %v3425_v50  ;;  %1809 = vmatpush1.bf16.msra.mxu1 %v3429_v51 }
 0x584   : > { %1769 = vmatprep.subr.bf16.mxu0 %v3007_v13  ;;  %1810 = vmatprep.subr.bf16.mxu1 %v3010_v14 }
 0x587   : > { %1770 = vmatpush1.bf16.msra.mxu0 %v3017_v16  ;;  %1811 = vmatpush1.bf16.msra.mxu1 %v3020_v17 }
 0x588   : > { %1771 = vmatprep.subr.bf16.mxu0 %v3025_v18  ;;  %1812 = vmatprep.subr.bf16.mxu1 %v3028_v19 }
 0x58b   : > { %1772 = vmatpush1.bf16.msra.mxu0 %v3033_v20  ;;  %1813 = vmatpush1.bf16.msra.mxu1 %v3036_v21 }
 0x58c   : > { %1875 = vmatprep.subr.bf16.mxu0 %v3327_v46  ;;  %1916 = vmatprep.subr.bf16.mxu1 %v3331_v47 }
 0x641   : > { %v1673_v54 = vpop.f32.mrb[36].mxu0  ;;  %v1714_v13 = vpop.f32.mrb[36].mxu1 }
 0x642   : > { %v1721_v14 = vadd.f32 %v1673_v54, %v3592_v55  ;;  %v1723_v16 = vadd.f32 %v1714_v13, %v3593_v57  ;;  %v1675_v58 = vpop.f32.mrb[37].mxu0  ;;  %v1716_v17 = vpop.f32.mrb[37].mxu1 }
 0x643   : > { %v1722_v18 = vadd.f32 %v1675_v58, %v3594_v59  ;;  %v1724_v19 = vadd.f32 %v1716_v17, %v3595_v60  ;;  %v1677_v61 = vpop.f32.mrb[38].mxu0  ;;  %v1718_v20 = vpop.f32.mrb[38].mxu1 }
 0x644   : > { %v2367_v62 = vmul.f32 -1.442695, %v1721_v14  ;;  %v1678_v21 = vpop.f32.mrb[39].mxu0  ;;  %v1719_v1 = vpop.f32.mrb[39].mxu1 }
 0x645   : > { %v2368_v46 = vmul.f32 -1.442695, %v1722_v18  ;;  %v2369_v47 = vmul.f32 -1.442695, %v1724_v19  ;;  %v3600_v1 = vld [vmem:[#allocation20_spill] sm:$0xff] }
 0x646   : > { %2644 = vpow2.f32 %v2367_v62 }
 0x647   : > { %2646 = vpow2.f32 %v2368_v46 }
 0x648   : > { %2648 = vpow2.f32 %v2369_v47  ;;  %v3601_v47 = vld [vmem:[#allocation21_spill] sm:$0xff] }
 0x649   : > { %2650 = vtanh.f32 %v1723_v16 }
 0x650   : > { %v2645_v2 = vpop.eup %2644 }
 0x651   : > { %v2647_v4 = vpop.eup %2646  ;;  %v1734_v5 = vadd.f32 1.0, %v2645_v2 }
 0x652   : > { %v1735_v6 = vadd.f32 1.0, %v2647_v4  ;;  %v2649_v7 = vpop.eup %2648 }
 0x653   : > { %2652 = vrcp.f32 %v1734_v5  ;;  %v2651_v8 = vpop.eup %2650  ;;  %v1736_v36 = vadd.f32 1.0, %v2649_v7 }
 0x654   : > { %2654 = vrcp.f32 %v1735_v6  ;;  %v3602_v6 = vld [vmem:[#allocation22_spill] sm:$0xff] }
 0x655   : > { %2656 = vrcp.f32 %v1736_v36 }
 0x65d   : > { %v2653_v9 = vpop.eup %2652 }
 0x65e   : > { %v2655_v40 = vpop.eup %2654  ;;  %v1745_v34 = vmul.f32 %v2653_v9, %v2651_v8  ;;  %v3603_v8 = vld [vmem:[#allocation23_spill] sm:$0xff] }
 0x65f   : > { %v1744_v10 = vmul.f32 %v2655_v40, %v3339_v11  ;;  %v2657_v38 = vpop.eup %2656  ;;  %v2718_v11 = vld [vmem:[%s2842_s23 + $0xc0] ss:$16 sps:$4 sm:$0xff]  }
 0x661   : > { %v3447_v37 = vadd.f32 %v1745_v34, %v1744_v10 }
 0x663   : > { %2658 = vtanh.f32 %v3447_v37 }
 0x66d   : > { %v2659_v52 = vpop.eup %2658 }
 0x66e   : > { %v1748_v26 = vmul.f32 %v2659_v52, %v2657_v38 }
 0x670   : > { %1750 = vst [vmem:[#allocation2 + $0x28] sm:$0xff] %v1748_v26  ;;  %v1756_v15 = vpack.c.bf16 %v1748_v26, %v1748_v26 }
 0x672   : > { %1790 = vmatmul.mubr.bf16.vlgmr.msra.gmra.mrb[40].mxu0 %v1756_v15  ;;  %1831 = vmatmul.mubr.bf16.vlgmr.msra.gmra.mrb[40].mxu1 %v1756_v15 }
 0x673   : > { %1876 = vmatpush1.bf16.msra.mxu0 %v3343_v43  ;;  %1917 = vmatpush1.bf16.msra.mxu1 %v3347_v44  ;;  %v2723_v43 = vld [vmem:[%s2842_s23 + $0xe8] ss:$16 sps:$4 sm:$0xff]  }
 0x674   : > { %1877 = vmatprep.subr.bf16.mxu0 %v3351_v3  ;;  %1918 = vmatprep.subr.bf16.mxu1 %v3355_v12  ;;  %v3596_v12 = vld [vmem:[#allocation16_spill] sm:$0xff] }
 0x675   : > { %1907 = vmatprep.mubr.bf16.mxu0 %v3583_v25  ;;  %1948 = vmatprep.mubr.bf16.mxu1 %v3583_v25  ;;  %v2716_v25 = vld [vmem:[%s2842_s23 + $0xc4] ss:$16 sps:$4 sm:$0xff]  }
 0x677   : > { %1878 = vmatpush1.bf16.msra.mxu0 %v3361_v22  ;;  %1919 = vmatpush1.bf16.msra.mxu1 %v3365_v56  ;;  %v3597_v56 = vld [vmem:[#allocation17_spill] sm:$0xff] }
 0x678   : > { %1879 = vmatprep.subr.bf16.mxu0 %v3369_v24  ;;  %1920 = vmatprep.subr.bf16.mxu1 %v3373_v63 }
 0x67b   : > { %1880 = vmatpush1.bf16.msra.mxu0 %v3377_v30  ;;  %1921 = vmatpush1.bf16.msra.mxu1 %v3381_v23  ;;  %v3598_v23 = vld [vmem:[#allocation18_spill] sm:$0xff] }
 0x67c   : > { %1881 = vmatprep.subr.bf16.mxu0 %v3385_v39  ;;  %1922 = vmatprep.subr.bf16.mxu1 %v3389_v0  ;;  %v3599_v0 = vld [vmem:[#allocation19_spill] sm:$0xff] }
 0x67f   : > { %1882 = vmatpush1.bf16.msra.mxu0 %v3393_v35  ;;  %1923 = vmatpush1.bf16.msra.mxu1 %v3397_v32 }
 0x680   : > { %1883 = vmatprep.subr.bf16.mxu0 %v3401_v28  ;;  %1924 = vmatprep.subr.bf16.mxu1 %v3405_v29 }
 0x683   : > { %1884 = vmatpush1.bf16.msra.mxu0 %v3409_v31  ;;  %1925 = vmatpush1.bf16.msra.mxu1 %v3413_v33 }
 0x684   : > { %1885 = vmatprep.subr.bf16.mxu0 %v3417_v48  ;;  %1926 = vmatprep.subr.bf16.mxu1 %v3421_v49 }
 0x687   : > { %1886 = vmatpush1.bf16.msra.mxu0 %v3425_v50  ;;  %1927 = vmatpush1.bf16.msra.mxu1 %v3429_v51 }
 0x688   : > { %1887 = vmatprep.subr.bf16.mxu0 %v2716_v25  ;;  %1928 = vmatprep.subr.bf16.mxu1 %v2717_v42 }
 0x68b   : > { %1888 = vmatpush1.bf16.msra.mxu0 %v2718_v11  ;;  %1929 = vmatpush1.bf16.msra.mxu1 %v2719_v41 }
 0x68c   : > { %1889 = vmatprep.subr.bf16.mxu0 %v2720_v45  ;;  %1930 = vmatprep.subr.bf16.mxu1 %v2721_v53 }
 0x68f   : > { %1890 = vmatpush1.bf16.msra.mxu0 %v2722_v27  ;;  %1931 = vmatpush1.bf16.msra.mxu1 %v2723_v43 }
 0x745   : > { %v1791_v44 = vpop.f32.mrb[40].mxu0  ;;  %v1832_v3 = vpop.f32.mrb[40].mxu1 }
 0x746   : > { %v1839_v22 = vadd.f32 %v1791_v44, %v3596_v12  ;;  %v1841_v24 = vadd.f32 %v1832_v3, %v3597_v56  ;;  %v1793_v63 = vpop.f32.mrb[41].mxu0  ;;  %v1834_v30 = vpop.f32.mrb[41].mxu1 }
 0x747   : > { %v1840_v39 = vadd.f32 %v1793_v63, %v3598_v23  ;;  %v1842_v35 = vadd.f32 %v1834_v30, %v3599_v0  ;;  %v1795_v32 = vpop.f32.mrb[42].mxu0  ;;  %v1836_v28 = vpop.f32.mrb[42].mxu1  ;;  %v2725_v63 = vld [vmem:[%s3558_s6 + $0x8] sm:$0xff] (!%p2376_p6)   ;;  %v2726_v30 = vld [vmem:[%s3558_s6 + $0x10] sm:$0xff] (!%p2376_p6)   ;;  %v2727_v23 = vld [vmem:[%s3558_s6 + $0x18] sm:$0xff] (!%p2376_p6)  }
 0x748   : > { %v2370_v29 = vmul.f32 -1.442695, %v1839_v22  ;;  %v1796_v31 = vpop.f32.mrb[43].mxu0  ;;  %v1837_v33 = vpop.f32.mrb[43].mxu1  ;;  %v1992_v0 = vld [vmem:[#allocation2 + $0x8] sm:$0xff] (!%p2376_p6) }
 0x749   : > { %v2371_v48 = vmul.f32 -1.442695, %v1840_v39  ;;  %v2372_v49 = vmul.f32 -1.442695, %v1842_v35  ;;  %v1991_v39 = vld [vmem:[#allocation2] sm:$0xff] (!%p2376_p6)  ;;  %v1996_v28 = vld [vmem:[#allocation2 + $0x28] sm:$0xff] (!%p2376_p6) }
 0x74a   : > { %2660 = vpow2.f32 %v2370_v29  ;;  %v1995_v35 = vld [vmem:[#allocation2 + $0x20] sm:$0xff] (!%p2376_p6)  ;;  %v1999_v32 = vpack.c.bf16 (!%p2376_p6), %v1992_v0, %v1991_v39  ;;  %v2729_v33 = vld [vmem:[%s3558_s6 + $0x28] sm:$0xff] (!%p2376_p6)  }
 0x74b   : > { %2662 = vpow2.f32 %v2371_v48  ;;  %v2001_v29 = vpack.c.bf16 (!%p2376_p6), %v1996_v28, %v1995_v35  ;;  %v2728_v31 = vld [vmem:[%s3558_s6 + $0x20] sm:$0xff] (!%p2376_p6)   ;;  %v2730_v48 = vld [vmem:[%s3558_s6 + $0x30] sm:$0xff] (!%p2376_p6)  }
 0x74c   : > { %2664 = vpow2.f32 %v2372_v49  ;;  %v2731_v49 = vld [vmem:[%s3558_s6 + $0x38] sm:$0xff] (!%p2376_p6)  }
 0x74d   : > { %2666 = vtanh.f32 %v1841_v24  ;;  %v2724_v24 = vld [vmem:[%s3558_s6] sm:$0xff] (!%p2376_p6)  }
 0x74e   : > { %2403 = vmatprep.subr.bf16.mxu0 (!%p2376_p6), %v2724_v24  ;;  %2427 = vmatprep.subr.bf16.mxu1 (!%p2376_p6), %v2724_v24 }
 0x754   : > { %v2661_v50 = vpop.eup %2660 }
 0x755   : > { %v2663_v51 = vpop.eup %2662  ;;  %v1852_v54 = vadd.f32 1.0, %v2661_v50  ;;  %v1993_v50 = vld [vmem:[#allocation2 + $0x10] sm:$0xff] (!%p2376_p6) }
 0x756   : > { %v1853_v13 = vadd.f32 1.0, %v2663_v51  ;;  %v2665_v55 = vpop.eup %2664  ;;  %v1994_v51 = vld [vmem:[#allocation2 + $0x18] sm:$0xff] (!%p2376_p6) }
 0x757   : > { %2668 = vrcp.f32 %v1852_v54  ;;  %v2667_v14 = vpop.eup %2666  ;;  %v1854_v17 = vadd.f32 1.0, %v2665_v55  ;;  %v2000_v55 = vpack.c.bf16 (!%p2376_p6), %v1994_v51, %v1993_v50 }
 0x758   : > { %2670 = vrcp.f32 %v1853_v13 }
 0x759   : > { %2672 = vrcp.f32 %v1854_v17 }
 0x761   : > { %v2669_v57 = vpop.eup %2668 }
 0x762   : > { %v2671_v16 = vpop.eup %2670  ;;  %v1863_v58 = vmul.f32 %v2669_v57, %v2667_v14  ;;  %v2377_v57 = vld [vmem:[%s3559_s7] ss:$0 sm:$0xff] (!%p2376_p6) }
 0x763   : > { %v1862_v59 = vmul.f32 %v2671_v16, %v3447_v37  ;;  %v2673_v60 = vpop.eup %2672 }
 0x765   : > { %v1864_v18 = vadd.f32 %v1863_v58, %v1862_v59 }
 0x767   : > { %2674 = vtanh.f32 %v1864_v18 }
 0x771   : > { %v2675_v19 = vpop.eup %2674 }
 0x772   : > { %v1866_v61 = vmul.f32 %v2675_v19, %v2673_v60 }
 0x774   : > { %1868 = vst [vmem:[#allocation2 + $0x30] sm:$0xff] %v1866_v61  ;;  %v1874_v20 = vpack.c.bf16 %v1866_v61, %v1866_v61 }
 0x776   : > { %1908 = vmatmul.mubr.bf16.vlgmr.msra.gmra.mrb[44].mxu0 %v1874_v20  ;;  %1949 = vmatmul.mubr.bf16.vlgmr.msra.gmra.mrb[44].mxu1 %v1874_v20 }
 0x777   : > { %2404 = vmatpush3.bf16.msra.mxu0 (!%p2376_p6), %v2724_v24  ;;  %2435 = vmatpush3.bf16.msra.mxu1 (!%p2376_p6), %v2724_v24 }
 0x778   : > { %2405 = vmatprep.subr.bf16.mxu0 (!%p2376_p6), %v2725_v63  ;;  %2428 = vmatprep.subr.bf16.mxu1 (!%p2376_p6), %v2725_v63 }
 0x779   : > { %2419 = vmatprep.mubr.bf16.mxu0 (!%p2376_p6), %v1999_v32  ;;  %2423 = vmatprep.mubr.bf16.mxu1 (!%p2376_p6), %v2001_v29 }
 0x77b   : > { %2406 = vmatpush3.bf16.msra.mxu0 (!%p2376_p6), %v2725_v63  ;;  %2436 = vmatpush3.bf16.msra.mxu1 (!%p2376_p6), %v2725_v63  ;;  %v1997_v54 = vld [vmem:[#allocation2 + $0x30] sm:$0xff] (!%p2376_p6) }
 0x77c   : > { %2407 = vmatprep.subr.bf16.mxu0 (!%p2376_p6), %v2726_v30  ;;  %2429 = vmatprep.subr.bf16.mxu1 (!%p2376_p6), %v2726_v30 }
 0x77f   : > { %2408 = vmatpush3.bf16.msra.mxu0 (!%p2376_p6), %v2726_v30  ;;  %2437 = vmatpush3.bf16.msra.mxu1 (!%p2376_p6), %v2726_v30 }
 0x780   : > { %2409 = vmatprep.subr.bf16.mxu0 (!%p2376_p6), %v2727_v23  ;;  %2430 = vmatprep.subr.bf16.mxu1 (!%p2376_p6), %v2727_v23 }
 0x783   : > { %2410 = vmatpush3.bf16.msra.mxu0 (!%p2376_p6), %v2727_v23  ;;  %2438 = vmatpush3.bf16.msra.mxu1 (!%p2376_p6), %v2727_v23 }
 0x784   : > { %2411 = vmatprep.subr.bf16.mxu0 (!%p2376_p6), %v2728_v31  ;;  %2431 = vmatprep.subr.bf16.mxu1 (!%p2376_p6), %v2728_v31 }
 0x787   : > { %2412 = vmatpush3.bf16.msra.mxu0 (!%p2376_p6), %v2728_v31  ;;  %2439 = vmatpush3.bf16.msra.mxu1 (!%p2376_p6), %v2728_v31 }
 0x788   : > { %2413 = vmatprep.subr.bf16.mxu0 (!%p2376_p6), %v2729_v33  ;;  %2432 = vmatprep.subr.bf16.mxu1 (!%p2376_p6), %v2729_v33 }
 0x78b   : > { %2414 = vmatpush3.bf16.msra.mxu0 (!%p2376_p6), %v2729_v33  ;;  %2440 = vmatpush3.bf16.msra.mxu1 (!%p2376_p6), %v2729_v33 }
 0x78c   : > { %2415 = vmatprep.subr.bf16.mxu0 (!%p2376_p6), %v2730_v48  ;;  %2433 = vmatprep.subr.bf16.mxu1 (!%p2376_p6), %v2730_v48 }
 0x78f   : > { %2416 = vmatpush3.bf16.msra.mxu0 (!%p2376_p6), %v2730_v48  ;;  %2441 = vmatpush3.bf16.msra.mxu1 (!%p2376_p6), %v2730_v48 }
 0x790   : > { %2417 = vmatprep.subr.bf16.mxu0 (!%p2376_p6), %v2731_v49  ;;  %2434 = vmatprep.subr.bf16.mxu1 (!%p2376_p6), %v2731_v49 }
 0x793   : > { %2418 = vmatpush3.bf16.msra.mxu0 (!%p2376_p6), %v2731_v49  ;;  %2442 = vmatpush3.bf16.msra.mxu1 (!%p2376_p6), %v2731_v49 }
 0x796   : > { %2420 = vmatmul.mubr.bf16.vlgmr.msra.gmra.mrb[0].mxu0 (!%p2376_p6), %v2000_v55 }
 0x849   : > { %v1909_v62 = vpop.f32.mrb[44].mxu0  ;;  %v1950_v21 = vpop.f32.mrb[44].mxu1 }
 0x84a   : > { %v1957_v46 = vadd.f32 %v1909_v62, %v3600_v1  ;;  %v1959_v2 = vadd.f32 %v1950_v21, %v3601_v47  ;;  %v1911_v4 = vpop.f32.mrb[45].mxu0  ;;  %v1952_v5 = vpop.f32.mrb[45].mxu1 }
 0x84b   : > { %v1958_v7 = vadd.f32 %v1911_v4, %v3602_v6  ;;  %v1960_v9 = vadd.f32 %v1952_v5, %v3603_v8  ;;  %v1913_v40 = vpop.f32.mrb[46].mxu0  ;;  %v1954_v34 = vpop.f32.mrb[46].mxu1 }
 0x84c   : > { %v2373_v36 = vmul.f32 -1.442695, %v1957_v46  ;;  %v1914_v10 = vpop.f32.mrb[47].mxu0  ;;  %v1955_v37 = vpop.f32.mrb[47].mxu1 }
 0x84d   : > { %v2374_v38 = vmul.f32 -1.442695, %v1958_v7  ;;  %v2375_v52 = vmul.f32 -1.442695, %v1960_v9 }
 0x84e   : > { %2676 = vpow2.f32 %v2373_v36 }
 0x84f   : > { %2678 = vpow2.f32 %v2374_v38 }
 0x850   : > { %2680 = vpow2.f32 %v2375_v52 }
 0x851   : > { %2682 = vtanh.f32 %v1959_v2 }
 0x858   : > { %v2677_v26 = vpop.eup %2676 }
 0x859   : > { %v2679_v15 = vpop.eup %2678  ;;  %v1970_v25 = vadd.f32 1.0, %v2677_v26 }
 0x85a   : > { %v1971_v42 = vadd.f32 1.0, %v2679_v15  ;;  %v2681_v11 = vpop.eup %2680 }
 0x85b   : > { %2684 = vrcp.f32 %v1970_v25  ;;  %v2683_v41 = vpop.eup %2682  ;;  %v1972_v43 = vadd.f32 1.0, %v2681_v11 }
 0x85c   : > { %2686 = vrcp.f32 %v1971_v42 }
 0x85d   : > { %2688 = vrcp.f32 %v1972_v43 }
 0x865   : > { %v2685_v45 = vpop.eup %2684 }
 0x866   : > { %v2687_v53 = vpop.eup %2686  ;;  %v1981_v27 = vmul.f32 %v2685_v45, %v2683_v41 }
 0x867   : > { %v1980_v44 = vmul.f32 %v2687_v53, %v1864_v18  ;;  %v2689_v12 = vpop.eup %2688 }
 0x869   : > { %v1982_v3 = vadd.f32 %v1981_v27, %v1980_v44  ;;  %v2421_v16 = vpop.f32.mrb[0].mxu0 (!%p2376_p6) }
 0x86a   : > { %v2117_v17 = vadd.f32 (!%p2376_p6), %v2421_v16, %v2377_v57  ;;  %v2108_v18 = vpop.f32.mrb[1].mxu0 (!%p2376_p6) }
 0x86b   : > { %2690 = vtanh.f32 %v1982_v3  ;;  %v2109_v19 = vadd.f32 (!%p2376_p6), %v2377_v57, %v2108_v18  ;;  %v2422_v20 = vpop.f32.mrb[2].mxu0 (!%p2376_p6) }
 0x86c   : > { %2141 = vst [vmem:[%s3560_s8 + $0x10] sm:$0xff] (!%p2376_p6), %v2117_v17  ;;  %v2120_v21 = vadd.f32 (!%p2376_p6), %v2422_v20, %v2377_v57  ;;  %v2111_v46 = vpop.f32.mrb[3].mxu0 (!%p2376_p6) }
 0x86d   : > { %2139 = vst [vmem:[%s3560_s8] sm:$0xff] (!%p2376_p6), %v2109_v19  ;;  %v2112_v2 = vadd.f32 (!%p2376_p6), %v2377_v57, %v2111_v46 }
 0x86e   : > { %2142 = vst [vmem:[%s3560_s8 + $0x18] sm:$0xff] (!%p2376_p6), %v2120_v21 }
 0x86f   : > { %2140 = vst [vmem:[%s3560_s8 + $0x8] sm:$0xff] (!%p2376_p6), %v2112_v2 }
 0x872   : > { %1990 = sbr.rel (%p2376_p6) target bundleno = 2396 (0x95c), region = 60 }
 0x875   : > { %v2691_v22 = vpop.eup %2690 }
 0x876   : > { %v1984_v56 = vmul.f32 %v2691_v22, %v2689_v12 }
 0x878   : > { %1986 = vst [vmem:[#allocation2 + $0x38] sm:$0xff] %v1984_v56 }
 0x87f   : > { %v1998_v13 = vld [vmem:[#allocation2 + $0x38] sm:$0xff] }
 0x880   : > { %v2002_v14 = vpack.c.bf16 %v1998_v13, %v1997_v54 }
 0x882   : > { %2424 = vmatmul.mubr.bf16.vlgmr.msra.gmra.mrb[0].mxu1 %v2002_v14 }
 0x955   : > { %v2425_v58 = vpop.f32.mrb[0].mxu1 }
 0x956   : > { %v2133_v59 = vadd.f32 %v2425_v58, %v2377_v57  ;;  %v2124_v60 = vpop.f32.mrb[1].mxu1 }
 0x957   : > { %v2125_v61 = vadd.f32 %v2377_v57, %v2124_v60  ;;  %v2426_v62 = vpop.f32.mrb[2].mxu1 }
 0x958   : > { %2145 = vst [vmem:[%s3560_s8 + $0x30] sm:$0xff] %v2133_v59  ;;  %v2136_v1 = vadd.f32 %v2426_v62, %v2377_v57  ;;  %v2127_v47 = vpop.f32.mrb[3].mxu1 }
 0x959   : > { %2143 = vst [vmem:[%s3560_s8 + $0x20] sm:$0xff] %v2125_v61  ;;  %v2128_v4 = vadd.f32 %v2377_v57, %v2127_v47 }
 0x95a   : > { %2146 = vst [vmem:[%s3560_s8 + $0x38] sm:$0xff] %v2136_v1 }
 0x95b   : > { %2144 = vst [vmem:[%s3560_s8 + $0x28] sm:$0xff] %v2128_v4 }
 0x95c PF: > { %s18_s29 = sadd.s32 1, %s2754_s29   ;;  %s3604_s27 = smov %s2750_s28 }
 0x95d   : > { %p15_p7 = scmp.ge.s32.totalorder %s18_s29, 4   ;;  %s3605_s28 = smov %s3607_s30 }
 0x95f   :  { %17 = sbr.rel (!%p15_p7) target bundleno = 2 (0x2), region = 119 }

// kernel: seq2seq_forward.2
= control target key start
LH: loop header
LB: loop body
LE: loop exit
PB: predicated region body
PF: predicated region fallthrough
CT: control target
= control target key end

     0   :  { %11 = vsyncpa [#allocation5], 0  ;;  %s3859_s0 = inlined_call_operand.vmem [shape: f32[10,8,128], index: 0, kind: input, shape index: {}]   ;;  %s3860_s1 = inlined_call_operand.vmem [shape: bf16[2,128,512], index: 1, kind: input, shape index: {}]   ;;  %s3861_s2 = inlined_call_operand.hbm [shape: bf16[2,128,512], index: 2, kind: input, shape index: {}]   ;;  %s3862_s3 = inlined_call_operand.vmem [shape: f32[2,1,512], index: 3, kind: input, shape index: {}]   ;;  %s3863_s4 = inlined_call_operand.vmem [shape: f32[2,8,128], index: 4, kind: output, shape index: {0}]   ;;  %s3864_s5 = inlined_call_operand.vmem [shape: f32[2,8,128], index: 5, kind: output, shape index: {1}]  }
   0x1   :  { %13 = vsyncpa [#allocation5 + $0x1], 0  ;;  %s2906_s18 = smov 0   ;;  %s2908_s19 = smov 0  }
   0x2   :  { %s2910_s20 = smov 0   ;;  %s2912_s21 = smov 0  }
   0x3   :  { %s2914_s22 = smov 0   ;;  %s2916_s23 = smov 0  }
   0x4 LB: > { %s2330_s24 = sadd.s32 4294967295, %s2870_s23   ;;  %s28_s25 = sadd.s32 1, %s2866_s22  ;;  %s2870_s23 = sphi %s2916_s23, %s19_s23   ;;  %s2866_s22 = sphi %s2914_s22, %s3929_s22   ;;  %s2862_s21 = sphi %s2912_s21, %s3928_s21   ;;  %s2858_s20 = sphi %s2910_s20, %s3927_s20   ;;  %s2854_s19 = sphi %s2908_s19, %s3926_s19   ;;  %s2850_s18 = sphi %s2906_s18, %s3925_s18  }
   0x5   : > { %p29_p0 = scmp.ge.s32.totalorder %s28_s25, 2  ;;  %s90_s26 = sadd.s32 1, %s2858_s20 }
   0x6   : > { %p97_p1 = scmp.ne.s32.totalorder %s2858_s20, %s2854_s19  ;;  %p98_p2 = scmp.eq.s32.totalorder %s2870_s23, 0 }
   0x7   : > { %s3931_s25 = smov (%p29_p0, %s28_s25), 0  ;;  %p103_p4 = scmp.ne.s32.totalorder %s2854_s19, %s2850_s18 }
   0x8   : > { %p2942_p3 = por %p98_p2, %p97_p1  ;;  %s87_s28 = ssub.s32 %s2866_s22, %s3931_s25 }
   0x9   : > { %p104_p5 = scmp.eq.s32.totalorder %s2330_s24, 0  ;;  %p88_p6 = scmp.eq.s32.totalorder %s87_s28, 0 }
   0xa   : > { %p2450_p8 = scmp.lt.s32.totalorder %s2870_s23, 2  ;;  %s224_s6 = sand.u32 1, %s2858_s20  }
   0xb   : > { %p2949_p7 = por %p104_p5, %p103_p4  ;;  %s2442_s7 = sshll.u32 %s2866_s22, 12 }
   0xc   : > { %s2955_s30 = scalar_select %p88_p6, %s2858_s20, %s90_s26  }
   0xd   : > { %s2335_s8 = sshll.u32 %s224_s6, 8  ;;  %s2962_s11 = scalar_lea.hbm %s3861_s2, %s2442_s7 }
   0xe   : > { %s228_s12 = scalar_lea.vmem [#allocation4], %s2335_s8  ;;  %p2966_p9 = pnand %p2450_p8, %p2942_p3 }
   0xf   : > { %s235_s13 = sshll.u32 %s228_s12, 4  ;;  %s2972_s15 = scalar_lea.sflag [#allocation5], %s224_s6  ;;  %s2970_s13 = int_to_ptr.vmem [resolvable:$true] %s235_s13 }
  0x10   : > { %s2790_s16 = scalar_lea.hbm %s2962_s11, 4096  ;;  %p2792_p11 = pneg %p2966_p9 }
  0x11   : > { %p2791_p10 = scmp.ne.s32.totalorder %s2962_s11, %s2790_s16  ;;  %s2795_s24 = scalar_lea.hbm %s3861_s2, 8192 }
  0x12   : > { %p2796_p0 = scmp.lt.u32.totalorder %s2962_s11, %s3861_s2  ;;  %p2797_p1 = scmp.lt.u32.totalorder %s2795_s24, %s2790_s16 }
  0x13   : > { %p2793_p12 = pnand %p2792_p11, %p2791_p10  ;;  %p2799_p3 = scmp.lt.u32.totalorder %s2790_s16, %s2962_s11 }
  0x14   : > { %p2798_p2 = por %p2797_p1, %p2796_p0 }
  0x15   : > { %p2794_p13 = pneg %p2793_p12 }
  0x16   : > { %p2800_p4 = por %p2799_p3, %p2798_p2 }
  0x18   : > { %p2801_p5 = pnand %p2800_p4, %p2794_p13 }
  0x1a   : > { %2804 = shalt.err (!%p2801_p5)
}
  0x1b   : > { %s2805_s28 = scalar_lea.vmem %s2970_s13, 4096  ;;  %s2872_s6 = smov [#allocation4]  }
  0x1c   : > { %p2806_p6 = scmp.ne.s32.totalorder %s2970_s13, %s2805_s28  ;;  %s2810_s7 = sshll.u32 %s2872_s6, 4  ;;  %s2811_s7 = int_to_ptr.vmem [resolvable:$false] %s2810_s7 }
  0x1d   : > { %s2812_s8 = scalar_lea.vmem %s2811_s7, 8192  ;;  %p2813_p12 = scmp.lt.s32.totalorder %s2970_s13, %s2811_s7 }
  0x1e   : > { %p2808_p8 = pnand %p2806_p6, %p2792_p11  ;;  %p2814_p0 = scmp.lt.s32.totalorder %s2812_s8, %s2805_s28 }
  0x20   : > { %p2809_p10 = pneg %p2808_p8  ;;  %p2815_p1 = por %p2814_p0, %p2813_p12 }
  0x22   : > { %p2816_p2 = pnand %p2815_p1, %p2809_p10 }
  0x24   : > { %2819 = shalt.err (!%p2816_p2)
}
  0x25   : > { %s2873_s9 = smov 256   ;;  %s2874_s10 = smov 16  }
  0x26   : > { %2449 = dma.hbm_to_vmem [thread:$0]  (!%p2966_p9), %s2962_s11, 4096, %s2970_s13, %s2972_s15, %s2873_s9, %s2873_s9, %s2874_s10  }
  0x27   : > { %p2338_p11 = scmp.ge.s32.totalorder %s2870_s23, 1  ;;  %p250_p13 = scmp.lt.s32.totalorder %s2870_s23, 3 }
  0x29   : > { %p251_p3 = pnand %p2338_p11, %p250_p13 }
  0x2b   : > { %254 = sbr.rel (%p251_p3) target bundleno = 2737 (0xab1), region = 36 }
  0x32   : > { %s256_s12 = sand.u32 1, %s2854_s19  }
  0x33   : > { %s2339_s16 = sshll.u32 %s256_s12, 8  ;;  %s257_s17 = scalar_lea.sflag [#allocation5], %s256_s12 }
  0x34   : > { %s3003_s18 = scalar_lea.vmem [#allocation4], %s2339_s16 }
  0x35   : > { %2845 = dma.done.wait (%p2949_p7), %s257_s17, 4096  }
  0x36   : > { %2847 = vsyncadd (%p2949_p7), %s257_s17, 4294963200  ;;  %p313_p4 = scmp.lt.s32.totalorder %s2862_s21, 1  ;;  %p2345_p7 = scmp.ne.s32.totalorder %s2862_s21, 0 }
  0x37   : > { %v341_v0 = vld [vmem:[%s3859_s0] sm:$0xff] (!%p2345_p7)  ;;  %v342_v1 = vld [vmem:[%s3859_s0 + $0x8] sm:$0xff] (!%p2345_p7)  ;;  %v343_v2 = vld [vmem:[%s3859_s0 + $0x10] sm:$0xff] (!%p2345_p7) }
  0x38   : > { %s314_s11 = scalar_select %p313_p4, %s2862_s21, 1 }
  0x39   : > { %340 = sbr.rel (%p2345_p7) target bundleno = 64 (0x40), region = 44  ;;  %351 = vst [vmem:[#allocation2] sm:$0xff] (!%p2345_p7), %v341_v0  ;;  %352 = vst [vmem:[#allocation2 + $0x8] sm:$0xff] (!%p2345_p7), %v342_v1  ;;  %v344_v3 = vld [vmem:[%s3859_s0 + $0x18] sm:$0xff] (!%p2345_p7)  ;;  %v345_v4 = vld [vmem:[%s3859_s0 + $0x20] sm:$0xff] (!%p2345_p7) }
  0x3a   : > { %s2443_s13 = sshll.u32 %s314_s11, 8  ;;  %s2342_s14 = sshll.u32 %s314_s11, 2  ;;  %353 = vst [vmem:[#allocation2 + $0x10] sm:$0xff] (!%p2345_p7), %v343_v2  ;;  %v346_v5 = vld [vmem:[%s3859_s0 + $0x28] sm:$0xff] (!%p2345_p7)  ;;  %354 = vst [vmem:[#allocation2 + $0x18] sm:$0xff] (!%p2345_p7), %v344_v3  ;;  %v347_v6 = vld [vmem:[%s3859_s0 + $0x30] sm:$0xff] (!%p2345_p7) }
  0x3b   : > { %s3014_s26 = scalar_lea.vmem %s3860_s1, %s2443_s13  ;;  %s3019_s6 = scalar_lea.vmem %s3862_s3, %s2342_s14  ;;  %355 = vst [vmem:[#allocation2 + $0x20] sm:$0xff] (!%p2345_p7), %v345_v4  ;;  %356 = vst [vmem:[#allocation2 + $0x28] sm:$0xff] (!%p2345_p7), %v346_v5  ;;  %v348_v7 = vld [vmem:[%s3859_s0 + $0x38] sm:$0xff] (!%p2345_p7)  ;;  %v349_v8 = vld [vmem:[%s3859_s0 + $0x40] sm:$0xff] (!%p2345_p7) }
  0x3c   : > { %s2343_s7 = sshll.u32 %s314_s11, 3  ;;  %357 = vst [vmem:[#allocation2 + $0x30] sm:$0xff] (!%p2345_p7), %v347_v6  ;;  %358 = vst [vmem:[#allocation2 + $0x38] sm:$0xff] (!%p2345_p7), %v348_v7  ;;  %v350_v9 = vld [vmem:[%s3859_s0 + $0x48] sm:$0xff] (!%p2345_p7) }
  0x3d   : > { %s3024_s9 = scalar_lea.vmem %s3863_s4, %s2343_s7  ;;  %s3029_s16 = scalar_lea.vmem %s3864_s5, %s2343_s7  ;;  %359 = vst [vmem:[#allocation2 + $0x40] sm:$0xff] (!%p2345_p7), %v349_v8  ;;  %360 = vst [vmem:[#allocation2 + $0x48] sm:$0xff] (!%p2345_p7), %v350_v9 }
  0x40 PF: > { %v2502_v10 = vld [vmem:[%s3014_s26 + $0x4] ss:$16 sps:$4 sm:$0xff]   ;;  %v2504_v11 = vld [vmem:[%s3014_s26 + $0xc] ss:$16 sps:$4 sm:$0xff]   ;;  %v3865_v12 = vmov 0  }
  0x41   : > { %654 = vmatprep.mubr.bf16.mxu0 %v3865_v12  ;;  %737 = vmatprep.mubr.bf16.mxu1 %v3865_v12  ;;  %v2506_v13 = vld [vmem:[%s3014_s26] ss:$16 sps:$4 sm:$0xff]   ;;  %v2507_v14 = vld [vmem:[%s3014_s26 + $0x8] ss:$16 sps:$4 sm:$0xff]   ;;  %v2508_v15 = vld [vmem:[%s3014_s26 + $0x24] ss:$16 sps:$4 sm:$0xff]  }
  0x42   : > { %622 = vmatprep.subr.bf16.mxu0 %v2502_v10  ;;  %705 = vmatprep.subr.bf16.mxu1 %v2504_v11  ;;  %v2510_v16 = vld [vmem:[%s3014_s26 + $0x2c] ss:$16 sps:$4 sm:$0xff]   ;;  %v2512_v17 = vld [vmem:[%s3014_s26 + $0x20] ss:$16 sps:$4 sm:$0xff]   ;;  %v2513_v18 = vld [vmem:[%s3014_s26 + $0x28] ss:$16 sps:$4 sm:$0xff]  }
  0x43   : > { %623 = vmatpush1.bf16.msra.mxu0 %v2506_v13  ;;  %706 = vmatpush1.bf16.msra.mxu1 %v2507_v14  ;;  %v2514_v19 = vld [vmem:[%s3014_s26 + $0x44] ss:$16 sps:$4 sm:$0xff]   ;;  %v2516_v20 = vld [vmem:[%s3014_s26 + $0x4c] ss:$16 sps:$4 sm:$0xff]   ;;  %v2518_v21 = vld [vmem:[%s3014_s26 + $0x40] ss:$16 sps:$4 sm:$0xff]  }
  0x44   : > { %624 = vmatprep.subr.bf16.mxu0 %v2508_v15  ;;  %707 = vmatprep.subr.bf16.mxu1 %v2510_v16  ;;  %v2519_v22 = vld [vmem:[%s3014_s26 + $0x48] ss:$16 sps:$4 sm:$0xff]   ;;  %v2520_v23 = vld [vmem:[%s3014_s26 + $0x64] ss:$16 sps:$4 sm:$0xff]   ;;  %v2522_v24 = vld [vmem:[%s3014_s26 + $0x6c] ss:$16 sps:$4 sm:$0xff]  }
  0x45   : > { %v2524_v25 = vld [vmem:[%s3014_s26 + $0x60] ss:$16 sps:$4 sm:$0xff]   ;;  %v2525_v26 = vld [vmem:[%s3014_s26 + $0x68] ss:$16 sps:$4 sm:$0xff]   ;;  %v2526_v27 = vld [vmem:[%s3014_s26 + $0x84] ss:$16 sps:$4 sm:$0xff]  }
  0x46   : > { %v2528_v28 = vld [vmem:[%s3014_s26 + $0x8c] ss:$16 sps:$4 sm:$0xff]   ;;  %v2530_v29 = vld [vmem:[%s3014_s26 + $0x80] ss:$16 sps:$4 sm:$0xff]   ;;  %v2531_v30 = vld [vmem:[%s3014_s26 + $0x88] ss:$16 sps:$4 sm:$0xff]  }
  0x47   : > { %625 = vmatpush1.bf16.msra.mxu0 %v2512_v17  ;;  %708 = vmatpush1.bf16.msra.mxu1 %v2513_v18  ;;  %v2532_v31 = vld [vmem:[%s3014_s26 + $0xa4] ss:$16 sps:$4 sm:$0xff]   ;;  %v2534_v32 = vld [vmem:[%s3014_s26 + $0xac] ss:$16 sps:$4 sm:$0xff]   ;;  %v2536_v33 = vld [vmem:[%s3014_s26 + $0xa0] ss:$16 sps:$4 sm:$0xff]  }
  0x48   : > { %626 = vmatprep.subr.bf16.mxu0 %v2514_v19  ;;  %709 = vmatprep.subr.bf16.mxu1 %v2516_v20  ;;  %v2537_v34 = vld [vmem:[%s3014_s26 + $0xa8] ss:$16 sps:$4 sm:$0xff]   ;;  %v2538_v35 = vld [vmem:[%s3014_s26 + $0xc4] ss:$16 sps:$4 sm:$0xff]   ;;  %v2540_v36 = vld [vmem:[%s3014_s26 + $0xcc] ss:$16 sps:$4 sm:$0xff]  }
  0x49   : > { %v2542_v37 = vld [vmem:[%s3014_s26 + $0xc0] ss:$16 sps:$4 sm:$0xff]   ;;  %v2543_v38 = vld [vmem:[%s3014_s26 + $0xc8] ss:$16 sps:$4 sm:$0xff]   ;;  %v2544_v39 = vld [vmem:[%s3014_s26 + $0xe4] ss:$16 sps:$4 sm:$0xff]  }
  0x4a   : > { %v2546_v40 = vld [vmem:[%s3014_s26 + $0xec] ss:$16 sps:$4 sm:$0xff]   ;;  %v2548_v41 = vld [vmem:[%s3014_s26 + $0xe0] ss:$16 sps:$4 sm:$0xff]   ;;  %v2549_v42 = vld [vmem:[%s3014_s26 + $0xe8] ss:$16 sps:$4 sm:$0xff]  }
  0x4b   : > { %627 = vmatpush1.bf16.msra.mxu0 %v2518_v21  ;;  %710 = vmatpush1.bf16.msra.mxu1 %v2519_v22  ;;  %v426_v43 = vld [vmem:[#allocation2] sm:$0xff]  ;;  %v427_v44 = vld [vmem:[#allocation2 + $0x8] sm:$0xff]  ;;  %v428_v52 = vld [vmem:[#allocation2 + $0x10] sm:$0xff] }
  0x4c   : > { %628 = vmatprep.subr.bf16.mxu0 %v2520_v23  ;;  %711 = vmatprep.subr.bf16.mxu1 %v2522_v24  ;;  %v3097_v45 = vld [vmem:[%s3003_s18 + $0x4] ss:$16 sps:$4 sm:$0xff]   ;;  %v3100_v46 = vld [vmem:[%s3003_s18 + $0xc] ss:$16 sps:$4 sm:$0xff]   ;;  %v436_v47 = vpack.c.bf16 %v427_v44, %v426_v43  ;;  %v3103_v48 = vld [vmem:[%s3003_s18] ss:$16 sps:$4 sm:$0xff]  }
  0x4d   : > { %v3107_v49 = vld [vmem:[%s3003_s18 + $0x24] ss:$16 sps:$4 sm:$0xff]   ;;  %v3111_v50 = vld [vmem:[%s3003_s18 + $0x8] ss:$16 sps:$4 sm:$0xff]   ;;  %v3114_v51 = vld [vmem:[%s3003_s18 + $0x20] ss:$16 sps:$4 sm:$0xff]  }
  0x4e   : > { %v3117_v53 = vld [vmem:[%s3003_s18 + $0x2c] ss:$16 sps:$4 sm:$0xff]   ;;  %v3124_v55 = vld [vmem:[%s3003_s18 + $0x44] ss:$16 sps:$4 sm:$0xff]   ;;  %v3128_v56 = vld [vmem:[%s3003_s18 + $0x28] ss:$16 sps:$4 sm:$0xff]  }
  0x4f   : > { %629 = vmatpush1.bf16.msra.mxu0 %v2524_v25  ;;  %712 = vmatpush1.bf16.msra.mxu1 %v2525_v26  ;;  %v429_v54 = vld [vmem:[#allocation2 + $0x18] sm:$0xff]  ;;  %v3133_v58 = vld [vmem:[%s3003_s18 + $0x40] ss:$16 sps:$4 sm:$0xff]   ;;  %v3137_v59 = vld [vmem:[%s3003_s18 + $0x64] ss:$16 sps:$4 sm:$0xff]  }
  0x50   : > { %630 = vmatprep.subr.bf16.mxu0 %v2526_v27  ;;  %713 = vmatprep.subr.bf16.mxu1 %v2528_v28  ;;  %v437_v57 = vpack.c.bf16 %v429_v54, %v428_v52  ;;  %v430_v60 = vld [vmem:[#allocation2 + $0x20] sm:$0xff]  ;;  %v431_v61 = vld [vmem:[#allocation2 + $0x28] sm:$0xff]  ;;  %v432_v8 = vld [vmem:[#allocation2 + $0x30] sm:$0xff]  ;;  %v442_v27 = vlaneseq }
  0x51   : > { %v3141_v62 = vld [vmem:[%s3003_s18 + $0x4c] ss:$16 sps:$4 sm:$0xff]   ;;  %v3144_v63 = vld [vmem:[%s3003_s18 + $0x48] ss:$16 sps:$4 sm:$0xff]   ;;  %v3149_v0 = vld [vmem:[%s3003_s18 + $0x60] ss:$16 sps:$4 sm:$0xff]   ;;  %v438_v3 = vpack.c.bf16 %v431_v61, %v430_v60 }
  0x52   : > { %v3152_v1 = vld [vmem:[%s3003_s18 + $0x6c] ss:$16 sps:$4 sm:$0xff]   ;;  %v3157_v2 = vld [vmem:[%s3003_s18 + $0x84] ss:$16 sps:$4 sm:$0xff]   ;;  %v3164_v4 = vld [vmem:[%s3003_s18 + $0x80] ss:$16 sps:$4 sm:$0xff]  }
  0x53   : > { %631 = vmatpush1.bf16.msra.mxu0 %v2530_v29  ;;  %714 = vmatpush1.bf16.msra.mxu1 %v2531_v30  ;;  %v3167_v5 = vld [vmem:[%s3003_s18 + $0x68] ss:$16 sps:$4 sm:$0xff]   ;;  %v3171_v6 = vld [vmem:[%s3003_s18 + $0x8c] ss:$16 sps:$4 sm:$0xff]   ;;  %v3174_v7 = vld [vmem:[%s3003_s18 + $0xa4] ss:$16 sps:$4 sm:$0xff]  }
  0x54   : > { %632 = vmatprep.subr.bf16.mxu0 %v2532_v31  ;;  %715 = vmatprep.subr.bf16.mxu1 %v2534_v32  ;;  %v433_v9 = vld [vmem:[#allocation2 + $0x38] sm:$0xff]  ;;  %v3182_v11 = vld [vmem:[%s3003_s18 + $0xa0] ss:$16 sps:$4 sm:$0xff]   ;;  %v3190_v14 = vld [vmem:[%s3003_s18 + $0xc4] ss:$16 sps:$4 sm:$0xff]   ;;  %v443_v28 = vshrl.u32 %v442_v27, 7 }
  0x55   : > { %v3179_v10 = vld [vmem:[%s3003_s18 + $0x88] ss:$16 sps:$4 sm:$0xff]   ;;  %v3187_v13 = vld [vmem:[%s3003_s18 + $0xac] ss:$16 sps:$4 sm:$0xff]   ;;  %v439_v15 = vpack.c.bf16 %v433_v9, %v432_v8  ;;  %v3202_v17 = vld [vmem:[%s3003_s18 + $0xc0] ss:$16 sps:$4 sm:$0xff]  }
  0x56   : > { %v3197_v16 = vld [vmem:[%s3003_s18 + $0xa8] ss:$16 sps:$4 sm:$0xff]   ;;  %v3205_v18 = vld [vmem:[%s3003_s18 + $0xcc] ss:$16 sps:$4 sm:$0xff]   ;;  %v3208_v19 = vld [vmem:[%s3003_s18 + $0xe4] ss:$16 sps:$4 sm:$0xff]  }
  0x57   : > { %633 = vmatpush1.bf16.msra.mxu0 %v2536_v33  ;;  %716 = vmatpush1.bf16.msra.mxu1 %v2537_v34  ;;  %v434_v20 = vld [vmem:[#allocation2 + $0x40] sm:$0xff]  ;;  %v435_v21 = vld [vmem:[#allocation2 + $0x48] sm:$0xff]  ;;  %v452_v29 = vsub.s32 2, %v443_v28  ;;  %v456_v30 = vsub.s32 3, %v443_v28  ;;  %v444_v31 = vsub.s32 0, %v443_v28  ;;  %v448_v33 = vsub.s32 1, %v443_v28 }
  0x58   : > { %634 = vmatprep.subr.bf16.mxu0 %v2538_v35  ;;  %717 = vmatprep.subr.bf16.mxu1 %v2540_v36  ;;  %v3213_v22 = vld [vmem:[%s3003_s18 + $0xc8] ss:$16 sps:$4 sm:$0xff]   ;;  %v3218_v23 = vld [vmem:[%s3003_s18 + $0xe0] ss:$16 sps:$4 sm:$0xff]   ;;  %v3221_v24 = vld [vmem:[%s3003_s18 + $0xec] ss:$16 sps:$4 sm:$0xff]   ;;  %v440_v25 = vpack.c.bf16 %v435_v21, %v434_v20 }
  0x59   : > { %v3227_v26 = vld [vmem:[%s3003_s18 + $0xe8] ss:$16 sps:$4 sm:$0xff]   ;;  %v425_v32 = vld [vmem:[%s3019_s6] sm:$0xf] }
  0x5a   : > { %v3273_v34 = vrot.slane %v425_v32, %v452_v29 }
  0x5b   : > { %635 = vmatpush1.bf16.msra.mxu0 %v2542_v37  ;;  %718 = vmatpush1.bf16.msra.mxu1 %v2543_v38  ;;  %v3279_v37 = vrot.slane %v425_v32, %v456_v30  ;;  %v3281_v38 = vrot.slane %v425_v32, %v444_v31 }
  0x5c   : > { %636 = vmatprep.subr.bf16.mxu0 %v2544_v39  ;;  %719 = vmatprep.subr.bf16.mxu1 %v2546_v40 }
  0x5f   : > { %637 = vmatpush1.bf16.msra.mxu0 %v2548_v41  ;;  %720 = vmatpush1.bf16.msra.mxu1 %v2549_v42  ;;  %v3287_v41 = vrot.slane %v425_v32, %v448_v33 }
  0x60   : > { %992 = vmatprep.subr.bf16.mxu0 %v3097_v45  ;;  %1033 = vmatprep.subr.bf16.mxu1 %v3100_v46 }
  0x62   : > { %655 = vmatmul.mubr.bf16.vlgmr.msra.gmra.mrb[0].mxu0 %v436_v47  ;;  %738 = vmatmul.mubr.bf16.vlgmr.msra.gmra.mrb[0].mxu1 %v436_v47 }
  0x63   : > { %993 = vmatpush1.bf16.msra.mxu0 %v3103_v48  ;;  %664 = vmatprep.mubr.bf16.mxu0 %v3865_v12 }
  0x64   : > { %994 = vmatprep.subr.bf16.mxu0 %v3107_v49  ;;  %747 = vmatprep.mubr.bf16.mxu1 %v3865_v12 }
  0x65   : > { %1034 = vmatpush1.bf16.msra.mxu1 %v3111_v50 }
  0x66   : > { %1035 = vmatprep.subr.bf16.mxu1 %v3117_v53 }
  0x67   : > { %995 = vmatpush1.bf16.msra.mxu0 %v3114_v51 }
  0x68   : > { %996 = vmatprep.subr.bf16.mxu0 %v3124_v55 }
  0x69   : > { %1036 = vmatpush1.bf16.msra.mxu1 %v3128_v56 }
  0x6a   : > { %665 = vmatmul.mubr.bf16.gmra.mrb[4].mxu0 %v437_v57  ;;  %748 = vmatmul.mubr.bf16.gmra.mrb[4].mxu1 %v437_v57 }
  0x6b   : > { %997 = vmatpush1.bf16.msra.mxu0 %v3133_v58  ;;  %674 = vmatprep.mubr.bf16.mxu0 %v3865_v12 }
  0x6c   : > { %757 = vmatprep.mubr.bf16.mxu1 %v3865_v12  ;;  %998 = vmatprep.subr.bf16.mxu0 %v3137_v59 }
  0x6d   : > { %1037 = vmatprep.subr.bf16.mxu1 %v3141_v62 }
  0x6e   : > { %1038 = vmatpush1.bf16.msra.mxu1 %v3144_v63 }
  0x6f   : > { %999 = vmatpush1.bf16.msra.mxu0 %v3149_v0  ;;  %1039 = vmatprep.subr.bf16.mxu1 %v3152_v1 }
  0x70   : > { %1000 = vmatprep.subr.bf16.mxu0 %v3157_v2 }
  0x72   : > { %675 = vmatmul.mubr.bf16.gmra.mrb[8].mxu0 %v438_v3  ;;  %758 = vmatmul.mubr.bf16.gmra.mrb[8].mxu1 %v438_v3 }
  0x73   : > { %1001 = vmatpush1.bf16.msra.mxu0 %v3164_v4  ;;  %1040 = vmatpush1.bf16.msra.mxu1 %v3167_v5 }
  0x74   : > { %684 = vmatprep.mubr.bf16.mxu0 %v3865_v12  ;;  %767 = vmatprep.mubr.bf16.mxu1 %v3865_v12 }
  0x75   : > { %1041 = vmatprep.subr.bf16.mxu1 %v3171_v6  ;;  %1002 = vmatprep.subr.bf16.mxu0 %v3174_v7 }
  0x77   : > { %1042 = vmatpush1.bf16.msra.mxu1 %v3179_v10  ;;  %1003 = vmatpush1.bf16.msra.mxu0 %v3182_v11 }
  0x78   : > { %1043 = vmatprep.subr.bf16.mxu1 %v3187_v13  ;;  %1004 = vmatprep.subr.bf16.mxu0 %v3190_v14 }
  0x7a   : > { %685 = vmatmul.mubr.bf16.gmra.mrb[12].mxu0 %v439_v15  ;;  %768 = vmatmul.mubr.bf16.gmra.mrb[12].mxu1 %v439_v15 }
  0x7b   : > { %1044 = vmatpush1.bf16.msra.mxu1 %v3197_v16  ;;  %694 = vmatprep.mubr.bf16.mxu0 %v3865_v12 }
  0x7c   : > { %777 = vmatprep.mubr.bf16.mxu1 %v3865_v12  ;;  %1005 = vmatpush1.bf16.msra.mxu0 %v3202_v17 }
  0x7d   : > { %1045 = vmatprep.subr.bf16.mxu1 %v3205_v18  ;;  %1006 = vmatprep.subr.bf16.mxu0 %v3208_v19 }
  0x7f   : > { %1046 = vmatpush1.bf16.msra.mxu1 %v3213_v22 }
  0x80   : > { %1007 = vmatpush1.bf16.msra.mxu0 %v3218_v23  ;;  %1047 = vmatprep.subr.bf16.mxu1 %v3221_v24 }
  0x81   : > { %1109 = vmatprep.subr.bf16.mxu0 %v3097_v45 }
  0x82   : > { %695 = vmatmul.mubr.bf16.gmra.mrb[16].mxu0 %v440_v25  ;;  %778 = vmatmul.mubr.bf16.gmra.mrb[16].mxu1 %v440_v25 }
  0x83   : > { %1048 = vmatpush1.bf16.msra.mxu1 %v3227_v26  ;;  %1024 = vmatprep.mubr.bf16.mxu0 %v3865_v12 }
  0x84   : > { %1065 = vmatprep.mubr.bf16.mxu1 %v3865_v12  ;;  %1150 = vmatprep.subr.bf16.mxu1 %v3100_v46 }
  0x8a   : > { %1025 = vmatmul.mubr.bf16.vlgmr.msra.gmra.mrb[20].mxu0 %v3865_v12  ;;  %1066 = vmatmul.mubr.bf16.vlgmr.msra.gmra.mrb[20].mxu1 %v3865_v12 }
  0x8b   : > { %1110 = vmatpush1.bf16.msra.mxu0 %v3103_v48  ;;  %1151 = vmatpush1.bf16.msra.mxu1 %v3111_v50 }
  0x8c   : > { %1111 = vmatprep.subr.bf16.mxu0 %v3107_v49  ;;  %1152 = vmatprep.subr.bf16.mxu1 %v3117_v53 }
  0x8d   : > { %1141 = vmatprep.mubr.bf16.mxu0 %v3865_v12  ;;  %1182 = vmatprep.mubr.bf16.mxu1 %v3865_v12 }
  0x8f   : > { %1112 = vmatpush1.bf16.msra.mxu0 %v3114_v51  ;;  %1153 = vmatpush1.bf16.msra.mxu1 %v3128_v56 }
  0x90   : > { %1113 = vmatprep.subr.bf16.mxu0 %v3124_v55  ;;  %1154 = vmatprep.subr.bf16.mxu1 %v3141_v62 }
  0x93   : > { %1114 = vmatpush1.bf16.msra.mxu0 %v3133_v58  ;;  %1155 = vmatpush1.bf16.msra.mxu1 %v3144_v63 }
  0x94   : > { %1115 = vmatprep.subr.bf16.mxu0 %v3137_v59  ;;  %1156 = vmatprep.subr.bf16.mxu1 %v3152_v1 }
  0x97   : > { %1116 = vmatpush1.bf16.msra.mxu0 %v3149_v0  ;;  %1157 = vmatpush1.bf16.msra.mxu1 %v3167_v5 }
  0x98   : > { %1117 = vmatprep.subr.bf16.mxu0 %v3157_v2  ;;  %1158 = vmatprep.subr.bf16.mxu1 %v3171_v6 }
  0x9b   : > { %1118 = vmatpush1.bf16.msra.mxu0 %v3164_v4  ;;  %1159 = vmatpush1.bf16.msra.mxu1 %v3179_v10 }
  0x9c   : > { %1119 = vmatprep.subr.bf16.mxu0 %v3174_v7  ;;  %1160 = vmatprep.subr.bf16.mxu1 %v3187_v13 }
  0x9f   : > { %1120 = vmatpush1.bf16.msra.mxu0 %v3182_v11  ;;  %1161 = vmatpush1.bf16.msra.mxu1 %v3197_v16 }
  0xa0   : > { %1121 = vmatprep.subr.bf16.mxu0 %v3190_v14  ;;  %1162 = vmatprep.subr.bf16.mxu1 %v3205_v18 }
  0xa3   : > { %1122 = vmatpush1.bf16.msra.mxu0 %v3202_v17  ;;  %1163 = vmatpush1.bf16.msra.mxu1 %v3213_v22 }
  0xa4   : > { %1123 = vmatprep.subr.bf16.mxu0 %v3208_v19  ;;  %1164 = vmatprep.subr.bf16.mxu1 %v3221_v24 }
  0xa7   : > { %1124 = vmatpush1.bf16.msra.mxu0 %v3218_v23  ;;  %1165 = vmatpush1.bf16.msra.mxu1 %v3227_v26 }
  0xa8   : > { %1227 = vmatprep.subr.bf16.mxu0 %v3097_v45  ;;  %1268 = vmatprep.subr.bf16.mxu1 %v3100_v46 }
 0x135   : > { %v3275_v35 = vpop.f32.mrb[0].mxu0  ;;  %v3277_v36 = vpop.f32.mrb[0].mxu1 }
 0x136   : > { %v3283_v39 = vpop.f32.mrb[1].mxu0  ;;  %v3285_v40 = vpop.f32.mrb[1].mxu1 }
 0x137   : > { %v660_v42 = vpop.f32.mrb[2].mxu0  ;;  %v743_v43 = vpop.f32.mrb[2].mxu1 }
 0x138   : > { %v3290_v44 = vadd.f32 %v660_v42, %v3281_v38  ;;  %v662_v47 = vpop.f32.mrb[3].mxu0  ;;  %v3293_v52 = vadd.f32 %v743_v43, %v3273_v34  ;;  %v745_v54 = vpop.f32.mrb[3].mxu1 }
 0x139   : > { %v3296_v57 = vadd.f32 %v662_v47, %v3287_v41  ;;  %v3299_v60 = vadd.f32 %v745_v54, %v3279_v37 }
 0x13d   : > { %v666_v61 = vpop.f32.mrb[4].mxu0  ;;  %v749_v3 = vpop.f32.mrb[4].mxu1 }
 0x13e   : > { %v3302_v8 = vadd.f32 %v666_v61, %v3281_v38  ;;  %v668_v9 = vpop.f32.mrb[5].mxu0  ;;  %v3305_v15 = vadd.f32 %v749_v3, %v3273_v34  ;;  %v751_v20 = vpop.f32.mrb[5].mxu1 }
 0x13f   : > { %v3308_v21 = vadd.f32 %v668_v9, %v3287_v41  ;;  %v670_v25 = vpop.f32.mrb[6].mxu0  ;;  %v3311_v27 = vadd.f32 %v751_v20, %v3279_v37  ;;  %v753_v28 = vpop.f32.mrb[6].mxu1 }
 0x140   : > { %v3314_v29 = vadd.f32 %v670_v25, %v3281_v38  ;;  %v672_v30 = vpop.f32.mrb[7].mxu0  ;;  %v3317_v31 = vadd.f32 %v753_v28, %v3273_v34  ;;  %v755_v32 = vpop.f32.mrb[7].mxu1 }
 0x141   : > { %v3320_v33 = vadd.f32 %v672_v30, %v3287_v41  ;;  %v3323_v42 = vadd.f32 %v755_v32, %v3279_v37 }
 0x142   : > { %3870 = vst [vmem:[#allocation7_spill] sm:$0xff] %v3317_v31 }
 0x143   : > { %3871 = vst [vmem:[#allocation8_spill] sm:$0xff] %v3320_v33  ;;  %3872 = vst [vmem:[#allocation9_spill] sm:$0xff] %v3323_v42 }
 0x145   : > { %v676_v43 = vpop.f32.mrb[8].mxu0  ;;  %v759_v47 = vpop.f32.mrb[8].mxu1 }
 0x146   : > { %v3326_v54 = vadd.f32 %v676_v43, %v3281_v38  ;;  %v678_v61 = vpop.f32.mrb[9].mxu0  ;;  %v3329_v3 = vadd.f32 %v759_v47, %v3273_v34  ;;  %v761_v9 = vpop.f32.mrb[9].mxu1 }
 0x147   : > { %v3332_v20 = vadd.f32 %v678_v61, %v3287_v41  ;;  %v680_v25 = vpop.f32.mrb[10].mxu0  ;;  %v3335_v28 = vadd.f32 %v761_v9, %v3279_v37  ;;  %v763_v30 = vpop.f32.mrb[10].mxu1 }
 0x148   : > { %3873 = vst [vmem:[#allocation10_spill] sm:$0xff] %v3326_v54  ;;  %3874 = vst [vmem:[#allocation11_spill] sm:$0xff] %v3329_v3  ;;  %v3338_v32 = vadd.f32 %v680_v25, %v3281_v38  ;;  %v682_v12 = vpop.f32.mrb[11].mxu0  ;;  %v3341_v43 = vadd.f32 %v763_v30, %v3273_v34  ;;  %v765_v54 = vpop.f32.mrb[11].mxu1 }
 0x149   : > { %3875 = vst [vmem:[#allocation12_spill] sm:$0xff] %v3332_v20  ;;  %3876 = vst [vmem:[#allocation13_spill] sm:$0xff] %v3335_v28  ;;  %v3344_v47 = vadd.f32 %v682_v12, %v3287_v41  ;;  %v3347_v3 = vadd.f32 %v765_v54, %v3279_v37 }
 0x14a   : > { %3877 = vst [vmem:[#allocation14_spill] sm:$0xff] %v3338_v32  ;;  %3878 = vst [vmem:[#allocation15_spill] sm:$0xff] %v3341_v43 }
 0x14b   : > { %3879 = vst [vmem:[#allocation16_spill] sm:$0xff] %v3344_v47  ;;  %3880 = vst [vmem:[#allocation17_spill] sm:$0xff] %v3347_v3 }
 0x14d   : > { %v686_v61 = vpop.f32.mrb[12].mxu0  ;;  %v769_v20 = vpop.f32.mrb[12].mxu1 }
 0x14e   : > { %v3350_v9 = vadd.f32 %v686_v61, %v3281_v38  ;;  %v688_v28 = vpop.f32.mrb[13].mxu0  ;;  %v3353_v25 = vadd.f32 %v769_v20, %v3273_v34  ;;  %v771_v32 = vpop.f32.mrb[13].mxu1 }
 0x14f   : > { %v3356_v30 = vadd.f32 %v688_v28, %v3287_v41  ;;  %v690_v43 = vpop.f32.mrb[14].mxu0  ;;  %v3359_v12 = vadd.f32 %v771_v32, %v3279_v37  ;;  %v773_v47 = vpop.f32.mrb[14].mxu1 }
 0x150   : > { %3881 = vst [vmem:[#allocation18_spill] sm:$0xff] %v3350_v9  ;;  %3882 = vst [vmem:[#allocation19_spill] sm:$0xff] %v3353_v25  ;;  %v3362_v54 = vadd.f32 %v690_v43, %v3281_v38  ;;  %v692_v3 = vpop.f32.mrb[15].mxu0  ;;  %v3365_v61 = vadd.f32 %v773_v47, %v3273_v34  ;;  %v775_v9 = vpop.f32.mrb[15].mxu1 }
 0x151   : > { %3883 = vst [vmem:[#allocation20_spill] sm:$0xff] %v3356_v30  ;;  %3884 = vst [vmem:[#allocation21_spill] sm:$0xff] %v3359_v12  ;;  %v3368_v20 = vadd.f32 %v692_v3, %v3287_v41  ;;  %v3371_v25 = vadd.f32 %v775_v9, %v3279_v37 }
 0x152   : > { %3885 = vst [vmem:[#allocation22_spill] sm:$0xff] %v3362_v54  ;;  %3886 = vst [vmem:[#allocation23_spill] sm:$0xff] %v3365_v61 }
 0x153   : > { %3887 = vst [vmem:[#allocation24_spill] sm:$0xff] %v3368_v20  ;;  %3888 = vst [vmem:[#allocation25_spill] sm:$0xff] %v3371_v25 }
 0x155   : > { %v696_v28 = vpop.f32.mrb[16].mxu0  ;;  %v779_v30 = vpop.f32.mrb[16].mxu1 }
 0x156   : > { %v3374_v32 = vadd.f32 %v696_v28, %v3281_v38  ;;  %v698_v12 = vpop.f32.mrb[17].mxu0  ;;  %v3377_v43 = vadd.f32 %v779_v30, %v3273_v34  ;;  %v781_v54 = vpop.f32.mrb[17].mxu1 }
 0x157   : > { %v3380_v47 = vadd.f32 %v698_v12, %v3287_v41  ;;  %v700_v61 = vpop.f32.mrb[18].mxu0  ;;  %v3383_v3 = vadd.f32 %v781_v54, %v3279_v37  ;;  %v783_v20 = vpop.f32.mrb[18].mxu1  ;;  %v657_v12 = vadd.f32 %v3275_v35, %v3281_v38  ;;  %v740_v54 = vadd.f32 %v3277_v36, %v3273_v34 }
 0x158   : > { %3889 = vst [vmem:[#allocation26_spill] sm:$0xff] %v3374_v32  ;;  %3890 = vst [vmem:[#allocation27_spill] sm:$0xff] %v3377_v43  ;;  %v3386_v9 = vadd.f32 %v700_v61, %v3281_v38  ;;  %v702_v25 = vpop.f32.mrb[19].mxu0  ;;  %v3389_v28 = vadd.f32 %v783_v20, %v3273_v34  ;;  %v785_v32 = vpop.f32.mrb[19].mxu1  ;;  %v659_v61 = vadd.f32 %v3283_v39, %v3287_v41 }
 0x159   : > { %3891 = vst [vmem:[#allocation28_spill] sm:$0xff] %v3380_v47  ;;  %3892 = vst [vmem:[#allocation29_spill] sm:$0xff] %v3383_v3  ;;  %v3392_v30 = vadd.f32 %v702_v25, %v3287_v41  ;;  %v3395_v43 = vadd.f32 %v785_v32, %v3279_v37  ;;  %v742_v20 = vadd.f32 %v3285_v40, %v3279_v37 }
 0x15a   : > { %3893 = vst [vmem:[#allocation30_spill] sm:$0xff] %v3386_v9  ;;  %3894 = vst [vmem:[#allocation31_spill] sm:$0xff] %v3389_v28 }
 0x15b   : > { %3895 = vst [vmem:[#allocation32_spill] sm:$0xff] %v3392_v30  ;;  %3896 = vst [vmem:[#allocation33_spill] sm:$0xff] %v3395_v43 }
 0x15d   : > { %v1026_v28 = vpop.f32.mrb[20].mxu0  ;;  %v1067_v9 = vpop.f32.mrb[20].mxu1 }
 0x15e   : > { %v1074_v3 = vadd.f32 %v1026_v28, %v657_v12  ;;  %v1076_v25 = vadd.f32 %v1067_v9, %v740_v54  ;;  %v1028_v30 = vpop.f32.mrb[21].mxu0  ;;  %v1069_v47 = vpop.f32.mrb[21].mxu1 }
 0x15f   : > { %v1075_v32 = vadd.f32 %v1028_v30, %v659_v61  ;;  %v1077_v43 = vadd.f32 %v1069_v47, %v742_v20  ;;  %v1030_v42 = vpop.f32.mrb[22].mxu0  ;;  %v1071_v33 = vpop.f32.mrb[22].mxu1  ;;  %v3897_v20 = vmov 0  }
 0x160   : > { %v2410_v35 = vmul.f32 -1.442695, %v1074_v3  ;;  %v1031_v38 = vpop.f32.mrb[23].mxu0  ;;  %v1072_v31 = vpop.f32.mrb[23].mxu1 }
 0x161   : > { %v2411_v34 = vmul.f32 -1.442695, %v1075_v32  ;;  %v2412_v36 = vmul.f32 -1.442695, %v1077_v43 }
 0x162   : > { %2598 = vpow2.f32 %v2410_v35 }
 0x163   : > { %2600 = vpow2.f32 %v2411_v34 }
 0x164   : > { %2602 = vpow2.f32 %v2412_v36 }
 0x165   : > { %2604 = vtanh.f32 %v1076_v25 }
 0x16c   : > { %v2599_v39 = vpop.eup %2598 }
 0x16d   : > { %v2601_v41 = vpop.eup %2600  ;;  %v1087_v37 = vadd.f32 1.0, %v2599_v39 }
 0x16e   : > { %v1088_v40 = vadd.f32 1.0, %v2601_v41  ;;  %v2603_v9 = vpop.eup %2602 }
 0x16f   : > { %2606 = vrcp.f32 %v1087_v37  ;;  %v2605_v28 = vpop.eup %2604  ;;  %v1089_v3 = vadd.f32 1.0, %v2603_v9 }
 0x170   : > { %2608 = vrcp.f32 %v1088_v40 }
 0x171   : > { %2610 = vrcp.f32 %v1089_v3 }
 0x179   : > { %v2607_v47 = vpop.eup %2606 }
 0x17a   : > { %v2609_v42 = vpop.eup %2608  ;;  %v1098_v33 = vmul.f32 %v2607_v47, %v2605_v28 }
 0x17b   : > { %v1097_v30 = vmul.f32 0.0, %v2609_v42  ;;  %v2611_v43 = vpop.eup %2610 }
 0x17d   : > { %v3405_v31 = vadd.f32 %v1098_v33, %v1097_v30 }
 0x17f   : > { %2612 = vtanh.f32 %v3405_v31 }
 0x189   : > { %v2613_v12 = vpop.eup %2612 }
 0x18a   : > { %v1101_v54 = vmul.f32 %v2613_v12, %v2611_v43 }
 0x18c   : > { %1102 = vst [vmem:[#allocation2] sm:$0xff] %v1101_v54  ;;  %v1108_v61 = vpack.c.bf16 %v1101_v54, %v1101_v54 }
 0x18e   : > { %1142 = vmatmul.mubr.bf16.vlgmr.msra.gmra.mrb[24].mxu0 %v1108_v61  ;;  %1183 = vmatmul.mubr.bf16.vlgmr.msra.gmra.mrb[24].mxu1 %v1108_v61 }
 0x18f   : > { %1228 = vmatpush1.bf16.msra.mxu0 %v3103_v48  ;;  %1269 = vmatpush1.bf16.msra.mxu1 %v3111_v50 }
 0x190   : > { %1229 = vmatprep.subr.bf16.mxu0 %v3107_v49  ;;  %1270 = vmatprep.subr.bf16.mxu1 %v3117_v53 }
 0x191   : > { %1259 = vmatprep.mubr.bf16.mxu0 %v3897_v20  ;;  %1300 = vmatprep.mubr.bf16.mxu1 %v3897_v20 }
 0x193   : > { %1230 = vmatpush1.bf16.msra.mxu0 %v3114_v51  ;;  %1271 = vmatpush1.bf16.msra.mxu1 %v3128_v56 }
 0x194   : > { %1231 = vmatprep.subr.bf16.mxu0 %v3124_v55  ;;  %1272 = vmatprep.subr.bf16.mxu1 %v3141_v62 }
 0x197   : > { %1232 = vmatpush1.bf16.msra.mxu0 %v3133_v58  ;;  %1273 = vmatpush1.bf16.msra.mxu1 %v3144_v63 }
 0x198   : > { %1233 = vmatprep.subr.bf16.mxu0 %v3137_v59  ;;  %1274 = vmatprep.subr.bf16.mxu1 %v3152_v1 }
 0x19b   : > { %1234 = vmatpush1.bf16.msra.mxu0 %v3149_v0  ;;  %1275 = vmatpush1.bf16.msra.mxu1 %v3167_v5 }
 0x19c   : > { %1235 = vmatprep.subr.bf16.mxu0 %v3157_v2  ;;  %1276 = vmatprep.subr.bf16.mxu1 %v3171_v6 }
 0x19f   : > { %1236 = vmatpush1.bf16.msra.mxu0 %v3164_v4  ;;  %1277 = vmatpush1.bf16.msra.mxu1 %v3179_v10 }
 0x1a0   : > { %1237 = vmatprep.subr.bf16.mxu0 %v3174_v7  ;;  %1278 = vmatprep.subr.bf16.mxu1 %v3187_v13 }
 0x1a3   : > { %1238 = vmatpush1.bf16.msra.mxu0 %v3182_v11  ;;  %1279 = vmatpush1.bf16.msra.mxu1 %v3197_v16 }
 0x1a4   : > { %1239 = vmatprep.subr.bf16.mxu0 %v3190_v14  ;;  %1280 = vmatprep.subr.bf16.mxu1 %v3205_v18 }
 0x1a7   : > { %1240 = vmatpush1.bf16.msra.mxu0 %v3202_v17  ;;  %1281 = vmatpush1.bf16.msra.mxu1 %v3213_v22 }
 0x1a8   : > { %1241 = vmatprep.subr.bf16.mxu0 %v3208_v19  ;;  %1282 = vmatprep.subr.bf16.mxu1 %v3221_v24 }
 0x1ab   : > { %1242 = vmatpush1.bf16.msra.mxu0 %v3218_v23  ;;  %1283 = vmatpush1.bf16.msra.mxu1 %v3227_v26 }
 0x1ac   : > { %1345 = vmatprep.subr.bf16.mxu0 %v3097_v45  ;;  %1386 = vmatprep.subr.bf16.mxu1 %v3100_v46 }
 0x261   : > { %v1143_v25 = vpop.f32.mrb[24].mxu0  ;;  %v1184_v32 = vpop.f32.mrb[24].mxu1 }
 0x262   : > { %v1191_v35 = vadd.f32 %v1143_v25, %v3290_v44  ;;  %v1193_v38 = vadd.f32 %v1184_v32, %v3293_v52  ;;  %v1145_v34 = vpop.f32.mrb[25].mxu0  ;;  %v1186_v36 = vpop.f32.mrb[25].mxu1 }
 0x263   : > { %v1192_v39 = vadd.f32 %v1145_v34, %v3296_v57  ;;  %v1194_v41 = vadd.f32 %v1186_v36, %v3299_v60  ;;  %v1147_v37 = vpop.f32.mrb[26].mxu0  ;;  %v1188_v40 = vpop.f32.mrb[26].mxu1 }
 0x264   : > { %v2413_v9 = vmul.f32 -1.442695, %v1191_v35  ;;  %v1148_v28 = vpop.f32.mrb[27].mxu0  ;;  %v1189_v47 = vpop.f32.mrb[27].mxu1 }
 0x265   : > { %v2414_v42 = vmul.f32 -1.442695, %v1192_v39  ;;  %v2415_v33 = vmul.f32 -1.442695, %v1194_v41 }
 0x266   : > { %2614 = vpow2.f32 %v2413_v9 }
 0x267   : > { %2616 = vpow2.f32 %v2414_v42 }
 0x268   : > { %2618 = vpow2.f32 %v2415_v33 }
 0x269   : > { %2620 = vtanh.f32 %v1193_v38 }
 0x270   : > { %v2615_v3 = vpop.eup %2614 }
 0x271   : > { %v2617_v30 = vpop.eup %2616  ;;  %v1204_v44 = vadd.f32 1.0, %v2615_v3 }
 0x272   : > { %v1205_v52 = vadd.f32 1.0, %v2617_v30  ;;  %v2619_v57 = vpop.eup %2618 }
 0x273   : > { %2622 = vrcp.f32 %v1204_v44  ;;  %v2621_v43 = vpop.eup %2620  ;;  %v1206_v61 = vadd.f32 1.0, %v2619_v57 }
 0x274   : > { %2624 = vrcp.f32 %v1205_v52 }
 0x275   : > { %2626 = vrcp.f32 %v1206_v61 }
 0x27d   : > { %v2623_v60 = vpop.eup %2622 }
 0x27e   : > { %v2625_v12 = vpop.eup %2624  ;;  %v1215_v54 = vmul.f32 %v2623_v60, %v2621_v43 }
 0x27f   : > { %v1214_v25 = vmul.f32 %v2625_v12, %v3405_v31  ;;  %v2627_v35 = vpop.eup %2626 }
 0x281   : > { %v3447_v32 = vadd.f32 %v1215_v54, %v1214_v25 }
 0x283   : > { %2628 = vtanh.f32 %v3447_v32 }
 0x28d   : > { %v2629_v34 = vpop.eup %2628 }
 0x28e   : > { %v1218_v36 = vmul.f32 %v2629_v34, %v2627_v35 }
 0x290   : > { %1220 = vst [vmem:[#allocation2 + $0x8] sm:$0xff] %v1218_v36  ;;  %v1226_v38 = vpack.c.bf16 %v1218_v36, %v1218_v36 }
 0x292   : > { %1260 = vmatmul.mubr.bf16.vlgmr.msra.gmra.mrb[28].mxu0 %v1226_v38  ;;  %1301 = vmatmul.mubr.bf16.vlgmr.msra.gmra.mrb[28].mxu1 %v1226_v38 }
 0x293   : > { %1346 = vmatpush1.bf16.msra.mxu0 %v3103_v48  ;;  %1387 = vmatpush1.bf16.msra.mxu1 %v3111_v50 }
 0x294   : > { %1347 = vmatprep.subr.bf16.mxu0 %v3107_v49  ;;  %1388 = vmatprep.subr.bf16.mxu1 %v3117_v53 }
 0x295   : > { %1377 = vmatprep.mubr.bf16.mxu0 %v3897_v20  ;;  %1418 = vmatprep.mubr.bf16.mxu1 %v3897_v20 }
 0x297   : > { %1348 = vmatpush1.bf16.msra.mxu0 %v3114_v51  ;;  %1389 = vmatpush1.bf16.msra.mxu1 %v3128_v56 }
 0x298   : > { %1349 = vmatprep.subr.bf16.mxu0 %v3124_v55  ;;  %1390 = vmatprep.subr.bf16.mxu1 %v3141_v62 }
 0x29b   : > { %1350 = vmatpush1.bf16.msra.mxu0 %v3133_v58  ;;  %1391 = vmatpush1.bf16.msra.mxu1 %v3144_v63 }
 0x29c   : > { %1351 = vmatprep.subr.bf16.mxu0 %v3137_v59  ;;  %1392 = vmatprep.subr.bf16.mxu1 %v3152_v1 }
 0x29f   : > { %1352 = vmatpush1.bf16.msra.mxu0 %v3149_v0  ;;  %1393 = vmatpush1.bf16.msra.mxu1 %v3167_v5 }
 0x2a0   : > { %1353 = vmatprep.subr.bf16.mxu0 %v3157_v2  ;;  %1394 = vmatprep.subr.bf16.mxu1 %v3171_v6 }
 0x2a3   : > { %1354 = vmatpush1.bf16.msra.mxu0 %v3164_v4  ;;  %1395 = vmatpush1.bf16.msra.mxu1 %v3179_v10 }
 0x2a4   : > { %1355 = vmatprep.subr.bf16.mxu0 %v3174_v7  ;;  %1396 = vmatprep.subr.bf16.mxu1 %v3187_v13 }
 0x2a7   : > { %1356 = vmatpush1.bf16.msra.mxu0 %v3182_v11  ;;  %1397 = vmatpush1.bf16.msra.mxu1 %v3197_v16 }
 0x2a8   : > { %1357 = vmatprep.subr.bf16.mxu0 %v3190_v14  ;;  %1398 = vmatprep.subr.bf16.mxu1 %v3205_v18 }
 0x2ab   : > { %1358 = vmatpush1.bf16.msra.mxu0 %v3202_v17  ;;  %1399 = vmatpush1.bf16.msra.mxu1 %v3213_v22 }
 0x2ac   : > { %1359 = vmatprep.subr.bf16.mxu0 %v3208_v19  ;;  %1400 = vmatprep.subr.bf16.mxu1 %v3221_v24 }
 0x2af   : > { %1360 = vmatpush1.bf16.msra.mxu0 %v3218_v23  ;;  %1401 = vmatpush1.bf16.msra.mxu1 %v3227_v26 }
 0x2b0   : > { %1463 = vmatprep.subr.bf16.mxu0 %v3097_v45  ;;  %1504 = vmatprep.subr.bf16.mxu1 %v3100_v46 }
 0x365   : > { %v1261_v31 = vpop.f32.mrb[28].mxu0  ;;  %v1302_v39 = vpop.f32.mrb[28].mxu1 }
 0x366   : > { %v1309_v41 = vadd.f32 %v1261_v31, %v3302_v8  ;;  %v1311_v37 = vadd.f32 %v1302_v39, %v3305_v15  ;;  %v1263_v40 = vpop.f32.mrb[29].mxu0  ;;  %v1304_v9 = vpop.f32.mrb[29].mxu1 }
 0x367   : > { %v1310_v28 = vadd.f32 %v1263_v40, %v3308_v21  ;;  %v1312_v47 = vadd.f32 %v1304_v9, %v3311_v27  ;;  %v1265_v42 = vpop.f32.mrb[30].mxu0  ;;  %v1306_v33 = vpop.f32.mrb[30].mxu1  ;;  %v3898_v40 = vld [vmem:[#allocation7_spill] sm:$0xff] }
 0x368   : > { %v2416_v3 = vmul.f32 -1.442695, %v1309_v41  ;;  %v1266_v30 = vpop.f32.mrb[31].mxu0  ;;  %v1307_v44 = vpop.f32.mrb[31].mxu1  ;;  %v3899_v42 = vld [vmem:[#allocation8_spill] sm:$0xff] }
 0x369   : > { %v2417_v52 = vmul.f32 -1.442695, %v1310_v28  ;;  %v2418_v57 = vmul.f32 -1.442695, %v1312_v47 }
 0x36a   : > { %2630 = vpow2.f32 %v2416_v3  ;;  %v3900_v3 = vld [vmem:[#allocation9_spill] sm:$0xff] }
 0x36b   : > { %2632 = vpow2.f32 %v2417_v52 }
 0x36c   : > { %2634 = vpow2.f32 %v2418_v57 }
 0x36d   : > { %2636 = vtanh.f32 %v1311_v37 }
 0x374   : > { %v2631_v43 = vpop.eup %2630 }
 0x375   : > { %v2633_v60 = vpop.eup %2632  ;;  %v1322_v8 = vadd.f32 1.0, %v2631_v43 }
 0x376   : > { %v1323_v15 = vadd.f32 1.0, %v2633_v60  ;;  %v2635_v21 = vpop.eup %2634 }
 0x377   : > { %2638 = vrcp.f32 %v1322_v8  ;;  %v2637_v12 = vpop.eup %2636  ;;  %v1324_v25 = vadd.f32 1.0, %v2635_v21 }
 0x378   : > { %2640 = vrcp.f32 %v1323_v15 }
 0x379   : > { %2642 = vrcp.f32 %v1324_v25 }
 0x381   : > { %v2639_v27 = vpop.eup %2638 }
 0x382   : > { %v2641_v54 = vpop.eup %2640  ;;  %v1333_v61 = vmul.f32 %v2639_v27, %v2637_v12 }
 0x383   : > { %v1332_v35 = vmul.f32 %v2641_v54, %v3447_v32  ;;  %v2643_v36 = vpop.eup %2642 }
 0x385   : > { %v3489_v34 = vadd.f32 %v1333_v61, %v1332_v35 }
 0x387   : > { %2644 = vtanh.f32 %v3489_v34 }
 0x391   : > { %v2645_v38 = vpop.eup %2644 }
 0x392   : > { %v1336_v31 = vmul.f32 %v2645_v38, %v2643_v36 }
 0x394   : > { %1338 = vst [vmem:[#allocation2 + $0x10] sm:$0xff] %v1336_v31  ;;  %v1344_v39 = vpack.c.bf16 %v1336_v31, %v1336_v31 }
 0x396   : > { %1378 = vmatmul.mubr.bf16.vlgmr.msra.gmra.mrb[32].mxu0 %v1344_v39  ;;  %1419 = vmatmul.mubr.bf16.vlgmr.msra.gmra.mrb[32].mxu1 %v1344_v39 }
 0x397   : > { %1464 = vmatpush1.bf16.msra.mxu0 %v3103_v48  ;;  %1505 = vmatpush1.bf16.msra.mxu1 %v3111_v50 }
 0x398   : > { %1465 = vmatprep.subr.bf16.mxu0 %v3107_v49  ;;  %1506 = vmatprep.subr.bf16.mxu1 %v3117_v53 }
 0x399   : > { %1495 = vmatprep.mubr.bf16.mxu0 %v3897_v20  ;;  %1536 = vmatprep.mubr.bf16.mxu1 %v3897_v20 }
 0x39b   : > { %1466 = vmatpush1.bf16.msra.mxu0 %v3114_v51  ;;  %1507 = vmatpush1.bf16.msra.mxu1 %v3128_v56 }
 0x39c   : > { %1467 = vmatprep.subr.bf16.mxu0 %v3124_v55  ;;  %1508 = vmatprep.subr.bf16.mxu1 %v3141_v62 }
 0x39f   : > { %1468 = vmatpush1.bf16.msra.mxu0 %v3133_v58  ;;  %1509 = vmatpush1.bf16.msra.mxu1 %v3144_v63 }
 0x3a0   : > { %1469 = vmatprep.subr.bf16.mxu0 %v3137_v59  ;;  %1510 = vmatprep.subr.bf16.mxu1 %v3152_v1 }
 0x3a3   : > { %1470 = vmatpush1.bf16.msra.mxu0 %v3149_v0  ;;  %1511 = vmatpush1.bf16.msra.mxu1 %v3167_v5 }
 0x3a4   : > { %1471 = vmatprep.subr.bf16.mxu0 %v3157_v2  ;;  %1512 = vmatprep.subr.bf16.mxu1 %v3171_v6 }
 0x3a7   : > { %1472 = vmatpush1.bf16.msra.mxu0 %v3164_v4  ;;  %1513 = vmatpush1.bf16.msra.mxu1 %v3179_v10 }
 0x3a8   : > { %1473 = vmatprep.subr.bf16.mxu0 %v3174_v7  ;;  %1514 = vmatprep.subr.bf16.mxu1 %v3187_v13 }
 0x3ab   : > { %1474 = vmatpush1.bf16.msra.mxu0 %v3182_v11  ;;  %1515 = vmatpush1.bf16.msra.mxu1 %v3197_v16 }
 0x3ac   : > { %1475 = vmatprep.subr.bf16.mxu0 %v3190_v14  ;;  %1516 = vmatprep.subr.bf16.mxu1 %v3205_v18 }
 0x3af   : > { %1476 = vmatpush1.bf16.msra.mxu0 %v3202_v17  ;;  %1517 = vmatpush1.bf16.msra.mxu1 %v3213_v22 }
 0x3b0   : > { %1477 = vmatprep.subr.bf16.mxu0 %v3208_v19  ;;  %1518 = vmatprep.subr.bf16.mxu1 %v3221_v24 }
 0x3b3   : > { %1478 = vmatpush1.bf16.msra.mxu0 %v3218_v23  ;;  %1519 = vmatpush1.bf16.msra.mxu1 %v3227_v26 }
 0x3b4   : > { %1581 = vmatprep.subr.bf16.mxu0 %v3097_v45  ;;  %1622 = vmatprep.subr.bf16.mxu1 %v3100_v46 }
 0x469   : > { %v1379_v32 = vpop.f32.mrb[32].mxu0  ;;  %v1420_v41 = vpop.f32.mrb[32].mxu1 }
 0x46a   : > { %v1427_v37 = vadd.f32 %v1379_v32, %v3314_v29  ;;  %v1429_v9 = vadd.f32 %v1420_v41, %v3898_v40  ;;  %v1381_v28 = vpop.f32.mrb[33].mxu0  ;;  %v1422_v47 = vpop.f32.mrb[33].mxu1 }
 0x46b   : > { %v1428_v33 = vadd.f32 %v1381_v28, %v3899_v42  ;;  %v1430_v30 = vadd.f32 %v1422_v47, %v3900_v3  ;;  %v1383_v44 = vpop.f32.mrb[34].mxu0  ;;  %v1424_v52 = vpop.f32.mrb[34].mxu1  ;;  %v3587_v3 = vld [vmem:[%s3003_s18 + $0x8] ss:$16 sps:$4 sm:$0xff]  }
 0x46c   : > { %v2419_v57 = vmul.f32 -1.442695, %v1427_v37  ;;  %v1384_v43 = vpop.f32.mrb[35].mxu0  ;;  %v1425_v60 = vpop.f32.mrb[35].mxu1  ;;  %v3595_v44 = vld [vmem:[%s3003_s18 + $0x2c] ss:$16 sps:$4 sm:$0xff]  }
 0x46d   : > { %v2420_v45 = vmul.f32 -1.442695, %v1428_v33  ;;  %v2421_v46 = vmul.f32 -1.442695, %v1430_v30  ;;  %v3583_v33 = vld [vmem:[%s3003_s18] ss:$16 sps:$4 sm:$0xff]  }
 0x46e   : > { %2646 = vpow2.f32 %v2419_v57  ;;  %v3591_v30 = vld [vmem:[%s3003_s18 + $0x24] ss:$16 sps:$4 sm:$0xff]   ;;  %v3601_v52 = vld [vmem:[%s3003_s18 + $0x20] ss:$16 sps:$4 sm:$0xff]   ;;  %v3605_v57 = vld [vmem:[%s3003_s18 + $0x28] ss:$16 sps:$4 sm:$0xff]  }
 0x46f   : > { %2648 = vpow2.f32 %v2420_v45  ;;  %v3609_v43 = vld [vmem:[%s3003_s18 + $0x44] ss:$16 sps:$4 sm:$0xff]   ;;  %v3613_v60 = vld [vmem:[%s3003_s18 + $0x4c] ss:$16 sps:$4 sm:$0xff]   ;;  %v3617_v45 = vld [vmem:[%s3003_s18 + $0x40] ss:$16 sps:$4 sm:$0xff]  }
 0x470   : > { %2650 = vpow2.f32 %v2421_v46  ;;  %v3621_v46 = vld [vmem:[%s3003_s18 + $0x48] ss:$16 sps:$4 sm:$0xff]  }
 0x471   : > { %2652 = vtanh.f32 %v1429_v9 }
 0x478   : > { %v2647_v8 = vpop.eup %2646 }
 0x479   : > { %v2649_v15 = vpop.eup %2648  ;;  %v1440_v29 = vadd.f32 1.0, %v2647_v8  ;;  %v3625_v8 = vld [vmem:[%s3003_s18 + $0x64] ss:$16 sps:$4 sm:$0xff]  }
 0x47a   : > { %v1441_v21 = vadd.f32 1.0, %v2649_v15  ;;  %v2651_v12 = vpop.eup %2650  ;;  %v3629_v15 = vld [vmem:[%s3003_s18 + $0x6c] ss:$16 sps:$4 sm:$0xff]  }
 0x47b   : > { %2654 = vrcp.f32 %v1440_v29  ;;  %v2653_v27 = vpop.eup %2652  ;;  %v1442_v35 = vadd.f32 1.0, %v2651_v12  ;;  %v3633_v29 = vld [vmem:[%s3003_s18 + $0x60] ss:$16 sps:$4 sm:$0xff]   ;;  %v3641_v12 = vld [vmem:[%s3003_s18 + $0x84] ss:$16 sps:$4 sm:$0xff]  }
 0x47c   : > { %2656 = vrcp.f32 %v1441_v21  ;;  %v3637_v21 = vld [vmem:[%s3003_s18 + $0x68] ss:$16 sps:$4 sm:$0xff]  }
 0x47d   : > { %2658 = vrcp.f32 %v1442_v35  ;;  %v3661_v35 = vld [vmem:[%s3003_s18 + $0xac] ss:$16 sps:$4 sm:$0xff]  }
 0x485   : > { %v2655_v54 = vpop.eup %2654 }
 0x486   : > { %v2657_v61 = vpop.eup %2656  ;;  %v1451_v25 = vmul.f32 %v2655_v54, %v2653_v27  ;;  %v3645_v27 = vld [vmem:[%s3003_s18 + $0x8c] ss:$16 sps:$4 sm:$0xff]   ;;  %v3649_v54 = vld [vmem:[%s3003_s18 + $0x80] ss:$16 sps:$4 sm:$0xff]  }
 0x487   : > { %v1450_v36 = vmul.f32 %v2657_v61, %v3489_v34  ;;  %v2659_v31 = vpop.eup %2658  ;;  %v3653_v61 = vld [vmem:[%s3003_s18 + $0x88] ss:$16 sps:$4 sm:$0xff]  }
 0x489   : > { %v3531_v38 = vadd.f32 %v1451_v25, %v1450_v36  ;;  %v3657_v25 = vld [vmem:[%s3003_s18 + $0xa4] ss:$16 sps:$4 sm:$0xff]   ;;  %v3665_v36 = vld [vmem:[%s3003_s18 + $0xa0] ss:$16 sps:$4 sm:$0xff]  }
 0x48b   : > { %2660 = vtanh.f32 %v3531_v38 }
 0x495   : > { %v2661_v39 = vpop.eup %2660 }
 0x496   : > { %v1454_v32 = vmul.f32 %v2661_v39, %v2659_v31  ;;  %v3673_v31 = vld [vmem:[%s3003_s18 + $0xc4] ss:$16 sps:$4 sm:$0xff]   ;;  %v3677_v39 = vld [vmem:[%s3003_s18 + $0xcc] ss:$16 sps:$4 sm:$0xff]  }
 0x498   : > { %1456 = vst [vmem:[#allocation2 + $0x18] sm:$0xff] %v1454_v32  ;;  %v1462_v41 = vpack.c.bf16 %v1454_v32, %v1454_v32  ;;  %v3681_v32 = vld [vmem:[%s3003_s18 + $0xc0] ss:$16 sps:$4 sm:$0xff]  }
 0x49a   : > { %1496 = vmatmul.mubr.bf16.vlgmr.msra.gmra.mrb[36].mxu0 %v1462_v41  ;;  %1537 = vmatmul.mubr.bf16.vlgmr.msra.gmra.mrb[36].mxu1 %v1462_v41  ;;  %v3685_v41 = vld [vmem:[%s3003_s18 + $0xc8] ss:$16 sps:$4 sm:$0xff]  }
 0x49b   : > { %1582 = vmatpush1.bf16.msra.mxu0 %v3103_v48  ;;  %1623 = vmatpush1.bf16.msra.mxu1 %v3111_v50  ;;  %v3567_v48 = vld [vmem:[%s3003_s18 + $0x4] ss:$16 sps:$4 sm:$0xff]  }
 0x49c   : > { %1583 = vmatprep.subr.bf16.mxu0 %v3107_v49  ;;  %1624 = vmatprep.subr.bf16.mxu1 %v3117_v53  ;;  %v3571_v49 = vld [vmem:[%s3003_s18 + $0xc] ss:$16 sps:$4 sm:$0xff]  }
 0x49d   : > { %1613 = vmatprep.mubr.bf16.mxu0 %v3897_v20  ;;  %1654 = vmatprep.mubr.bf16.mxu1 %v3897_v20  ;;  %v3901_v53 = vld [vmem:[#allocation10_spill] sm:$0xff] }
 0x49f   : > { %1584 = vmatpush1.bf16.msra.mxu0 %v3114_v51  ;;  %1625 = vmatpush1.bf16.msra.mxu1 %v3128_v56  ;;  %v3902_v56 = vld [vmem:[#allocation11_spill] sm:$0xff] }
 0x4a0   : > { %1585 = vmatprep.subr.bf16.mxu0 %v3124_v55  ;;  %1626 = vmatprep.subr.bf16.mxu1 %v3141_v62 }
 0x4a3   : > { %1586 = vmatpush1.bf16.msra.mxu0 %v3133_v58  ;;  %1627 = vmatpush1.bf16.msra.mxu1 %v3144_v63  ;;  %v3903_v63 = vld [vmem:[#allocation12_spill] sm:$0xff] }
 0x4a4   : > { %1587 = vmatprep.subr.bf16.mxu0 %v3137_v59  ;;  %1628 = vmatprep.subr.bf16.mxu1 %v3152_v1  ;;  %v3904_v1 = vld [vmem:[#allocation13_spill] sm:$0xff] }
 0x4a7   : > { %1588 = vmatpush1.bf16.msra.mxu0 %v3149_v0  ;;  %1629 = vmatpush1.bf16.msra.mxu1 %v3167_v5 }
 0x4a8   : > { %1589 = vmatprep.subr.bf16.mxu0 %v3157_v2  ;;  %1630 = vmatprep.subr.bf16.mxu1 %v3171_v6 }
 0x4ab   : > { %1590 = vmatpush1.bf16.msra.mxu0 %v3164_v4  ;;  %1631 = vmatpush1.bf16.msra.mxu1 %v3179_v10 }
 0x4ac   : > { %1591 = vmatprep.subr.bf16.mxu0 %v3174_v7  ;;  %1632 = vmatprep.subr.bf16.mxu1 %v3187_v13 }
 0x4af   : > { %1592 = vmatpush1.bf16.msra.mxu0 %v3182_v11  ;;  %1633 = vmatpush1.bf16.msra.mxu1 %v3197_v16 }
 0x4b0   : > { %1593 = vmatprep.subr.bf16.mxu0 %v3190_v14  ;;  %1634 = vmatprep.subr.bf16.mxu1 %v3205_v18 }
 0x4b3   : > { %1594 = vmatpush1.bf16.msra.mxu0 %v3202_v17  ;;  %1635 = vmatpush1.bf16.msra.mxu1 %v3213_v22 }
 0x4b4   : > { %1595 = vmatprep.subr.bf16.mxu0 %v3208_v19  ;;  %1636 = vmatprep.subr.bf16.mxu1 %v3221_v24 }
 0x4b7   : > { %1596 = vmatpush1.bf16.msra.mxu0 %v3218_v23  ;;  %1637 = vmatpush1.bf16.msra.mxu1 %v3227_v26 }
 0x4b8   : > { %1699 = vmatprep.subr.bf16.mxu0 %v3567_v48  ;;  %1740 = vmatprep.subr.bf16.mxu1 %v3571_v49 }
 0x56d   : > { %v1497_v50 = vpop.f32.mrb[36].mxu0  ;;  %v1538_v51 = vpop.f32.mrb[36].mxu1 }
 0x56e   : > { %v1545_v55 = vadd.f32 %v1497_v50, %v3901_v53  ;;  %v1547_v58 = vadd.f32 %v1538_v51, %v3902_v56  ;;  %v1499_v59 = vpop.f32.mrb[37].mxu0  ;;  %v1540_v62 = vpop.f32.mrb[37].mxu1  ;;  %v3689_v50 = vld [vmem:[%s3003_s18 + $0xe4] ss:$16 sps:$4 sm:$0xff]   ;;  %v3693_v51 = vld [vmem:[%s3003_s18 + $0xec] ss:$16 sps:$4 sm:$0xff]  }
 0x56f   : > { %v1546_v0 = vadd.f32 %v1499_v59, %v3903_v63  ;;  %v1548_v2 = vadd.f32 %v1540_v62, %v3904_v1  ;;  %v1501_v4 = vpop.f32.mrb[38].mxu0  ;;  %v1542_v5 = vpop.f32.mrb[38].mxu1  ;;  %v3697_v53 = vld [vmem:[%s3003_s18 + $0xe0] ss:$16 sps:$4 sm:$0xff]   ;;  %v3905_v59 = vld [vmem:[#allocation14_spill] sm:$0xff] }
 0x570   : > { %v2422_v6 = vmul.f32 -1.442695, %v1545_v55  ;;  %v1502_v7 = vpop.f32.mrb[39].mxu0  ;;  %v1543_v10 = vpop.f32.mrb[39].mxu1  ;;  %v3701_v55 = vld [vmem:[%s3003_s18 + $0xe8] ss:$16 sps:$4 sm:$0xff]  }
 0x571   : > { %v2423_v11 = vmul.f32 -1.442695, %v1546_v0  ;;  %v2424_v13 = vmul.f32 -1.442695, %v1548_v2  ;;  %v3906_v63 = vld [vmem:[#allocation15_spill] sm:$0xff]  ;;  %v3907_v4 = vld [vmem:[#allocation16_spill] sm:$0xff] }
 0x572   : > { %2662 = vpow2.f32 %v2422_v6  ;;  %v3908_v6 = vld [vmem:[#allocation17_spill] sm:$0xff] }
 0x573   : > { %2664 = vpow2.f32 %v2423_v11 }
 0x574   : > { %2666 = vpow2.f32 %v2424_v13 }
 0x575   : > { %2668 = vtanh.f32 %v1547_v58 }
 0x57c   : > { %v2663_v14 = vpop.eup %2662 }
 0x57d   : > { %v2665_v16 = vpop.eup %2664  ;;  %v1558_v17 = vadd.f32 1.0, %v2663_v14 }
 0x57e   : > { %v1559_v18 = vadd.f32 1.0, %v2665_v16  ;;  %v2667_v19 = vpop.eup %2666 }
 0x57f   : > { %2670 = vrcp.f32 %v1558_v17  ;;  %v2669_v22 = vpop.eup %2668  ;;  %v1560_v34 = vadd.f32 1.0, %v2667_v19 }
 0x580   : > { %2672 = vrcp.f32 %v1559_v18 }
 0x581   : > { %2674 = vrcp.f32 %v1560_v34 }
 0x589   : > { %v2671_v23 = vpop.eup %2670 }
 0x58a   : > { %v2673_v24 = vpop.eup %2672  ;;  %v1569_v26 = vmul.f32 %v2671_v23, %v2669_v22 }
 0x58b   : > { %v1568_v37 = vmul.f32 %v2673_v24, %v3531_v38  ;;  %v2675_v9 = vpop.eup %2674  ;;  %v3669_v38 = vld [vmem:[%s3003_s18 + $0xa8] ss:$16 sps:$4 sm:$0xff]  }
 0x58d   : > { %v3579_v40 = vadd.f32 %v1569_v26, %v1568_v37 }
 0x58f   : > { %2676 = vtanh.f32 %v3579_v40 }
 0x599   : > { %v2677_v28 = vpop.eup %2676 }
 0x59a   : > { %v1572_v47 = vmul.f32 %v2677_v28, %v2675_v9 }
 0x59c   : > { %1574 = vst [vmem:[#allocation2 + $0x20] sm:$0xff] %v1572_v47  ;;  %v1580_v42 = vpack.c.bf16 %v1572_v47, %v1572_v47 }
 0x59e   : > { %1614 = vmatmul.mubr.bf16.vlgmr.msra.gmra.mrb[40].mxu0 %v1580_v42  ;;  %1655 = vmatmul.mubr.bf16.vlgmr.msra.gmra.mrb[40].mxu1 %v1580_v42 }
 0x59f   : > { %1700 = vmatpush1.bf16.msra.mxu0 %v3583_v33  ;;  %1741 = vmatpush1.bf16.msra.mxu1 %v3587_v3 }
 0x5a0   : > { %1701 = vmatprep.subr.bf16.mxu0 %v3591_v30  ;;  %1742 = vmatprep.subr.bf16.mxu1 %v3595_v44 }
 0x5a1   : > { %1731 = vmatprep.mubr.bf16.mxu0 %v3897_v20  ;;  %1772 = vmatprep.mubr.bf16.mxu1 %v3897_v20 }
 0x5a3   : > { %1702 = vmatpush1.bf16.msra.mxu0 %v3601_v52  ;;  %1743 = vmatpush1.bf16.msra.mxu1 %v3605_v57 }
 0x5a4   : > { %1703 = vmatprep.subr.bf16.mxu0 %v3609_v43  ;;  %1744 = vmatprep.subr.bf16.mxu1 %v3613_v60 }
 0x5a7   : > { %1704 = vmatpush1.bf16.msra.mxu0 %v3617_v45  ;;  %1745 = vmatpush1.bf16.msra.mxu1 %v3621_v46 }
 0x5a8   : > { %1705 = vmatprep.subr.bf16.mxu0 %v3625_v8  ;;  %1746 = vmatprep.subr.bf16.mxu1 %v3629_v15 }
 0x5ab   : > { %1706 = vmatpush1.bf16.msra.mxu0 %v3633_v29  ;;  %1747 = vmatpush1.bf16.msra.mxu1 %v3637_v21 }
 0x5ac   : > { %1707 = vmatprep.subr.bf16.mxu0 %v3641_v12  ;;  %1748 = vmatprep.subr.bf16.mxu1 %v3645_v27 }
 0x5af   : > { %1708 = vmatpush1.bf16.msra.mxu0 %v3649_v54  ;;  %1749 = vmatpush1.bf16.msra.mxu1 %v3653_v61 }
 0x5b0   : > { %1709 = vmatprep.subr.bf16.mxu0 %v3657_v25  ;;  %1750 = vmatprep.subr.bf16.mxu1 %v3661_v35 }
 0x5b3   : > { %1710 = vmatpush1.bf16.msra.mxu0 %v3665_v36  ;;  %1751 = vmatpush1.bf16.msra.mxu1 %v3669_v38 }
 0x5b4   : > { %1711 = vmatprep.subr.bf16.mxu0 %v3673_v31  ;;  %1752 = vmatprep.subr.bf16.mxu1 %v3677_v39 }
 0x5b7   : > { %1712 = vmatpush1.bf16.msra.mxu0 %v3681_v32  ;;  %1753 = vmatpush1.bf16.msra.mxu1 %v3685_v41 }
 0x5b8   : > { %1713 = vmatprep.subr.bf16.mxu0 %v3689_v50  ;;  %1754 = vmatprep.subr.bf16.mxu1 %v3693_v51 }
 0x5bb   : > { %1714 = vmatpush1.bf16.msra.mxu0 %v3697_v53  ;;  %1755 = vmatpush1.bf16.msra.mxu1 %v3701_v55 }
 0x5bc   : > { %1817 = vmatprep.subr.bf16.mxu0 %v3567_v48  ;;  %1858 = vmatprep.subr.bf16.mxu1 %v3571_v49 }
 0x671   : > { %v1615_v56 = vpop.f32.mrb[40].mxu0  ;;  %v1656_v58 = vpop.f32.mrb[40].mxu1 }
 0x672   : > { %v1663_v62 = vadd.f32 %v1615_v56, %v3905_v59  ;;  %v1665_v0 = vadd.f32 %v1656_v58, %v3906_v63  ;;  %v1617_v1 = vpop.f32.mrb[41].mxu0  ;;  %v1658_v2 = vpop.f32.mrb[41].mxu1 }
 0x673   : > { %v1664_v5 = vadd.f32 %v1617_v1, %v3907_v4  ;;  %v1666_v7 = vadd.f32 %v1658_v2, %v3908_v6  ;;  %v1619_v10 = vpop.f32.mrb[42].mxu0  ;;  %v1660_v11 = vpop.f32.mrb[42].mxu1  ;;  %v3909_v1 = vld [vmem:[#allocation18_spill] sm:$0xff]  ;;  %v3910_v4 = vld [vmem:[#allocation19_spill] sm:$0xff] }
 0x674   : > { %v2425_v13 = vmul.f32 -1.442695, %v1663_v62  ;;  %v1620_v14 = vpop.f32.mrb[43].mxu0  ;;  %v1661_v16 = vpop.f32.mrb[43].mxu1  ;;  %v3911_v10 = vld [vmem:[#allocation20_spill] sm:$0xff] }
 0x675   : > { %v2426_v17 = vmul.f32 -1.442695, %v1664_v5  ;;  %v2427_v18 = vmul.f32 -1.442695, %v1666_v7 }
 0x676   : > { %2678 = vpow2.f32 %v2425_v13  ;;  %v3912_v13 = vld [vmem:[#allocation21_spill] sm:$0xff] }
 0x677   : > { %2680 = vpow2.f32 %v2426_v17 }
 0x678   : > { %2682 = vpow2.f32 %v2427_v18 }
 0x679   : > { %2684 = vtanh.f32 %v1665_v0 }
 0x680   : > { %v2679_v19 = vpop.eup %2678 }
 0x681   : > { %v2681_v22 = vpop.eup %2680  ;;  %v1676_v23 = vadd.f32 1.0, %v2679_v19 }
 0x682   : > { %v1677_v24 = vadd.f32 1.0, %v2681_v22  ;;  %v2683_v26 = vpop.eup %2682 }
 0x683   : > { %2686 = vrcp.f32 %v1676_v23  ;;  %v2685_v34 = vpop.eup %2684  ;;  %v1678_v47 = vadd.f32 1.0, %v2683_v26 }
 0x684   : > { %2688 = vrcp.f32 %v1677_v24 }
 0x685   : > { %2690 = vrcp.f32 %v1678_v47 }
 0x68d   : > { %v2687_v37 = vpop.eup %2686 }
 0x68e   : > { %v2689_v9 = vpop.eup %2688  ;;  %v1687_v28 = vmul.f32 %v2687_v37, %v2685_v34 }
 0x68f   : > { %v1686_v42 = vmul.f32 %v2689_v9, %v3579_v40  ;;  %v2691_v58 = vpop.eup %2690 }
 0x691   : > { %v3711_v56 = vadd.f32 %v1687_v28, %v1686_v42 }
 0x693   : > { %2692 = vtanh.f32 %v3711_v56 }
 0x69d   : > { %v2693_v59 = vpop.eup %2692 }
 0x69e   : > { %v1690_v62 = vmul.f32 %v2693_v59, %v2691_v58 }
 0x6a0   : > { %1692 = vst [vmem:[#allocation2 + $0x28] sm:$0xff] %v1690_v62  ;;  %v1698_v63 = vpack.c.bf16 %v1690_v62, %v1690_v62 }
 0x6a2   : > { %1732 = vmatmul.mubr.bf16.vlgmr.msra.gmra.mrb[44].mxu0 %v1698_v63  ;;  %1773 = vmatmul.mubr.bf16.vlgmr.msra.gmra.mrb[44].mxu1 %v1698_v63 }
 0x6a3   : > { %1818 = vmatpush1.bf16.msra.mxu0 %v3583_v33  ;;  %1859 = vmatpush1.bf16.msra.mxu1 %v3587_v3 }
 0x6a4   : > { %1819 = vmatprep.subr.bf16.mxu0 %v3591_v30  ;;  %1860 = vmatprep.subr.bf16.mxu1 %v3595_v44 }
 0x6a5   : > { %1849 = vmatprep.mubr.bf16.mxu0 %v3897_v20  ;;  %1890 = vmatprep.mubr.bf16.mxu1 %v3897_v20 }
 0x6a7   : > { %1820 = vmatpush1.bf16.msra.mxu0 %v3601_v52  ;;  %1861 = vmatpush1.bf16.msra.mxu1 %v3605_v57 }
 0x6a8   : > { %1821 = vmatprep.subr.bf16.mxu0 %v3609_v43  ;;  %1862 = vmatprep.subr.bf16.mxu1 %v3613_v60 }
 0x6ab   : > { %1822 = vmatpush1.bf16.msra.mxu0 %v3617_v45  ;;  %1863 = vmatpush1.bf16.msra.mxu1 %v3621_v46 }
 0x6ac   : > { %1823 = vmatprep.subr.bf16.mxu0 %v3625_v8  ;;  %1864 = vmatprep.subr.bf16.mxu1 %v3629_v15 }
 0x6af   : > { %1824 = vmatpush1.bf16.msra.mxu0 %v3633_v29  ;;  %1865 = vmatpush1.bf16.msra.mxu1 %v3637_v21 }
 0x6b0   : > { %1825 = vmatprep.subr.bf16.mxu0 %v3641_v12  ;;  %1866 = vmatprep.subr.bf16.mxu1 %v3645_v27 }
 0x6b3   : > { %1826 = vmatpush1.bf16.msra.mxu0 %v3649_v54  ;;  %1867 = vmatpush1.bf16.msra.mxu1 %v3653_v61 }
 0x6b4   : > { %1827 = vmatprep.subr.bf16.mxu0 %v3657_v25  ;;  %1868 = vmatprep.subr.bf16.mxu1 %v3661_v35 }
 0x6b7   : > { %1828 = vmatpush1.bf16.msra.mxu0 %v3665_v36  ;;  %1869 = vmatpush1.bf16.msra.mxu1 %v3669_v38 }
 0x6b8   : > { %1829 = vmatprep.subr.bf16.mxu0 %v3673_v31  ;;  %1870 = vmatprep.subr.bf16.mxu1 %v3677_v39 }
 0x6bb   : > { %1830 = vmatpush1.bf16.msra.mxu0 %v3681_v32  ;;  %1871 = vmatpush1.bf16.msra.mxu1 %v3685_v41 }
 0x6bc   : > { %1831 = vmatprep.subr.bf16.mxu0 %v3689_v50  ;;  %1872 = vmatprep.subr.bf16.mxu1 %v3693_v51 }
 0x6bf   : > { %1832 = vmatpush1.bf16.msra.mxu0 %v3697_v53  ;;  %1873 = vmatpush1.bf16.msra.mxu1 %v3701_v55 }
 0x6c0   : > { %1935 = vmatprep.subr.bf16.mxu0 %v3567_v48  ;;  %1976 = vmatprep.subr.bf16.mxu1 %v3571_v49 }
 0x775   : > { %v1733_v40 = vpop.f32.mrb[44].mxu0  ;;  %v1774_v0 = vpop.f32.mrb[44].mxu1 }
 0x776   : > { %v1781_v2 = vadd.f32 %v1733_v40, %v3909_v1  ;;  %v1783_v5 = vadd.f32 %v1774_v0, %v3910_v4  ;;  %v1735_v6 = vpop.f32.mrb[45].mxu0  ;;  %v1776_v7 = vpop.f32.mrb[45].mxu1 }
 0x777   : > { %v1782_v11 = vadd.f32 %v1735_v6, %v3911_v10  ;;  %v1784_v14 = vadd.f32 %v1776_v7, %v3912_v13  ;;  %v1737_v16 = vpop.f32.mrb[46].mxu0  ;;  %v1778_v17 = vpop.f32.mrb[46].mxu1  ;;  %v3913_v6 = vld [vmem:[#allocation22_spill] sm:$0xff]  ;;  %v3914_v10 = vld [vmem:[#allocation23_spill] sm:$0xff] }
 0x778   : > { %v2428_v18 = vmul.f32 -1.442695, %v1781_v2  ;;  %v1738_v19 = vpop.f32.mrb[47].mxu0  ;;  %v1779_v22 = vpop.f32.mrb[47].mxu1  ;;  %v3915_v16 = vld [vmem:[#allocation24_spill] sm:$0xff] }
 0x779   : > { %v2429_v23 = vmul.f32 -1.442695, %v1782_v11  ;;  %v2430_v24 = vmul.f32 -1.442695, %v1784_v14 }
 0x77a   : > { %2694 = vpow2.f32 %v2428_v18  ;;  %v3916_v18 = vld [vmem:[#allocation25_spill] sm:$0xff] }
 0x77b   : > { %2696 = vpow2.f32 %v2429_v23 }
 0x77c   : > { %2698 = vpow2.f32 %v2430_v24 }
 0x77d   : > { %2700 = vtanh.f32 %v1783_v5 }
 0x784   : > { %v2695_v26 = vpop.eup %2694 }
 0x785   : > { %v2697_v34 = vpop.eup %2696  ;;  %v1794_v37 = vadd.f32 1.0, %v2695_v26 }
 0x786   : > { %v1795_v9 = vadd.f32 1.0, %v2697_v34  ;;  %v2699_v28 = vpop.eup %2698 }
 0x787   : > { %2702 = vrcp.f32 %v1794_v37  ;;  %v2701_v47 = vpop.eup %2700  ;;  %v1796_v62 = vadd.f32 1.0, %v2699_v28 }
 0x788   : > { %2704 = vrcp.f32 %v1795_v9 }
 0x789   : > { %2706 = vrcp.f32 %v1796_v62 }
 0x791   : > { %v2703_v42 = vpop.eup %2702 }
 0x792   : > { %v2705_v58 = vpop.eup %2704  ;;  %v1805_v59 = vmul.f32 %v2703_v42, %v2701_v47 }
 0x793   : > { %v1804_v63 = vmul.f32 %v2705_v58, %v3711_v56  ;;  %v2707_v0 = vpop.eup %2706 }
 0x795   : > { %v3753_v40 = vadd.f32 %v1805_v59, %v1804_v63 }
 0x797   : > { %2708 = vtanh.f32 %v3753_v40 }
 0x7a1   : > { %v2709_v1 = vpop.eup %2708 }
 0x7a2   : > { %v1808_v2 = vmul.f32 %v2709_v1, %v2707_v0 }
 0x7a4   : > { %1810 = vst [vmem:[#allocation2 + $0x30] sm:$0xff] %v1808_v2  ;;  %v1816_v4 = vpack.c.bf16 %v1808_v2, %v1808_v2 }
 0x7a6   : > { %1850 = vmatmul.mubr.bf16.vlgmr.msra.gmra.mrb[48].mxu0 %v1816_v4  ;;  %1891 = vmatmul.mubr.bf16.vlgmr.msra.gmra.mrb[48].mxu1 %v1816_v4 }
 0x7a7   : > { %1936 = vmatpush1.bf16.msra.mxu0 %v3583_v33  ;;  %1977 = vmatpush1.bf16.msra.mxu1 %v3587_v3 }
 0x7a8   : > { %1937 = vmatprep.subr.bf16.mxu0 %v3591_v30  ;;  %1978 = vmatprep.subr.bf16.mxu1 %v3595_v44 }
 0x7a9   : > { %1967 = vmatprep.mubr.bf16.mxu0 %v3897_v20  ;;  %2008 = vmatprep.mubr.bf16.mxu1 %v3897_v20 }
 0x7ab   : > { %1938 = vmatpush1.bf16.msra.mxu0 %v3601_v52  ;;  %1979 = vmatpush1.bf16.msra.mxu1 %v3605_v57 }
 0x7ac   : > { %1939 = vmatprep.subr.bf16.mxu0 %v3609_v43  ;;  %1980 = vmatprep.subr.bf16.mxu1 %v3613_v60 }
 0x7af   : > { %1940 = vmatpush1.bf16.msra.mxu0 %v3617_v45  ;;  %1981 = vmatpush1.bf16.msra.mxu1 %v3621_v46 }
 0x7b0   : > { %1941 = vmatprep.subr.bf16.mxu0 %v3625_v8  ;;  %1982 = vmatprep.subr.bf16.mxu1 %v3629_v15 }
 0x7b3   : > { %1942 = vmatpush1.bf16.msra.mxu0 %v3633_v29  ;;  %1983 = vmatpush1.bf16.msra.mxu1 %v3637_v21 }
 0x7b4   : > { %1943 = vmatprep.subr.bf16.mxu0 %v3641_v12  ;;  %1984 = vmatprep.subr.bf16.mxu1 %v3645_v27 }
 0x7b7   : > { %1944 = vmatpush1.bf16.msra.mxu0 %v3649_v54  ;;  %1985 = vmatpush1.bf16.msra.mxu1 %v3653_v61 }
 0x7b8   : > { %1945 = vmatprep.subr.bf16.mxu0 %v3657_v25  ;;  %1986 = vmatprep.subr.bf16.mxu1 %v3661_v35 }
 0x7bb   : > { %1946 = vmatpush1.bf16.msra.mxu0 %v3665_v36  ;;  %1987 = vmatpush1.bf16.msra.mxu1 %v3669_v38 }
 0x7bc   : > { %1947 = vmatprep.subr.bf16.mxu0 %v3673_v31  ;;  %1988 = vmatprep.subr.bf16.mxu1 %v3677_v39 }
 0x7bf   : > { %1948 = vmatpush1.bf16.msra.mxu0 %v3681_v32  ;;  %1989 = vmatpush1.bf16.msra.mxu1 %v3685_v41 }
 0x7c0   : > { %1949 = vmatprep.subr.bf16.mxu0 %v3689_v50  ;;  %1990 = vmatprep.subr.bf16.mxu1 %v3693_v51 }
 0x7c3   : > { %1950 = vmatpush1.bf16.msra.mxu0 %v3697_v53  ;;  %1991 = vmatpush1.bf16.msra.mxu1 %v3701_v55 }
 0x7c4   : > { %2053 = vmatprep.subr.bf16.mxu0 %v3567_v48  ;;  %2094 = vmatprep.subr.bf16.mxu1 %v3571_v49 }
 0x879   : > { %v1851_v56 = vpop.f32.mrb[48].mxu0  ;;  %v1892_v5 = vpop.f32.mrb[48].mxu1 }
 0x87a   : > { %v1899_v7 = vadd.f32 %v1851_v56, %v3913_v6  ;;  %v1901_v11 = vadd.f32 %v1892_v5, %v3914_v10  ;;  %v1853_v13 = vpop.f32.mrb[49].mxu0  ;;  %v1894_v14 = vpop.f32.mrb[49].mxu1 }
 0x87b   : > { %v1900_v17 = vadd.f32 %v1853_v13, %v3915_v16  ;;  %v1902_v19 = vadd.f32 %v1894_v14, %v3916_v18  ;;  %v1855_v22 = vpop.f32.mrb[50].mxu0  ;;  %v1896_v23 = vpop.f32.mrb[50].mxu1  ;;  %v3921_v16 = vld [vmem:[#allocation30_spill] sm:$0xff]  ;;  %v3922_v18 = vld [vmem:[#allocation31_spill] sm:$0xff] }
 0x87c   : > { %v2431_v24 = vmul.f32 -1.442695, %v1899_v7  ;;  %v1856_v26 = vpop.f32.mrb[51].mxu0  ;;  %v1897_v34 = vpop.f32.mrb[51].mxu1 }
 0x87d   : > { %v2432_v48 = vmul.f32 -1.442695, %v1900_v17  ;;  %v2433_v49 = vmul.f32 -1.442695, %v1902_v19  ;;  %v3924_v34 = vld [vmem:[#allocation33_spill] sm:$0xff] }
 0x87e   : > { %2710 = vpow2.f32 %v2431_v24  ;;  %v3923_v24 = vld [vmem:[#allocation32_spill] sm:$0xff] }
 0x87f   : > { %2712 = vpow2.f32 %v2432_v48 }
 0x880   : > { %2714 = vpow2.f32 %v2433_v49 }
 0x881   : > { %2716 = vtanh.f32 %v1901_v11 }
 0x888   : > { %v2711_v37 = vpop.eup %2710 }
 0x889   : > { %v2713_v9 = vpop.eup %2712  ;;  %v1912_v28 = vadd.f32 1.0, %v2711_v37 }
 0x88a   : > { %v1913_v47 = vadd.f32 1.0, %v2713_v9  ;;  %v2715_v42 = vpop.eup %2714 }
 0x88b   : > { %2718 = vrcp.f32 %v1912_v28  ;;  %v2717_v58 = vpop.eup %2716  ;;  %v1914_v0 = vadd.f32 1.0, %v2715_v42 }
 0x88c   : > { %2720 = vrcp.f32 %v1913_v47 }
 0x88d   : > { %2722 = vrcp.f32 %v1914_v0 }
 0x895   : > { %v2719_v59 = vpop.eup %2718 }
 0x896   : > { %v2721_v62 = vpop.eup %2720  ;;  %v1923_v63 = vmul.f32 %v2719_v59, %v2717_v58 }
 0x897   : > { %v1922_v1 = vmul.f32 %v2721_v62, %v3753_v40  ;;  %v2723_v4 = vpop.eup %2722 }
 0x899   : > { %v3795_v2 = vadd.f32 %v1923_v63, %v1922_v1 }
 0x89b   : > { %2724 = vtanh.f32 %v3795_v2 }
 0x8a5   : > { %v2725_v56 = vpop.eup %2724 }
 0x8a6   : > { %v1926_v5 = vmul.f32 %v2725_v56, %v2723_v4 }
 0x8a8   : > { %1928 = vst [vmem:[#allocation2 + $0x38] sm:$0xff] %v1926_v5  ;;  %v1934_v6 = vpack.c.bf16 %v1926_v5, %v1926_v5 }
 0x8aa   : > { %1968 = vmatmul.mubr.bf16.vlgmr.msra.gmra.mrb[52].mxu0 %v1934_v6  ;;  %2009 = vmatmul.mubr.bf16.vlgmr.msra.gmra.mrb[52].mxu1 %v1934_v6 }
 0x8ab   : > { %2054 = vmatpush1.bf16.msra.mxu0 %v3583_v33  ;;  %2095 = vmatpush1.bf16.msra.mxu1 %v3587_v3  ;;  %v3917_v3 = vld [vmem:[#allocation26_spill] sm:$0xff] }
 0x8ac   : > { %2055 = vmatprep.subr.bf16.mxu0 %v3591_v30  ;;  %2096 = vmatprep.subr.bf16.mxu1 %v3595_v44  ;;  %v3918_v44 = vld [vmem:[#allocation27_spill] sm:$0xff] }
 0x8ad   : > { %2085 = vmatprep.mubr.bf16.mxu0 %v3897_v20  ;;  %2126 = vmatprep.mubr.bf16.mxu1 %v3897_v20 }
 0x8af   : > { %2056 = vmatpush1.bf16.msra.mxu0 %v3601_v52  ;;  %2097 = vmatpush1.bf16.msra.mxu1 %v3605_v57 }
 0x8b0   : > { %2057 = vmatprep.subr.bf16.mxu0 %v3609_v43  ;;  %2098 = vmatprep.subr.bf16.mxu1 %v3613_v60  ;;  %v3919_v60 = vld [vmem:[#allocation28_spill] sm:$0xff] }
 0x8b3   : > { %2058 = vmatpush1.bf16.msra.mxu0 %v3617_v45  ;;  %2099 = vmatpush1.bf16.msra.mxu1 %v3621_v46  ;;  %v3920_v46 = vld [vmem:[#allocation29_spill] sm:$0xff] }
 0x8b4   : > { %2059 = vmatprep.subr.bf16.mxu0 %v3625_v8  ;;  %2100 = vmatprep.subr.bf16.mxu1 %v3629_v15 }
 0x8b7   : > { %2060 = vmatpush1.bf16.msra.mxu0 %v3633_v29  ;;  %2101 = vmatpush1.bf16.msra.mxu1 %v3637_v21 }
 0x8b8   : > { %2061 = vmatprep.subr.bf16.mxu0 %v3641_v12  ;;  %2102 = vmatprep.subr.bf16.mxu1 %v3645_v27 }
 0x8bb   : > { %2062 = vmatpush1.bf16.msra.mxu0 %v3649_v54  ;;  %2103 = vmatpush1.bf16.msra.mxu1 %v3653_v61 }
 0x8bc   : > { %2063 = vmatprep.subr.bf16.mxu0 %v3657_v25  ;;  %2104 = vmatprep.subr.bf16.mxu1 %v3661_v35 }
 0x8bf   : > { %2064 = vmatpush1.bf16.msra.mxu0 %v3665_v36  ;;  %2105 = vmatpush1.bf16.msra.mxu1 %v3669_v38 }
 0x8c0   : > { %2065 = vmatprep.subr.bf16.mxu0 %v3673_v31  ;;  %2106 = vmatprep.subr.bf16.mxu1 %v3677_v39 }
 0x8c3   : > { %2066 = vmatpush1.bf16.msra.mxu0 %v3681_v32  ;;  %2107 = vmatpush1.bf16.msra.mxu1 %v3685_v41 }
 0x8c4   : > { %2067 = vmatprep.subr.bf16.mxu0 %v3689_v50  ;;  %2108 = vmatprep.subr.bf16.mxu1 %v3693_v51 }
 0x8c7   : > { %2068 = vmatpush1.bf16.msra.mxu0 %v3697_v53  ;;  %2109 = vmatpush1.bf16.msra.mxu1 %v3701_v55 }
 0x97d   : > { %v1969_v20 = vpop.f32.mrb[52].mxu0  ;;  %v2010_v33 = vpop.f32.mrb[52].mxu1 }
 0x97e   : > { %v2017_v30 = vadd.f32 %v1969_v20, %v3917_v3  ;;  %v2019_v52 = vadd.f32 %v2010_v33, %v3918_v44  ;;  %v1971_v57 = vpop.f32.mrb[53].mxu0  ;;  %v2012_v43 = vpop.f32.mrb[53].mxu1 }
 0x97f   : > { %v2018_v45 = vadd.f32 %v1971_v57, %v3919_v60  ;;  %v2020_v8 = vadd.f32 %v2012_v43, %v3920_v46  ;;  %v1973_v15 = vpop.f32.mrb[54].mxu0  ;;  %v2014_v29 = vpop.f32.mrb[54].mxu1 }
 0x980   : > { %v2434_v21 = vmul.f32 -1.442695, %v2017_v30  ;;  %v1974_v12 = vpop.f32.mrb[55].mxu0  ;;  %v2015_v27 = vpop.f32.mrb[55].mxu1 }
 0x981   : > { %v2435_v54 = vmul.f32 -1.442695, %v2018_v45  ;;  %v2436_v61 = vmul.f32 -1.442695, %v2020_v8 }
 0x982   : > { %2726 = vpow2.f32 %v2434_v21 }
 0x983   : > { %2728 = vpow2.f32 %v2435_v54 }
 0x984   : > { %2730 = vpow2.f32 %v2436_v61 }
 0x985   : > { %2732 = vtanh.f32 %v2019_v52 }
 0x98c   : > { %v2727_v25 = vpop.eup %2726 }
 0x98d   : > { %v2729_v35 = vpop.eup %2728  ;;  %v2030_v36 = vadd.f32 1.0, %v2727_v25 }
 0x98e   : > { %v2031_v38 = vadd.f32 1.0, %v2729_v35  ;;  %v2731_v31 = vpop.eup %2730 }
 0x98f   : > { %2734 = vrcp.f32 %v2030_v36  ;;  %v2733_v39 = vpop.eup %2732  ;;  %v2032_v51 = vadd.f32 1.0, %v2731_v31 }
 0x990   : > { %2736 = vrcp.f32 %v2031_v38 }
 0x991   : > { %2738 = vrcp.f32 %v2032_v51 }
 0x999   : > { %v2735_v32 = vpop.eup %2734 }
 0x99a   : > { %v2737_v41 = vpop.eup %2736  ;;  %v2041_v50 = vmul.f32 %v2735_v32, %v2733_v39 }
 0x99b   : > { %v2040_v53 = vmul.f32 %v2737_v41, %v3795_v2  ;;  %v2739_v40 = vpop.eup %2738 }
 0x99d   : > { %v2042_v55 = vadd.f32 %v2041_v50, %v2040_v53 }
 0x99f   : > { %2740 = vtanh.f32 %v2042_v55 }
 0x9a9   : > { %v2741_v7 = vpop.eup %2740 }
 0x9aa   : > { %v2044_v10 = vmul.f32 %v2741_v7, %v2739_v40 }
 0x9ac   : > { %2046 = vst [vmem:[#allocation2 + $0x40] sm:$0xff] %v2044_v10  ;;  %v2052_v11 = vpack.c.bf16 %v2044_v10, %v2044_v10 }
 0x9ae   : > { %2086 = vmatmul.mubr.bf16.vlgmr.msra.gmra.mrb[56].mxu0 %v2052_v11  ;;  %2127 = vmatmul.mubr.bf16.vlgmr.msra.gmra.mrb[56].mxu1 %v2052_v11 }
 0xa81   : > { %v2087_v13 = vpop.f32.mrb[56].mxu0  ;;  %v2128_v14 = vpop.f32.mrb[56].mxu1 }
 0xa82   : > { %v2135_v17 = vadd.f32 %v2087_v13, %v3921_v16  ;;  %v2137_v19 = vadd.f32 %v2128_v14, %v3922_v18  ;;  %v2089_v22 = vpop.f32.mrb[57].mxu0  ;;  %v2130_v23 = vpop.f32.mrb[57].mxu1 }
 0xa83   : > { %v2136_v26 = vadd.f32 %v2089_v22, %v3923_v24  ;;  %v2138_v48 = vadd.f32 %v2130_v23, %v3924_v34  ;;  %v2091_v49 = vpop.f32.mrb[58].mxu0  ;;  %v2132_v37 = vpop.f32.mrb[58].mxu1 }
 0xa84   : > { %v2437_v9 = vmul.f32 -1.442695, %v2135_v17  ;;  %v2092_v28 = vpop.f32.mrb[59].mxu0  ;;  %v2133_v47 = vpop.f32.mrb[59].mxu1 }
 0xa85   : > { %v2438_v42 = vmul.f32 -1.442695, %v2136_v26  ;;  %v2439_v58 = vmul.f32 -1.442695, %v2138_v48 }
 0xa86   : > { %2742 = vpow2.f32 %v2437_v9 }
 0xa87   : > { %2744 = vpow2.f32 %v2438_v42 }
 0xa88   : > { %2746 = vpow2.f32 %v2439_v58 }
 0xa89   : > { %2748 = vtanh.f32 %v2137_v19 }
 0xa90   : > { %v2743_v59 = vpop.eup %2742 }
 0xa91   : > { %v2745_v62 = vpop.eup %2744  ;;  %v2148_v63 = vadd.f32 1.0, %v2743_v59 }
 0xa92   : > { %v2149_v0 = vadd.f32 1.0, %v2745_v62  ;;  %v2747_v1 = vpop.eup %2746 }
 0xa93   : > { %2750 = vrcp.f32 %v2148_v63  ;;  %v2749_v2 = vpop.eup %2748  ;;  %v2150_v6 = vadd.f32 1.0, %v2747_v1 }
 0xa94   : > { %2752 = vrcp.f32 %v2149_v0 }
 0xa95   : > { %2754 = vrcp.f32 %v2150_v6 }
 0xa9d   : > { %v2751_v4 = vpop.eup %2750 }
 0xa9e   : > { %v2753_v56 = vpop.eup %2752  ;;  %v2159_v5 = vmul.f32 %v2751_v4, %v2749_v2 }
 0xa9f   : > { %v2158_v20 = vmul.f32 %v2753_v56, %v2042_v55  ;;  %v2755_v3 = vpop.eup %2754 }
 0xaa1   : > { %v2160_v33 = vadd.f32 %v2159_v5, %v2158_v20 }
 0xaa3   : > { %2756 = vtanh.f32 %v2160_v33  ;;  %2166 = vst [vmem:[%s3029_s16] sm:$0xff] %v2160_v33 }
 0xaad   : > { %v2757_v30 = vpop.eup %2756 }
 0xaae   : > { %v2162_v44 = vmul.f32 %v2757_v30, %v2755_v3 }
 0xab0   : > { %2164 = vst [vmem:[#allocation2 + $0x48] sm:$0xff] %v2162_v44  ;;  %2165 = vst [vmem:[%s3024_s9] sm:$0xff] %v2162_v44 }
 0xab1 PF: > { %s19_s23 = sadd.s32 1, %s2870_s23   ;;  %s3925_s18 = smov %s2854_s19 }
 0xab2   : > { %p16_p9 = scmp.ge.s32.totalorder %s19_s23, 4   ;;  %s3926_s19 = smov %s2858_s20 }
 0xab3   : > { %s3927_s20 = smov %s2955_s30  ;;  %s3928_s21 = smov %s2866_s22 }
 0xab4   : > { %s3929_s22 = smov %s3931_s25  ;;  %18 = sbr.rel (!%p16_p9) target bundleno = 4 (0x4), region = 119 }
 0xabb   :  { %2212 = vsyncpa [#allocation5], 1 }
 0xabc   :  { %2214 = vsyncpa [#allocation5 + $0x1], 1 }

</bundles_post_ra>
